<compile_context>
chip_gen: v6e
topology: v6e:2x2x1
jax: 0.10.0
libtpu: 0.0.40
codegen_flags: <defaults>
</compile_context>

<pallas_src>
import functools
import math

import jax
import jax.numpy as jnp
import numpy as np
from jax.experimental import pallas as pl
from jax.experimental.pallas import tpu as pltpu

F32 = jnp.float32


# ------------------------- in-kernel building blocks -------------------------

def _mab_attend(Q, K, V, Wo, bo, num_heads, d_v, bias):
    """Core of the GMT MAB (ln=False, cluster=False) on already-projected Q/K/V.

    Q: [Sq, d_v], K/V: [Sk, d_v], bias: [1, Sk] additive mask (0 / -1e9) or None.
    Returns O + relu(O @ Wo + bo) with
      O = concat_h( Q_h + softmax(Q_h K_h^T / sqrt(d_v) + bias) V_h ).
    """
    # TODO(synk): LayerNorm branches omitted (ln=False in this config).
    scale = 1.0 / math.sqrt(d_v)
    d_h = d_v // num_heads
    head_outs = []
    for h in range(num_heads):          # heads stay on the lane axis; static slices
        lo, hi = h * d_h, (h + 1) * d_h
        q, k, v = Q[:, lo:hi], K[:, lo:hi], V[:, lo:hi]
        s = jax.lax.dot_general(q, k, (((1,), (1,)), ((), ())),
                                preferred_element_type=F32) * scale
        if bias is not None:
            s = s + bias
        s = s - jnp.max(s, axis=-1, keepdims=True)      # stable softmax over keys
        e = jnp.exp(s)
        a = e * pl.reciprocal(jnp.sum(e, axis=-1, keepdims=True), approx=True)
        head_outs.append(q + jnp.dot(a, v, preferred_element_type=F32))
    O = jnp.concatenate(head_outs, axis=1)
    O2 = jnp.maximum(jnp.dot(O, Wo, preferred_element_type=F32) + bo, 0.0)
    return O + O2


def _gmt_kernel(off_ref, cnt_ref,                        # SMEM: [B] int32 each
                x_ref, a_ref,                            # [N_pad, F], [N_pad, N_pad]
                g1w_ref, g1b_ref, g2w_ref, g2b_ref,
                s0_ref, p0wq_ref, p0bq_ref, p0wkv_ref, p0bkv_ref, p0wo_ref, p0bo_ref,
                s1wqkv_ref, s1bqkv_ref, s1wo_ref, s1bo_ref,
                s2_ref, p2wq_ref, p2bq_ref, p2wkv_ref, p2bkv_ref, p2wo_ref, p2bo_ref,
                plw_ref, plb_ref,
                c1w_ref, c1b_ref, c2w_ref, c2b_ref, c3w_ref, c3b_ref,
                out_ref, *, B, N_max, num_heads, nhid):
    pool_in = 2 * nhid

    # ---- GCN stack: h_l = relu(A_norm @ (h_{l-1} @ W_l) + b_l); concat layer feats
    x = x_ref[...]
    A = a_ref[...]
    h1 = jnp.maximum(
        jnp.dot(A, jnp.dot(x, g1w_ref[...], preferred_element_type=F32),
                preferred_element_type=F32) + g1b_ref[...], 0.0)
    h2 = jnp.maximum(
        jnp.dot(A, jnp.dot(h1, g2w_ref[...], preferred_element_type=F32),
                preferred_element_type=F32) + g2b_ref[...], 0.0)
    xcat = jnp.concatenate([h1, h2], axis=1)             # [N_pad, pool_in]
    n_pad = xcat.shape[0]

    # hoist all weights once (reused for every graph in the batch)
    s0 = s0_ref[...]
    p0wq, p0bq = p0wq_ref[...], p0bq_ref[...]
    p0wkv, p0bkv = p0wkv_ref[...], p0bkv_ref[...]
    p0wo, p0bo = p0wo_ref[...], p0bo_ref[...]
    s1wqkv, s1bqkv = s1wqkv_ref[...], s1bqkv_ref[...]
    s1wo, s1bo = s1wo_ref[...], s1bo_ref[...]
    s2 = s2_ref[...]
    p2wq, p2bq = p2wq_ref[...], p2bq_ref[...]
    p2wkv, p2bkv = p2wkv_ref[...], p2bkv_ref[...]
    p2wo, p2bo = p2wo_ref[...], p2bo_ref[...]
    plw, plb = plw_ref[...], plb_ref[...]
    c1w, c1b = c1w_ref[...], c1b_ref[...]
    c2w, c2b = c2w_ref[...], c2b_ref[...]
    c3w, c3b = c3w_ref[...], c3b_ref[...]

    # iotas reused for the in-kernel to_dense_batch gather + attention mask
    row_ids = jax.lax.broadcasted_iota(jnp.int32, (N_max, n_pad), 0)
    col_ids = jax.lax.broadcasted_iota(jnp.int32, (N_max, n_pad), 1)
    key_ids = jax.lax.broadcasted_iota(jnp.int32, (1, N_max), 1)

    rows = []
    for b in range(B):                                   # static unroll over graphs
        off = off_ref[b]
        cnt = cnt_ref[b]

        # to_dense_batch for graph b: one-hot gather matrix -> MXU matmul,
        # padded slots (j >= cnt) come out exactly zero.
        sel = jnp.where(
            jnp.logical_and(col_ids == off + row_ids, row_ids < cnt),
            1.0, 0.0).astype(F32)                        # [N_max, N_pad]
        kb = jnp.dot(sel, xcat, preferred_element_type=F32)      # [N_max, pool_in]
        bias = jnp.where(key_ids < cnt, 0.0, -1e9).astype(F32)   # [1, N_max]

        # pool 0: PMA(pool_in, heads, seeds) over the masked dense node set
        # TODO(synk): GMPool_G / mab_conv GNN inside the MAB omitted (mab_conv=None).
        q0 = jnp.dot(s0, p0wq, preferred_element_type=F32) + p0bq
        kv0 = jnp.dot(kb, p0wkv, preferred_element_type=F32) + p0bkv
        x0 = _mab_attend(q0, kv0[:, :pool_in], kv0[:, pool_in:],
                         p0wo, p0bo, num_heads, pool_in, bias)

        # pool 1: SAB(pool_in -> nhid); Q==K==V input -> single fused QKV projection
        qkv1 = jnp.dot(x0, s1wqkv, preferred_element_type=F32) + s1bqkv
        x1 = _mab_attend(qkv1[:, :nhid], qkv1[:, nhid:2 * nhid], qkv1[:, 2 * nhid:],
                         s1wo, s1bo, num_heads, nhid, None)

        # pool 2: PMA(nhid, heads, 1 seed)
        q2 = jnp.dot(s2, p2wq, preferred_element_type=F32) + p2bq
        kv2 = jnp.dot(x1, p2wkv, preferred_element_type=F32) + p2bkv
        x2 = _mab_attend(q2, kv2[:, :nhid], kv2[:, nhid:],
                         p2wo, p2bo, num_heads, nhid, None)       # [1, nhid]

        # pool 3: Linear(nhid, nhid); classifier MLP + log_softmax
        # TODO(synk): dropout omitted (p=0.0 / inference), no Pallas RNG needed.
        g = jnp.dot(x2, plw, preferred_element_type=F32) + plb
        h = jnp.maximum(jnp.dot(g, c1w, preferred_element_type=F32) + c1b, 0.0)
        h = jnp.maximum(jnp.dot(h, c2w, preferred_element_type=F32) + c2b, 0.0)
        z = jnp.dot(h, c3w, preferred_element_type=F32) + c3b
        z = z - jnp.max(z, axis=-1, keepdims=True)
        z = z - jnp.log(jnp.sum(jnp.exp(z), axis=-1, keepdims=True))
        rows.append(z)                                    # [1, num_classes]

    out_ref[...] = jnp.concatenate(rows, axis=0)


# ------------------------------- host wrapper --------------------------------

def gmt_forward(params, off, cnt, x_pad, a_pad, B, N_max, args):
    """Single fused pallas_call for the whole GMT forward. Returns [B, num_classes]."""
    smem = pl.BlockSpec(memory_space=pltpu.MemorySpace.SMEM)
    vmem = pl.BlockSpec(memory_space=pltpu.MemorySpace.VMEM)
    p = params
    operands = (
        off, cnt, x_pad, a_pad,
        p["g1w"], p["g1b"], p["g2w"], p["g2b"],
        p["pma0_S"], p["pma0"]["wq"], p["pma0"]["bq"], p["pma0"]["wkv"],
        p["pma0"]["bkv"], p["pma0"]["wo"], p["pma0"]["bo"],
        p["sab1"]["wqkv"], p["sab1"]["bqkv"], p["sab1"]["wo"], p["sab1"]["bo"],
        p["pma2_S"], p["pma2"]["wq"], p["pma2"]["bq"], p["pma2"]["wkv"],
        p["pma2"]["bkv"], p["pma2"]["wo"], p["pma2"]["bo"],
        p["poolL_W"], p["poolL_b"],
        p["cls1_W"], p["cls1_b"], p["cls2_W"], p["cls2_b"],
        p["cls3_W"], p["cls3_b"],
    )
    kernel = functools.partial(_gmt_kernel, B=B, N_max=N_max,
                               num_heads=args["num_heads"], nhid=args["num_hidden"])
    # NOTE: grid-less call (everything fits one VMEM-resident block). If B grows,
    # reintroduce a leading "parallel" grid axis over graphs to use v7x's 2nd TC.
    return pl.pallas_call(
        kernel,
        out_shape=jax.ShapeDtypeStruct((B, args["num_classes"]), F32),
        in_specs=[smem, smem] + [vmem] * (len(operands) - 2),
        out_specs=vmem,
    )(*operands)


# ------------------------------ parameter init -------------------------------

def _dense(key, din, dout):
    k1, k2 = jax.random.split(key)
    lim = math.sqrt(6.0 / (din + dout))
    w = jax.random.uniform(k1, (din, dout), F32, -lim, lim)
    b = 0.01 * jax.random.normal(k2, (1, dout), F32)
    return w, b


def _mab_params(key, dQ, dK, dV, fuse_qkv):
    ks = jax.random.split(key, 4)
    Wq, bq = _dense(ks[0], dQ, dV)
    Wk, bk = _dense(ks[1], dK, dV)
    Wv, bv = _dense(ks[2], dK, dV)
    Wo, bo = _dense(ks[3], dV, dV)
    if fuse_qkv:   # SAB: Q_in == K_in -> one [dK, 3*dV] projection
        return dict(wqkv=jnp.concatenate([Wq, Wk, Wv], axis=1),
                    bqkv=jnp.concatenate([bq, bk, bv], axis=1), wo=Wo, bo=bo)
    return dict(wq=Wq, bq=bq,
                wkv=jnp.concatenate([Wk, Wv], axis=1),
                bkv=jnp.concatenate([bk, bv], axis=1), wo=Wo, bo=bo)


def init_params(key, args):
    nhid = args["num_hidden"]
    pool_in = nhid * args["num_convs"]                                   # 64
    seeds0 = math.ceil(args["pooling_ratio"] * args["avg_num_nodes"])    # 4
    ks = jax.random.split(key, 12)
    p = {}
    p["g1w"], p["g1b"] = _dense(ks[0], args["num_features"], nhid)
    p["g2w"], p["g2b"] = _dense(ks[1], nhid, nhid)
    p["pma0_S"] = jax.random.normal(ks[2], (seeds0, pool_in), F32) * 0.1
    p["pma0"] = _mab_params(ks[3], pool_in, pool_in, pool_in, fuse_qkv=False)
    p["sab1"] = _mab_params(ks[4], pool_in, pool_in, nhid, fuse_qkv=True)
    p["pma2_S"] = jax.random.normal(ks[5], (1, nhid), F32) * 0.1
    p["pma2"] = _mab_params(ks[6], nhid, nhid, nhid, fuse_qkv=False)
    p["poolL_W"], p["poolL_b"] = _dense(ks[7], nhid, nhid)
    p["cls1_W"], p["cls1_b"] = _dense(ks[8], nhid, nhid)
    p["cls2_W"], p["cls2_b"] = _dense(ks[9], nhid, nhid // 2)
    p["cls3_W"], p["cls3_b"] = _dense(ks[10], nhid // 2, args["num_classes"])
    return p


# ----------------------------------- main ------------------------------------

if __name__ == "__main__":
    args = dict(num_features=4, num_hidden=32, num_classes=5, num_convs=2,
                num_heads=4, pooling_ratio=0.25, avg_num_nodes=16,
                dropout=0.0, ln=False, cluster=False,
                model_string="GMPool_I-SelfAtt-GMPool_I", conv="GCN",
                mab_conv=None)

    key = jax.random.PRNGKey(0)
    kp, kx = jax.random.split(key)
    params = init_params(kp, args)

    # synthetic batched graph: graph0 has 6 nodes, graph1 has 5 nodes
    # (PyG-style: nodes sorted & contiguous per graph, as to_dense_batch assumes)
    batch_np = np.array([0] * 6 + [1] * 5, dtype=np.int32)
    N = batch_np.shape[0]
    counts = np.bincount(batch_np).astype(np.int32)
    B, N_max = int(counts.shape[0]), int(counts.max())
    offsets = np.concatenate([[0], np.cumsum(counts)[:-1]]).astype(np.int32)

    edges = np.array([[0, 1], [1, 2], [2, 3], [3, 4], [4, 5], [0, 3],
                      [6, 7], [7, 8], [8, 9], [9, 10], [6, 10]], dtype=np.int32)
    src = np.concatenate([edges[:, 0], edges[:, 1]])
    dst = np.concatenate([edges[:, 1], edges[:, 0]])
    A = np.zeros((N, N), np.float32)
    A[src, dst] = 1.0
    A += np.eye(N, dtype=np.float32)                 # GCN self loops
    dinv = 1.0 / np.sqrt(A.sum(axis=1))
    A_norm = A * dinv[:, None] * dinv[None, :]

    # pad node axis to a sublane multiple; padded rows/cols are zero and are
    # never selected by the in-kernel dense-batch gather
    N_pad = int(np.ceil(N / 8.0) * 8)
    A_pad = np.zeros((N_pad, N_pad), np.float32)
    A_pad[:N, :N] = A_norm

    x_nodes = jax.random.normal(kx, (N, args["num_features"]), F32)
    x_pad = jnp.zeros((N_pad, args["num_features"]), F32).at[:N].set(x_nodes)

    out = gmt_forward(params, jnp.asarray(offsets), jnp.asarray(counts),
                      x_pad, jnp.asarray(A_pad), B, N_max, args)
    out = jax.block_until_ready(out)

    assert out.shape == (B, args["num_classes"])
    assert bool(jnp.all(jnp.isfinite(out)))
    # rows of log_softmax should exponentiate-and-sum to ~1
    assert bool(jnp.allclose(jnp.exp(out).sum(axis=-1), 1.0, atol=1e-4))
    print("KERNEL_OK")
</pallas_src>

<mosaic_0001>
module attributes {stable_mosaic.version = 11 : i64} {
  func.func @_gmt_kernel(%arg0: memref<2xi32, #tpu.memory_space<smem>>, %arg1: memref<2xi32, #tpu.memory_space<smem>>, %arg2: memref<16x4xf32, #tpu.memory_space<vmem>>, %arg3: memref<16x16xf32, #tpu.memory_space<vmem>>, %arg4: memref<4x32xf32, #tpu.memory_space<vmem>>, %arg5: memref<1x32xf32, #tpu.memory_space<vmem>>, %arg6: memref<32x32xf32, #tpu.memory_space<vmem>>, %arg7: memref<1x32xf32, #tpu.memory_space<vmem>>, %arg8: memref<4x64xf32, #tpu.memory_space<vmem>>, %arg9: memref<64x64xf32, #tpu.memory_space<vmem>>, %arg10: memref<1x64xf32, #tpu.memory_space<vmem>>, %arg11: memref<64x128xf32, #tpu.memory_space<vmem>>, %arg12: memref<1x128xf32, #tpu.memory_space<vmem>>, %arg13: memref<64x64xf32, #tpu.memory_space<vmem>>, %arg14: memref<1x64xf32, #tpu.memory_space<vmem>>, %arg15: memref<64x96xf32, #tpu.memory_space<vmem>>, %arg16: memref<1x96xf32, #tpu.memory_space<vmem>>, %arg17: memref<32x32xf32, #tpu.memory_space<vmem>>, %arg18: memref<1x32xf32, #tpu.memory_space<vmem>>, %arg19: memref<1x32xf32, #tpu.memory_space<vmem>>, %arg20: memref<32x32xf32, #tpu.memory_space<vmem>>, %arg21: memref<1x32xf32, #tpu.memory_space<vmem>>, %arg22: memref<32x64xf32, #tpu.memory_space<vmem>>, %arg23: memref<1x64xf32, #tpu.memory_space<vmem>>, %arg24: memref<32x32xf32, #tpu.memory_space<vmem>>, %arg25: memref<1x32xf32, #tpu.memory_space<vmem>>, %arg26: memref<32x32xf32, #tpu.memory_space<vmem>>, %arg27: memref<1x32xf32, #tpu.memory_space<vmem>>, %arg28: memref<32x32xf32, #tpu.memory_space<vmem>>, %arg29: memref<1x32xf32, #tpu.memory_space<vmem>>, %arg30: memref<32x16xf32, #tpu.memory_space<vmem>>, %arg31: memref<1x16xf32, #tpu.memory_space<vmem>>, %arg32: memref<16x5xf32, #tpu.memory_space<vmem>>, %arg33: memref<1x5xf32, #tpu.memory_space<vmem>>, %arg34: memref<2x5xf32, #tpu.memory_space<vmem>>) attributes {dimension_semantics = [], scalar_prefetch = 0 : i64, scratch_operands = 0 : i64, tpu.core_type = #tpu.core_type<tc>} {
    %c0 = arith.constant 0 : index
    %c0_0 = arith.constant 0 : index
    %0 = vector.load %arg2[%c0, %c0_0] : memref<16x4xf32, #tpu.memory_space<vmem>>, vector<16x4xf32>
    %c0_1 = arith.constant 0 : index
    %c0_2 = arith.constant 0 : index
    %1 = vector.load %arg3[%c0_1, %c0_2] : memref<16x16xf32, #tpu.memory_space<vmem>>, vector<16x16xf32>
    %c0_3 = arith.constant 0 : index
    %c0_4 = arith.constant 0 : index
    %2 = vector.load %arg4[%c0_3, %c0_4] : memref<4x32xf32, #tpu.memory_space<vmem>>, vector<4x32xf32>
    %cst = arith.constant dense<0.000000e+00> : vector<16x32xf32>
    %3 = tpu.matmul %0, %2, %cst {dimension_numbers = #tpu.dot_dimension_numbers<[1], [0], [0], [1], [0, 0, 1, 1], [], []>} : vector<16x4xf32>, vector<4x32xf32>, vector<16x32xf32> -> vector<16x32xf32>
    %cst_5 = arith.constant dense<0.000000e+00> : vector<16x32xf32>
    %4 = tpu.matmul %1, %3, %cst_5 {dimension_numbers = #tpu.dot_dimension_numbers<[1], [0], [0], [1], [0, 0, 1, 1], [], []>} : vector<16x16xf32>, vector<16x32xf32>, vector<16x32xf32> -> vector<16x32xf32>
    %c0_6 = arith.constant 0 : index
    %c0_7 = arith.constant 0 : index
    %5 = vector.load %arg5[%c0_6, %c0_7] : memref<1x32xf32, #tpu.memory_space<vmem>>, vector<1x32xf32>
    %6 = vector.broadcast %5 : vector<1x32xf32> to vector<16x32xf32>
    %7 = arith.addf %4, %6 : vector<16x32xf32>
    %cst_8 = arith.constant 0.000000e+00 : f32
    %8 = vector.broadcast %cst_8 : f32 to vector<16x32xf32>
    %9 = arith.maximumf %7, %8 : vector<16x32xf32>
    %c0_9 = arith.constant 0 : index
    %c0_10 = arith.constant 0 : index
    %10 = vector.load %arg6[%c0_9, %c0_10] : memref<32x32xf32, #tpu.memory_space<vmem>>, vector<32x32xf32>
    %cst_11 = arith.constant dense<0.000000e+00> : vector<16x32xf32>
    %11 = tpu.matmul %9, %10, %cst_11 {dimension_numbers = #tpu.dot_dimension_numbers<[1], [0], [0], [1], [0, 0, 1, 1], [], []>} : vector<16x32xf32>, vector<32x32xf32>, vector<16x32xf32> -> vector<16x32xf32>
    %cst_12 = arith.constant dense<0.000000e+00> : vector<16x32xf32>
    %12 = tpu.matmul %1, %11, %cst_12 {dimension_numbers = #tpu.dot_dimension_numbers<[1], [0], [0], [1], [0, 0, 1, 1], [], []>} : vector<16x16xf32>, vector<16x32xf32>, vector<16x32xf32> -> vector<16x32xf32>
    %c0_13 = arith.constant 0 : index
    %c0_14 = arith.constant 0 : index
    %13 = vector.load %arg7[%c0_13, %c0_14] : memref<1x32xf32, #tpu.memory_space<vmem>>, vector<1x32xf32>
    %14 = vector.broadcast %13 : vector<1x32xf32> to vector<16x32xf32>
    %15 = arith.addf %12, %14 : vector<16x32xf32>
    %cst_15 = arith.constant 0.000000e+00 : f32
    %16 = vector.broadcast %cst_15 : f32 to vector<16x32xf32>
    %17 = arith.maximumf %15, %16 : vector<16x32xf32>
    %18 = tpu.concatenate %9, %17 in 1 : vector<16x32xf32>, vector<16x32xf32> -> vector<16x64xf32>
    %c0_16 = arith.constant 0 : index
    %c0_17 = arith.constant 0 : index
    %19 = vector.load %arg8[%c0_16, %c0_17] : memref<4x64xf32, #tpu.memory_space<vmem>>, vector<4x64xf32>
    %c0_18 = arith.constant 0 : index
    %c0_19 = arith.constant 0 : index
    %20 = vector.load %arg9[%c0_18, %c0_19] : memref<64x64xf32, #tpu.memory_space<vmem>>, vector<64x64xf32>
    %c0_20 = arith.constant 0 : index
    %c0_21 = arith.constant 0 : index
    %21 = vector.load %arg10[%c0_20, %c0_21] : memref<1x64xf32, #tpu.memory_space<vmem>>, vector<1x64xf32>
    %c0_22 = arith.constant 0 : index
    %c0_23 = arith.constant 0 : index
    %22 = vector.load %arg11[%c0_22, %c0_23] : memref<64x128xf32, #tpu.memory_space<vmem>>, vector<64x128xf32>
    %c0_24 = arith.constant 0 : index
    %c0_25 = arith.constant 0 : index
    %23 = vector.load %arg12[%c0_24, %c0_25] : memref<1x128xf32, #tpu.memory_space<vmem>>, vector<1x128xf32>
    %c0_26 = arith.constant 0 : index
    %c0_27 = arith.constant 0 : index
    %24 = vector.load %arg13[%c0_26, %c0_27] : memref<64x64xf32, #tpu.memory_space<vmem>>, vector<64x64xf32>
    %c0_28 = arith.constant 0 : index
    %c0_29 = arith.constant 0 : index
    %25 = vector.load %arg14[%c0_28, %c0_29] : memref<1x64xf32, #tpu.memory_space<vmem>>, vector<1x64xf32>
    %c0_30 = arith.constant 0 : index
    %c0_31 = arith.constant 0 : index
    %26 = vector.load %arg15[%c0_30, %c0_31] : memref<64x96xf32, #tpu.memory_space<vmem>>, vector<64x96xf32>
    %c0_32 = arith.constant 0 : index
    %c0_33 = arith.constant 0 : index
    %27 = vector.load %arg16[%c0_32, %c0_33] : memref<1x96xf32, #tpu.memory_space<vmem>>, vector<1x96xf32>
    %c0_34 = arith.constant 0 : index
    %c0_35 = arith.constant 0 : index
    %28 = vector.load %arg17[%c0_34, %c0_35] : memref<32x32xf32, #tpu.memory_space<vmem>>, vector<32x32xf32>
    %c0_36 = arith.constant 0 : index
    %c0_37 = arith.constant 0 : index
    %29 = vector.load %arg18[%c0_36, %c0_37] : memref<1x32xf32, #tpu.memory_space<vmem>>, vector<1x32xf32>
    %c0_38 = arith.constant 0 : index
    %c0_39 = arith.constant 0 : index
    %30 = vector.load %arg19[%c0_38, %c0_39] : memref<1x32xf32, #tpu.memory_space<vmem>>, vector<1x32xf32>
    %c0_40 = arith.constant 0 : index
    %c0_41 = arith.constant 0 : index
    %31 = vector.load %arg20[%c0_40, %c0_41] : memref<32x32xf32, #tpu.memory_space<vmem>>, vector<32x32xf32>
    %c0_42 = arith.constant 0 : index
    %c0_43 = arith.constant 0 : index
    %32 = vector.load %arg21[%c0_42, %c0_43] : memref<1x32xf32, #tpu.memory_space<vmem>>, vector<1x32xf32>
    %c0_44 = arith.constant 0 : index
    %c0_45 = arith.constant 0 : index
    %33 = vector.load %arg22[%c0_44, %c0_45] : memref<32x64xf32, #tpu.memory_space<vmem>>, vector<32x64xf32>
    %c0_46 = arith.constant 0 : index
    %c0_47 = arith.constant 0 : index
    %34 = vector.load %arg23[%c0_46, %c0_47] : memref<1x64xf32, #tpu.memory_space<vmem>>, vector<1x64xf32>
    %c0_48 = arith.constant 0 : index
    %c0_49 = arith.constant 0 : index
    %35 = vector.load %arg24[%c0_48, %c0_49] : memref<32x32xf32, #tpu.memory_space<vmem>>, vector<32x32xf32>
    %c0_50 = arith.constant 0 : index
    %c0_51 = arith.constant 0 : index
    %36 = vector.load %arg25[%c0_50, %c0_51] : memref<1x32xf32, #tpu.memory_space<vmem>>, vector<1x32xf32>
    %c0_52 = arith.constant 0 : index
    %c0_53 = arith.constant 0 : index
    %37 = vector.load %arg26[%c0_52, %c0_53] : memref<32x32xf32, #tpu.memory_space<vmem>>, vector<32x32xf32>
    %c0_54 = arith.constant 0 : index
    %c0_55 = arith.constant 0 : index
    %38 = vector.load %arg27[%c0_54, %c0_55] : memref<1x32xf32, #tpu.memory_space<vmem>>, vector<1x32xf32>
    %c0_56 = arith.constant 0 : index
    %c0_57 = arith.constant 0 : index
    %39 = vector.load %arg28[%c0_56, %c0_57] : memref<32x32xf32, #tpu.memory_space<vmem>>, vector<32x32xf32>
    %c0_58 = arith.constant 0 : index
    %c0_59 = arith.constant 0 : index
    %40 = vector.load %arg29[%c0_58, %c0_59] : memref<1x32xf32, #tpu.memory_space<vmem>>, vector<1x32xf32>
    %c0_60 = arith.constant 0 : index
    %c0_61 = arith.constant 0 : index
    %41 = vector.load %arg30[%c0_60, %c0_61] : memref<32x16xf32, #tpu.memory_space<vmem>>, vector<32x16xf32>
    %c0_62 = arith.constant 0 : index
    %c0_63 = arith.constant 0 : index
    %42 = vector.load %arg31[%c0_62, %c0_63] : memref<1x16xf32, #tpu.memory_space<vmem>>, vector<1x16xf32>
    %c0_64 = arith.constant 0 : index
    %c0_65 = arith.constant 0 : index
    %43 = vector.load %arg32[%c0_64, %c0_65] : memref<16x5xf32, #tpu.memory_space<vmem>>, vector<16x5xf32>
    %c0_66 = arith.constant 0 : index
    %c0_67 = arith.constant 0 : index
    %44 = vector.load %arg33[%c0_66, %c0_67] : memref<1x5xf32, #tpu.memory_space<vmem>>, vector<1x5xf32>
    %45 = tpu.iota {dimensions = array<i32: 0>} : vector<6x16xi32>
    %46 = tpu.iota {dimensions = array<i32: 1>} : vector<6x16xi32>
    %47 = tpu.iota {dimensions = array<i32: 1>} : vector<1x6xi32>
    %c0_68 = arith.constant 0 : index
    %48 = memref.load %arg0[%c0_68] : memref<2xi32, #tpu.memory_space<smem>>
    %c0_69 = arith.constant 0 : index
    %49 = memref.load %arg1[%c0_69] : memref<2xi32, #tpu.memory_space<smem>>
    %50 = vector.broadcast %48 : i32 to vector<6x16xi32>
    %51 = arith.addi %50, %45 : vector<6x16xi32>
    %52 = arith.cmpi eq, %46, %51 : vector<6x16xi32>
    %53 = vector.broadcast %49 : i32 to vector<6x16xi32>
    %54 = arith.cmpi slt, %45, %53 : vector<6x16xi32>
    %55 = arith.andi %52, %54 : vector<6x16xi1>
    %cst_70 = arith.constant 1.000000e+00 : f32
    %cst_71 = arith.constant 0.000000e+00 : f32
    %56 = vector.broadcast %cst_70 : f32 to vector<6x16xf32>
    %57 = vector.broadcast %cst_71 : f32 to vector<6x16xf32>
    %58 = arith.select %55, %56, %57 : vector<6x16xi1>, vector<6x16xf32>
    %cst_72 = arith.constant dense<0.000000e+00> : vector<6x64xf32>
    %59 = tpu.matmul %58, %18, %cst_72 {dimension_numbers = #tpu.dot_dimension_numbers<[1], [0], [0], [1], [0, 0, 1, 1], [], []>} : vector<6x16xf32>, vector<16x64xf32>, vector<6x64xf32> -> vector<6x64xf32>
    %60 = vector.broadcast %49 : i32 to vector<1x6xi32>
    %61 = arith.cmpi slt, %47, %60 : vector<1x6xi32>
    %cst_73 = arith.constant 0.000000e+00 : f32
    %cst_74 = arith.constant -1.000000e+09 : f32
    %62 = vector.broadcast %cst_73 : f32 to vector<1x6xf32>
    %63 = vector.broadcast %cst_74 : f32 to vector<1x6xf32>
    %64 = arith.select %61, %62, %63 : vector<1x6xi1>, vector<1x6xf32>
    %cst_75 = arith.constant dense<0.000000e+00> : vector<4x64xf32>
    %65 = tpu.matmul %19, %20, %cst_75 {dimension_numbers = #tpu.dot_dimension_numbers<[1], [0], [0], [1], [0, 0, 1, 1], [], []>} : vector<4x64xf32>, vector<64x64xf32>, vector<4x64xf32> -> vector<4x64xf32>
    %66 = vector.broadcast %21 : vector<1x64xf32> to vector<4x64xf32>
    %67 = arith.addf %65, %66 : vector<4x64xf32>
    %cst_76 = arith.constant dense<0.000000e+00> : vector<6x128xf32>
    %68 = tpu.matmul %59, %22, %cst_76 {dimension_numbers = #tpu.dot_dimension_numbers<[1], [0], [0], [1], [0, 0, 1, 1], [], []>} : vector<6x64xf32>, vector<64x128xf32>, vector<6x128xf32> -> vector<6x128xf32>
    %69 = vector.broadcast %23 : vector<1x128xf32> to vector<6x128xf32>
    %70 = arith.addf %68, %69 : vector<6x128xf32>
    %71 = vector.extract_strided_slice %70 {offsets = [0, 0], sizes = [6, 64], strides = [1, 1]} : vector<6x128xf32> to vector<6x64xf32>
    %72 = vector.extract_strided_slice %70 {offsets = [0, 64], sizes = [6, 64], strides = [1, 1]} : vector<6x128xf32> to vector<6x64xf32>
    %73 = vector.extract_strided_slice %67 {offsets = [0, 0], sizes = [4, 16], strides = [1, 1]} : vector<4x64xf32> to vector<4x16xf32>
    %74 = vector.extract_strided_slice %71 {offsets = [0, 0], sizes = [6, 16], strides = [1, 1]} : vector<6x64xf32> to vector<6x16xf32>
    %75 = vector.extract_strided_slice %72 {offsets = [0, 0], sizes = [6, 16], strides = [1, 1]} : vector<6x64xf32> to vector<6x16xf32>
    %cst_77 = arith.constant dense<0.000000e+00> : vector<4x6xf32>
    %76 = tpu.matmul %73, %74, %cst_77 {dimension_numbers = #tpu.dot_dimension_numbers<[1], [1], [0], [0], [0, 0, 1, 0], [], []>} : vector<4x16xf32>, vector<6x16xf32>, vector<4x6xf32> -> vector<4x6xf32>
    %cst_78 = arith.constant 1.250000e-01 : f32
    %77 = vector.broadcast %cst_78 : f32 to vector<4x6xf32>
    %78 = arith.mulf %76, %77 : vector<4x6xf32>
    %79 = vector.broadcast %64 : vector<1x6xf32> to vector<4x6xf32>
    %80 = arith.addf %78, %79 : vector<4x6xf32>
    %cst_79 = arith.constant dense<0xFF800000> : vector<4xf32>
    %81 = vector.multi_reduction <maximumf>, %80, %cst_79 [1] : vector<4x6xf32> to vector<4xf32>
    %82 = vector.shape_cast %81 : vector<4xf32> to vector<4x1xf32>
    %83 = vector.broadcast %82 : vector<4x1xf32> to vector<4x6xf32>
    %84 = arith.subf %80, %83 : vector<4x6xf32>
    %85 = math.exp %84 : vector<4x6xf32>
    %cst_80 = arith.constant dense<0.000000e+00> : vector<4xf32>
    %86 = vector.multi_reduction <add>, %85, %cst_80 [1] : vector<4x6xf32> to vector<4xf32>
    %87 = vector.shape_cast %86 : vector<4xf32> to vector<4x1xf32>
    %88 = tpu.reciprocal %87 {approx = true} : vector<4x1xf32> -> vector<4x1xf32>
    %89 = vector.broadcast %88 : vector<4x1xf32> to vector<4x6xf32>
    %90 = arith.mulf %85, %89 : vector<4x6xf32>
    %cst_81 = arith.constant dense<0.000000e+00> : vector<4x16xf32>
    %91 = tpu.matmul %90, %75, %cst_81 {dimension_numbers = #tpu.dot_dimension_numbers<[1], [0], [0], [1], [0, 0, 1, 1], [], []>} : vector<4x6xf32>, vector<6x16xf32>, vector<4x16xf32> -> vector<4x16xf32>
    %92 = arith.addf %73, %91 : vector<4x16xf32>
    %93 = vector.extract_strided_slice %67 {offsets = [0, 16], sizes = [4, 16], strides = [1, 1]} : vector<4x64xf32> to vector<4x16xf32>
    %94 = vector.extract_strided_slice %71 {offsets = [0, 16], sizes = [6, 16], strides = [1, 1]} : vector<6x64xf32> to vector<6x16xf32>
    %95 = vector.extract_strided_slice %72 {offsets = [0, 16], sizes = [6, 16], strides = [1, 1]} : vector<6x64xf32> to vector<6x16xf32>
    %cst_82 = arith.constant dense<0.000000e+00> : vector<4x6xf32>
    %96 = tpu.matmul %93, %94, %cst_82 {dimension_numbers = #tpu.dot_dimension_numbers<[1], [1], [0], [0], [0, 0, 1, 0], [], []>} : vector<4x16xf32>, vector<6x16xf32>, vector<4x6xf32> -> vector<4x6xf32>
    %cst_83 = arith.constant 1.250000e-01 : f32
    %97 = vector.broadcast %cst_83 : f32 to vector<4x6xf32>
    %98 = arith.mulf %96, %97 : vector<4x6xf32>
    %99 = vector.broadcast %64 : vector<1x6xf32> to vector<4x6xf32>
    %100 = arith.addf %98, %99 : vector<4x6xf32>
    %cst_84 = arith.constant dense<0xFF800000> : vector<4xf32>
    %101 = vector.multi_reduction <maximumf>, %100, %cst_84 [1] : vector<4x6xf32> to vector<4xf32>
    %102 = vector.shape_cast %101 : vector<4xf32> to vector<4x1xf32>
    %103 = vector.broadcast %102 : vector<4x1xf32> to vector<4x6xf32>
    %104 = arith.subf %100, %103 : vector<4x6xf32>
    %105 = math.exp %104 : vector<4x6xf32>
    %cst_85 = arith.constant dense<0.000000e+00> : vector<4xf32>
    %106 = vector.multi_reduction <add>, %105, %cst_85 [1] : vector<4x6xf32> to vector<4xf32>
    %107 = vector.shape_cast %106 : vector<4xf32> to vector<4x1xf32>
    %108 = tpu.reciprocal %107 {approx = true} : vector<4x1xf32> -> vector<4x1xf32>
    %109 = vector.broadcast %108 : vector<4x1xf32> to vector<4x6xf32>
    %110 = arith.mulf %105, %109 : vector<4x6xf32>
    %cst_86 = arith.constant dense<0.000000e+00> : vector<4x16xf32>
    %111 = tpu.matmul %110, %95, %cst_86 {dimension_numbers = #tpu.dot_dimension_numbers<[1], [0], [0], [1], [0, 0, 1, 1], [], []>} : vector<4x6xf32>, vector<6x16xf32>, vector<4x16xf32> -> vector<4x16xf32>
    %112 = arith.addf %93, %111 : vector<4x16xf32>
    %113 = vector.extract_strided_slice %67 {offsets = [0, 32], sizes = [4, 16], strides = [1, 1]} : vector<4x64xf32> to vector<4x16xf32>
    %114 = vector.extract_strided_slice %71 {offsets = [0, 32], sizes = [6, 16], strides = [1, 1]} : vector<6x64xf32> to vector<6x16xf32>
    %115 = vector.extract_strided_slice %72 {offsets = [0, 32], sizes = [6, 16], strides = [1, 1]} : vector<6x64xf32> to vector<6x16xf32>
    %cst_87 = arith.constant dense<0.000000e+00> : vector<4x6xf32>
    %116 = tpu.matmul %113, %114, %cst_87 {dimension_numbers = #tpu.dot_dimension_numbers<[1], [1], [0], [0], [0, 0, 1, 0], [], []>} : vector<4x16xf32>, vector<6x16xf32>, vector<4x6xf32> -> vector<4x6xf32>
    %cst_88 = arith.constant 1.250000e-01 : f32
    %117 = vector.broadcast %cst_88 : f32 to vector<4x6xf32>
    %118 = arith.mulf %116, %117 : vector<4x6xf32>
    %119 = vector.broadcast %64 : vector<1x6xf32> to vector<4x6xf32>
    %120 = arith.addf %118, %119 : vector<4x6xf32>
    %cst_89 = arith.constant dense<0xFF800000> : vector<4xf32>
    %121 = vector.multi_reduction <maximumf>, %120, %cst_89 [1] : vector<4x6xf32> to vector<4xf32>
    %122 = vector.shape_cast %121 : vector<4xf32> to vector<4x1xf32>
    %123 = vector.broadcast %122 : vector<4x1xf32> to vector<4x6xf32>
    %124 = arith.subf %120, %123 : vector<4x6xf32>
    %125 = math.exp %124 : vector<4x6xf32>
    %cst_90 = arith.constant dense<0.000000e+00> : vector<4xf32>
    %126 = vector.multi_reduction <add>, %125, %cst_90 [1] : vector<4x6xf32> to vector<4xf32>
    %127 = vector.shape_cast %126 : vector<4xf32> to vector<4x1xf32>
    %128 = tpu.reciprocal %127 {approx = true} : vector<4x1xf32> -> vector<4x1xf32>
    %129 = vector.broadcast %128 : vector<4x1xf32> to vector<4x6xf32>
    %130 = arith.mulf %125, %129 : vector<4x6xf32>
    %cst_91 = arith.constant dense<0.000000e+00> : vector<4x16xf32>
    %131 = tpu.matmul %130, %115, %cst_91 {dimension_numbers = #tpu.dot_dimension_numbers<[1], [0], [0], [1], [0, 0, 1, 1], [], []>} : vector<4x6xf32>, vector<6x16xf32>, vector<4x16xf32> -> vector<4x16xf32>
    %132 = arith.addf %113, %131 : vector<4x16xf32>
    %133 = vector.extract_strided_slice %67 {offsets = [0, 48], sizes = [4, 16], strides = [1, 1]} : vector<4x64xf32> to vector<4x16xf32>
    %134 = vector.extract_strided_slice %71 {offsets = [0, 48], sizes = [6, 16], strides = [1, 1]} : vector<6x64xf32> to vector<6x16xf32>
    %135 = vector.extract_strided_slice %72 {offsets = [0, 48], sizes = [6, 16], strides = [1, 1]} : vector<6x64xf32> to vector<6x16xf32>
    %cst_92 = arith.constant dense<0.000000e+00> : vector<4x6xf32>
    %136 = tpu.matmul %133, %134, %cst_92 {dimension_numbers = #tpu.dot_dimension_numbers<[1], [1], [0], [0], [0, 0, 1, 0], [], []>} : vector<4x16xf32>, vector<6x16xf32>, vector<4x6xf32> -> vector<4x6xf32>
    %cst_93 = arith.constant 1.250000e-01 : f32
    %137 = vector.broadcast %cst_93 : f32 to vector<4x6xf32>
    %138 = arith.mulf %136, %137 : vector<4x6xf32>
    %139 = vector.broadcast %64 : vector<1x6xf32> to vector<4x6xf32>
    %140 = arith.addf %138, %139 : vector<4x6xf32>
    %cst_94 = arith.constant dense<0xFF800000> : vector<4xf32>
    %141 = vector.multi_reduction <maximumf>, %140, %cst_94 [1] : vector<4x6xf32> to vector<4xf32>
    %142 = vector.shape_cast %141 : vector<4xf32> to vector<4x1xf32>
    %143 = vector.broadcast %142 : vector<4x1xf32> to vector<4x6xf32>
    %144 = arith.subf %140, %143 : vector<4x6xf32>
    %145 = math.exp %144 : vector<4x6xf32>
    %cst_95 = arith.constant dense<0.000000e+00> : vector<4xf32>
    %146 = vector.multi_reduction <add>, %145, %cst_95 [1] : vector<4x6xf32> to vector<4xf32>
    %147 = vector.shape_cast %146 : vector<4xf32> to vector<4x1xf32>
    %148 = tpu.reciprocal %147 {approx = true} : vector<4x1xf32> -> vector<4x1xf32>
    %149 = vector.broadcast %148 : vector<4x1xf32> to vector<4x6xf32>
    %150 = arith.mulf %145, %149 : vector<4x6xf32>
    %cst_96 = arith.constant dense<0.000000e+00> : vector<4x16xf32>
    %151 = tpu.matmul %150, %135, %cst_96 {dimension_numbers = #tpu.dot_dimension_numbers<[1], [0], [0], [1], [0, 0, 1, 1], [], []>} : vector<4x6xf32>, vector<6x16xf32>, vector<4x16xf32> -> vector<4x16xf32>
    %152 = arith.addf %133, %151 : vector<4x16xf32>
    %153 = tpu.concatenate %92, %112, %132, %152 in 1 : vector<4x16xf32>, vector<4x16xf32>, vector<4x16xf32>, vector<4x16xf32> -> vector<4x64xf32>
    %cst_97 = arith.constant dense<0.000000e+00> : vector<4x64xf32>
    %154 = tpu.matmul %153, %24, %cst_97 {dimension_numbers = #tpu.dot_dimension_numbers<[1], [0], [0], [1], [0, 0, 1, 1], [], []>} : vector<4x64xf32>, vector<64x64xf32>, vector<4x64xf32> -> vector<4x64xf32>
    %155 = vector.broadcast %25 : vector<1x64xf32> to vector<4x64xf32>
    %156 = arith.addf %154, %155 : vector<4x64xf32>
    %cst_98 = arith.constant 0.000000e+00 : f32
    %157 = vector.broadcast %cst_98 : f32 to vector<4x64xf32>
    %158 = arith.maximumf %156, %157 : vector<4x64xf32>
    %159 = arith.addf %153, %158 : vector<4x64xf32>
    %cst_99 = arith.constant dense<0.000000e+00> : vector<4x96xf32>
    %160 = tpu.matmul %159, %26, %cst_99 {dimension_numbers = #tpu.dot_dimension_numbers<[1], [0], [0], [1], [0, 0, 1, 1], [], []>} : vector<4x64xf32>, vector<64x96xf32>, vector<4x96xf32> -> vector<4x96xf32>
    %161 = vector.broadcast %27 : vector<1x96xf32> to vector<4x96xf32>
    %162 = arith.addf %160, %161 : vector<4x96xf32>
    %163 = vector.extract_strided_slice %162 {offsets = [0, 0], sizes = [4, 32], strides = [1, 1]} : vector<4x96xf32> to vector<4x32xf32>
    %164 = vector.extract_strided_slice %162 {offsets = [0, 32], sizes = [4, 32], strides = [1, 1]} : vector<4x96xf32> to vector<4x32xf32>
    %165 = vector.extract_strided_slice %162 {offsets = [0, 64], sizes = [4, 32], strides = [1, 1]} : vector<4x96xf32> to vector<4x32xf32>
    %166 = vector.extract_strided_slice %163 {offsets = [0, 0], sizes = [4, 8], strides = [1, 1]} : vector<4x32xf32> to vector<4x8xf32>
    %167 = vector.extract_strided_slice %164 {offsets = [0, 0], sizes = [4, 8], strides = [1, 1]} : vector<4x32xf32> to vector<4x8xf32>
    %168 = vector.extract_strided_slice %165 {offsets = [0, 0], sizes = [4, 8], strides = [1, 1]} : vector<4x32xf32> to vector<4x8xf32>
    %cst_100 = arith.constant dense<0.000000e+00> : vector<4x4xf32>
    %169 = tpu.matmul %166, %167, %cst_100 {dimension_numbers = #tpu.dot_dimension_numbers<[1], [1], [0], [0], [0, 0, 1, 0], [], []>} : vector<4x8xf32>, vector<4x8xf32>, vector<4x4xf32> -> vector<4x4xf32>
    %cst_101 = arith.constant 0.176776692 : f32
    %170 = vector.broadcast %cst_101 : f32 to vector<4x4xf32>
    %171 = arith.mulf %169, %170 : vector<4x4xf32>
    %cst_102 = arith.constant dense<0xFF800000> : vector<4xf32>
    %172 = vector.multi_reduction <maximumf>, %171, %cst_102 [1] : vector<4x4xf32> to vector<4xf32>
    %173 = vector.shape_cast %172 : vector<4xf32> to vector<4x1xf32>
    %174 = vector.broadcast %173 : vector<4x1xf32> to vector<4x4xf32>
    %175 = arith.subf %171, %174 : vector<4x4xf32>
    %176 = math.exp %175 : vector<4x4xf32>
    %cst_103 = arith.constant dense<0.000000e+00> : vector<4xf32>
    %177 = vector.multi_reduction <add>, %176, %cst_103 [1] : vector<4x4xf32> to vector<4xf32>
    %178 = vector.shape_cast %177 : vector<4xf32> to vector<4x1xf32>
    %179 = tpu.reciprocal %178 {approx = true} : vector<4x1xf32> -> vector<4x1xf32>
    %180 = vector.broadcast %179 : vector<4x1xf32> to vector<4x4xf32>
    %181 = arith.mulf %176, %180 : vector<4x4xf32>
    %cst_104 = arith.constant dense<0.000000e+00> : vector<4x8xf32>
    %182 = tpu.matmul %181, %168, %cst_104 {dimension_numbers = #tpu.dot_dimension_numbers<[1], [0], [0], [1], [0, 0, 1, 1], [], []>} : vector<4x4xf32>, vector<4x8xf32>, vector<4x8xf32> -> vector<4x8xf32>
    %183 = arith.addf %166, %182 : vector<4x8xf32>
    %184 = vector.extract_strided_slice %163 {offsets = [0, 8], sizes = [4, 8], strides = [1, 1]} : vector<4x32xf32> to vector<4x8xf32>
    %185 = vector.extract_strided_slice %164 {offsets = [0, 8], sizes = [4, 8], strides = [1, 1]} : vector<4x32xf32> to vector<4x8xf32>
    %186 = vector.extract_strided_slice %165 {offsets = [0, 8], sizes = [4, 8], strides = [1, 1]} : vector<4x32xf32> to vector<4x8xf32>
    %cst_105 = arith.constant dense<0.000000e+00> : vector<4x4xf32>
    %187 = tpu.matmul %184, %185, %cst_105 {dimension_numbers = #tpu.dot_dimension_numbers<[1], [1], [0], [0], [0, 0, 1, 0], [], []>} : vector<4x8xf32>, vector<4x8xf32>, vector<4x4xf32> -> vector<4x4xf32>
    %cst_106 = arith.constant 0.176776692 : f32
    %188 = vector.broadcast %cst_106 : f32 to vector<4x4xf32>
    %189 = arith.mulf %187, %188 : vector<4x4xf32>
    %cst_107 = arith.constant dense<0xFF800000> : vector<4xf32>
    %190 = vector.multi_reduction <maximumf>, %189, %cst_107 [1] : vector<4x4xf32> to vector<4xf32>
    %191 = vector.shape_cast %190 : vector<4xf32> to vector<4x1xf32>
    %192 = vector.broadcast %191 : vector<4x1xf32> to vector<4x4xf32>
    %193 = arith.subf %189, %192 : vector<4x4xf32>
    %194 = math.exp %193 : vector<4x4xf32>
    %cst_108 = arith.constant dense<0.000000e+00> : vector<4xf32>
    %195 = vector.multi_reduction <add>, %194, %cst_108 [1] : vector<4x4xf32> to vector<4xf32>
    %196 = vector.shape_cast %195 : vector<4xf32> to vector<4x1xf32>
    %197 = tpu.reciprocal %196 {approx = true} : vector<4x1xf32> -> vector<4x1xf32>
    %198 = vector.broadcast %197 : vector<4x1xf32> to vector<4x4xf32>
    %199 = arith.mulf %194, %198 : vector<4x4xf32>
    %cst_109 = arith.constant dense<0.000000e+00> : vector<4x8xf32>
    %200 = tpu.matmul %199, %186, %cst_109 {dimension_numbers = #tpu.dot_dimension_numbers<[1], [0], [0], [1], [0, 0, 1, 1], [], []>} : vector<4x4xf32>, vector<4x8xf32>, vector<4x8xf32> -> vector<4x8xf32>
    %201 = arith.addf %184, %200 : vector<4x8xf32>
    %202 = vector.extract_strided_slice %163 {offsets = [0, 16], sizes = [4, 8], strides = [1, 1]} : vector<4x32xf32> to vector<4x8xf32>
    %203 = vector.extract_strided_slice %164 {offsets = [0, 16], sizes = [4, 8], strides = [1, 1]} : vector<4x32xf32> to vector<4x8xf32>
    %204 = vector.extract_strided_slice %165 {offsets = [0, 16], sizes = [4, 8], strides = [1, 1]} : vector<4x32xf32> to vector<4x8xf32>
    %cst_110 = arith.constant dense<0.000000e+00> : vector<4x4xf32>
    %205 = tpu.matmul %202, %203, %cst_110 {dimension_numbers = #tpu.dot_dimension_numbers<[1], [1], [0], [0], [0, 0, 1, 0], [], []>} : vector<4x8xf32>, vector<4x8xf32>, vector<4x4xf32> -> vector<4x4xf32>
    %cst_111 = arith.constant 0.176776692 : f32
    %206 = vector.broadcast %cst_111 : f32 to vector<4x4xf32>
    %207 = arith.mulf %205, %206 : vector<4x4xf32>
    %cst_112 = arith.constant dense<0xFF800000> : vector<4xf32>
    %208 = vector.multi_reduction <maximumf>, %207, %cst_112 [1] : vector<4x4xf32> to vector<4xf32>
    %209 = vector.shape_cast %208 : vector<4xf32> to vector<4x1xf32>
    %210 = vector.broadcast %209 : vector<4x1xf32> to vector<4x4xf32>
    %211 = arith.subf %207, %210 : vector<4x4xf32>
    %212 = math.exp %211 : vector<4x4xf32>
    %cst_113 = arith.constant dense<0.000000e+00> : vector<4xf32>
    %213 = vector.multi_reduction <add>, %212, %cst_113 [1] : vector<4x4xf32> to vector<4xf32>
    %214 = vector.shape_cast %213 : vector<4xf32> to vector<4x1xf32>
    %215 = tpu.reciprocal %214 {approx = true} : vector<4x1xf32> -> vector<4x1xf32>
    %216 = vector.broadcast %215 : vector<4x1xf32> to vector<4x4xf32>
    %217 = arith.mulf %212, %216 : vector<4x4xf32>
    %cst_114 = arith.constant dense<0.000000e+00> : vector<4x8xf32>
    %218 = tpu.matmul %217, %204, %cst_114 {dimension_numbers = #tpu.dot_dimension_numbers<[1], [0], [0], [1], [0, 0, 1, 1], [], []>} : vector<4x4xf32>, vector<4x8xf32>, vector<4x8xf32> -> vector<4x8xf32>
    %219 = arith.addf %202, %218 : vector<4x8xf32>
    %220 = vector.extract_strided_slice %163 {offsets = [0, 24], sizes = [4, 8], strides = [1, 1]} : vector<4x32xf32> to vector<4x8xf32>
    %221 = vector.extract_strided_slice %164 {offsets = [0, 24], sizes = [4, 8], strides = [1, 1]} : vector<4x32xf32> to vector<4x8xf32>
    %222 = vector.extract_strided_slice %165 {offsets = [0, 24], sizes = [4, 8], strides = [1, 1]} : vector<4x32xf32> to vector<4x8xf32>
    %cst_115 = arith.constant dense<0.000000e+00> : vector<4x4xf32>
    %223 = tpu.matmul %220, %221, %cst_115 {dimension_numbers = #tpu.dot_dimension_numbers<[1], [1], [0], [0], [0, 0, 1, 0], [], []>} : vector<4x8xf32>, vector<4x8xf32>, vector<4x4xf32> -> vector<4x4xf32>
    %cst_116 = arith.constant 0.176776692 : f32
    %224 = vector.broadcast %cst_116 : f32 to vector<4x4xf32>
    %225 = arith.mulf %223, %224 : vector<4x4xf32>
    %cst_117 = arith.constant dense<0xFF800000> : vector<4xf32>
    %226 = vector.multi_reduction <maximumf>, %225, %cst_117 [1] : vector<4x4xf32> to vector<4xf32>
    %227 = vector.shape_cast %226 : vector<4xf32> to vector<4x1xf32>
    %228 = vector.broadcast %227 : vector<4x1xf32> to vector<4x4xf32>
    %229 = arith.subf %225, %228 : vector<4x4xf32>
    %230 = math.exp %229 : vector<4x4xf32>
    %cst_118 = arith.constant dense<0.000000e+00> : vector<4xf32>
    %231 = vector.multi_reduction <add>, %230, %cst_118 [1] : vector<4x4xf32> to vector<4xf32>
    %232 = vector.shape_cast %231 : vector<4xf32> to vector<4x1xf32>
    %233 = tpu.reciprocal %232 {approx = true} : vector<4x1xf32> -> vector<4x1xf32>
    %234 = vector.broadcast %233 : vector<4x1xf32> to vector<4x4xf32>
    %235 = arith.mulf %230, %234 : vector<4x4xf32>
    %cst_119 = arith.constant dense<0.000000e+00> : vector<4x8xf32>
    %236 = tpu.matmul %235, %222, %cst_119 {dimension_numbers = #tpu.dot_dimension_numbers<[1], [0], [0], [1], [0, 0, 1, 1], [], []>} : vector<4x4xf32>, vector<4x8xf32>, vector<4x8xf32> -> vector<4x8xf32>
    %237 = arith.addf %220, %236 : vector<4x8xf32>
    %238 = tpu.concatenate %183, %201, %219, %237 in 1 : vector<4x8xf32>, vector<4x8xf32>, vector<4x8xf32>, vector<4x8xf32> -> vector<4x32xf32>
    %cst_120 = arith.constant dense<0.000000e+00> : vector<4x32xf32>
    %239 = tpu.matmul %238, %28, %cst_120 {dimension_numbers = #tpu.dot_dimension_numbers<[1], [0], [0], [1], [0, 0, 1, 1], [], []>} : vector<4x32xf32>, vector<32x32xf32>, vector<4x32xf32> -> vector<4x32xf32>
    %240 = vector.broadcast %29 : vector<1x32xf32> to vector<4x32xf32>
    %241 = arith.addf %239, %240 : vector<4x32xf32>
    %cst_121 = arith.constant 0.000000e+00 : f32
    %242 = vector.broadcast %cst_121 : f32 to vector<4x32xf32>
    %243 = arith.maximumf %241, %242 : vector<4x32xf32>
    %244 = arith.addf %238, %243 : vector<4x32xf32>
    %cst_122 = arith.constant dense<0.000000e+00> : vector<1x32xf32>
    %245 = tpu.matmul %30, %31, %cst_122 {dimension_numbers = #tpu.dot_dimension_numbers<[1], [0], [0], [1], [0, 0, 1, 1], [], []>} : vector<1x32xf32>, vector<32x32xf32>, vector<1x32xf32> -> vector<1x32xf32>
    %246 = arith.addf %245, %32 : vector<1x32xf32>
    %cst_123 = arith.constant dense<0.000000e+00> : vector<4x64xf32>
    %247 = tpu.matmul %244, %33, %cst_123 {dimension_numbers = #tpu.dot_dimension_numbers<[1], [0], [0], [1], [0, 0, 1, 1], [], []>} : vector<4x32xf32>, vector<32x64xf32>, vector<4x64xf32> -> vector<4x64xf32>
    %248 = vector.broadcast %34 : vector<1x64xf32> to vector<4x64xf32>
    %249 = arith.addf %247, %248 : vector<4x64xf32>
    %250 = vector.extract_strided_slice %249 {offsets = [0, 0], sizes = [4, 32], strides = [1, 1]} : vector<4x64xf32> to vector<4x32xf32>
    %251 = vector.extract_strided_slice %249 {offsets = [0, 32], sizes = [4, 32], strides = [1, 1]} : vector<4x64xf32> to vector<4x32xf32>
    %252 = vector.extract_strided_slice %246 {offsets = [0, 0], sizes = [1, 8], strides = [1, 1]} : vector<1x32xf32> to vector<1x8xf32>
    %253 = vector.extract_strided_slice %250 {offsets = [0, 0], sizes = [4, 8], strides = [1, 1]} : vector<4x32xf32> to vector<4x8xf32>
    %254 = vector.extract_strided_slice %251 {offsets = [0, 0], sizes = [4, 8], strides = [1, 1]} : vector<4x32xf32> to vector<4x8xf32>
    %cst_124 = arith.constant dense<0.000000e+00> : vector<1x4xf32>
    %255 = tpu.matmul %252, %253, %cst_124 {dimension_numbers = #tpu.dot_dimension_numbers<[1], [1], [0], [0], [0, 0, 1, 0], [], []>} : vector<1x8xf32>, vector<4x8xf32>, vector<1x4xf32> -> vector<1x4xf32>
    %cst_125 = arith.constant 0.176776692 : f32
    %256 = vector.broadcast %cst_125 : f32 to vector<1x4xf32>
    %257 = arith.mulf %255, %256 : vector<1x4xf32>
    %cst_126 = arith.constant dense<0xFF800000> : vector<1xf32>
    %258 = vector.multi_reduction <maximumf>, %257, %cst_126 [1] : vector<1x4xf32> to vector<1xf32>
    %259 = vector.shape_cast %258 : vector<1xf32> to vector<1x1xf32>
    %260 = vector.broadcast %259 : vector<1x1xf32> to vector<1x4xf32>
    %261 = arith.subf %257, %260 : vector<1x4xf32>
    %262 = math.exp %261 : vector<1x4xf32>
    %cst_127 = arith.constant dense<0.000000e+00> : vector<1xf32>
    %263 = vector.multi_reduction <add>, %262, %cst_127 [1] : vector<1x4xf32> to vector<1xf32>
    %264 = vector.shape_cast %263 : vector<1xf32> to vector<1x1xf32>
    %265 = tpu.reciprocal %264 {approx = true} : vector<1x1xf32> -> vector<1x1xf32>
    %266 = vector.broadcast %265 : vector<1x1xf32> to vector<1x4xf32>
    %267 = arith.mulf %262, %266 : vector<1x4xf32>
    %cst_128 = arith.constant dense<0.000000e+00> : vector<1x8xf32>
    %268 = tpu.matmul %267, %254, %cst_128 {dimension_numbers = #tpu.dot_dimension_numbers<[1], [0], [0], [1], [0, 0, 1, 1], [], []>} : vector<1x4xf32>, vector<4x8xf32>, vector<1x8xf32> -> vector<1x8xf32>
    %269 = arith.addf %252, %268 : vector<1x8xf32>
    %270 = vector.extract_strided_slice %246 {offsets = [0, 8], sizes = [1, 8], strides = [1, 1]} : vector<1x32xf32> to vector<1x8xf32>
    %271 = vector.extract_strided_slice %250 {offsets = [0, 8], sizes = [4, 8], strides = [1, 1]} : vector<4x32xf32> to vector<4x8xf32>
    %272 = vector.extract_strided_slice %251 {offsets = [0, 8], sizes = [4, 8], strides = [1, 1]} : vector<4x32xf32> to vector<4x8xf32>
    %cst_129 = arith.constant dense<0.000000e+00> : vector<1x4xf32>
    %273 = tpu.matmul %270, %271, %cst_129 {dimension_numbers = #tpu.dot_dimension_numbers<[1], [1], [0], [0], [0, 0, 1, 0], [], []>} : vector<1x8xf32>, vector<4x8xf32>, vector<1x4xf32> -> vector<1x4xf32>
    %cst_130 = arith.constant 0.176776692 : f32
    %274 = vector.broadcast %cst_130 : f32 to vector<1x4xf32>
    %275 = arith.mulf %273, %274 : vector<1x4xf32>
    %cst_131 = arith.constant dense<0xFF800000> : vector<1xf32>
    %276 = vector.multi_reduction <maximumf>, %275, %cst_131 [1] : vector<1x4xf32> to vector<1xf32>
    %277 = vector.shape_cast %276 : vector<1xf32> to vector<1x1xf32>
    %278 = vector.broadcast %277 : vector<1x1xf32> to vector<1x4xf32>
    %279 = arith.subf %275, %278 : vector<1x4xf32>
    %280 = math.exp %279 : vector<1x4xf32>
    %cst_132 = arith.constant dense<0.000000e+00> : vector<1xf32>
    %281 = vector.multi_reduction <add>, %280, %cst_132 [1] : vector<1x4xf32> to vector<1xf32>
    %282 = vector.shape_cast %281 : vector<1xf32> to vector<1x1xf32>
    %283 = tpu.reciprocal %282 {approx = true} : vector<1x1xf32> -> vector<1x1xf32>
    %284 = vector.broadcast %283 : vector<1x1xf32> to vector<1x4xf32>
    %285 = arith.mulf %280, %284 : vector<1x4xf32>
    %cst_133 = arith.constant dense<0.000000e+00> : vector<1x8xf32>
    %286 = tpu.matmul %285, %272, %cst_133 {dimension_numbers = #tpu.dot_dimension_numbers<[1], [0], [0], [1], [0, 0, 1, 1], [], []>} : vector<1x4xf32>, vector<4x8xf32>, vector<1x8xf32> -> vector<1x8xf32>
    %287 = arith.addf %270, %286 : vector<1x8xf32>
    %288 = vector.extract_strided_slice %246 {offsets = [0, 16], sizes = [1, 8], strides = [1, 1]} : vector<1x32xf32> to vector<1x8xf32>
    %289 = vector.extract_strided_slice %250 {offsets = [0, 16], sizes = [4, 8], strides = [1, 1]} : vector<4x32xf32> to vector<4x8xf32>
    %290 = vector.extract_strided_slice %251 {offsets = [0, 16], sizes = [4, 8], strides = [1, 1]} : vector<4x32xf32> to vector<4x8xf32>
    %cst_134 = arith.constant dense<0.000000e+00> : vector<1x4xf32>
    %291 = tpu.matmul %288, %289, %cst_134 {dimension_numbers = #tpu.dot_dimension_numbers<[1], [1], [0], [0], [0, 0, 1, 0], [], []>} : vector<1x8xf32>, vector<4x8xf32>, vector<1x4xf32> -> vector<1x4xf32>
    %cst_135 = arith.constant 0.176776692 : f32
    %292 = vector.broadcast %cst_135 : f32 to vector<1x4xf32>
    %293 = arith.mulf %291, %292 : vector<1x4xf32>
    %cst_136 = arith.constant dense<0xFF800000> : vector<1xf32>
    %294 = vector.multi_reduction <maximumf>, %293, %cst_136 [1] : vector<1x4xf32> to vector<1xf32>
    %295 = vector.shape_cast %294 : vector<1xf32> to vector<1x1xf32>
    %296 = vector.broadcast %295 : vector<1x1xf32> to vector<1x4xf32>
    %297 = arith.subf %293, %296 : vector<1x4xf32>
    %298 = math.exp %297 : vector<1x4xf32>
    %cst_137 = arith.constant dense<0.000000e+00> : vector<1xf32>
    %299 = vector.multi_reduction <add>, %298, %cst_137 [1] : vector<1x4xf32> to vector<1xf32>
    %300 = vector.shape_cast %299 : vector<1xf32> to vector<1x1xf32>
    %301 = tpu.reciprocal %300 {approx = true} : vector<1x1xf32> -> vector<1x1xf32>
    %302 = vector.broadcast %301 : vector<1x1xf32> to vector<1x4xf32>
    %303 = arith.mulf %298, %302 : vector<1x4xf32>
    %cst_138 = arith.constant dense<0.000000e+00> : vector<1x8xf32>
    %304 = tpu.matmul %303, %290, %cst_138 {dimension_numbers = #tpu.dot_dimension_numbers<[1], [0], [0], [1], [0, 0, 1, 1], [], []>} : vector<1x4xf32>, vector<4x8xf32>, vector<1x8xf32> -> vector<1x8xf32>
    %305 = arith.addf %288, %304 : vector<1x8xf32>
    %306 = vector.extract_strided_slice %246 {offsets = [0, 24], sizes = [1, 8], strides = [1, 1]} : vector<1x32xf32> to vector<1x8xf32>
    %307 = vector.extract_strided_slice %250 {offsets = [0, 24], sizes = [4, 8], strides = [1, 1]} : vector<4x32xf32> to vector<4x8xf32>
    %308 = vector.extract_strided_slice %251 {offsets = [0, 24], sizes = [4, 8], strides = [1, 1]} : vector<4x32xf32> to vector<4x8xf32>
    %cst_139 = arith.constant dense<0.000000e+00> : vector<1x4xf32>
    %309 = tpu.matmul %306, %307, %cst_139 {dimension_numbers = #tpu.dot_dimension_numbers<[1], [1], [0], [0], [0, 0, 1, 0], [], []>} : vector<1x8xf32>, vector<4x8xf32>, vector<1x4xf32> -> vector<1x4xf32>
    %cst_140 = arith.constant 0.176776692 : f32
    %310 = vector.broadcast %cst_140 : f32 to vector<1x4xf32>
    %311 = arith.mulf %309, %310 : vector<1x4xf32>
    %cst_141 = arith.constant dense<0xFF800000> : vector<1xf32>
    %312 = vector.multi_reduction <maximumf>, %311, %cst_141 [1] : vector<1x4xf32> to vector<1xf32>
    %313 = vector.shape_cast %312 : vector<1xf32> to vector<1x1xf32>
    %314 = vector.broadcast %313 : vector<1x1xf32> to vector<1x4xf32>
    %315 = arith.subf %311, %314 : vector<1x4xf32>
    %316 = math.exp %315 : vector<1x4xf32>
    %cst_142 = arith.constant dense<0.000000e+00> : vector<1xf32>
    %317 = vector.multi_reduction <add>, %316, %cst_142 [1] : vector<1x4xf32> to vector<1xf32>
    %318 = vector.shape_cast %317 : vector<1xf32> to vector<1x1xf32>
    %319 = tpu.reciprocal %318 {approx = true} : vector<1x1xf32> -> vector<1x1xf32>
    %320 = vector.broadcast %319 : vector<1x1xf32> to vector<1x4xf32>
    %321 = arith.mulf %316, %320 : vector<1x4xf32>
    %cst_143 = arith.constant dense<0.000000e+00> : vector<1x8xf32>
    %322 = tpu.matmul %321, %308, %cst_143 {dimension_numbers = #tpu.dot_dimension_numbers<[1], [0], [0], [1], [0, 0, 1, 1], [], []>} : vector<1x4xf32>, vector<4x8xf32>, vector<1x8xf32> -> vector<1x8xf32>
    %323 = arith.addf %306, %322 : vector<1x8xf32>
    %324 = tpu.concatenate %269, %287, %305, %323 in 1 : vector<1x8xf32>, vector<1x8xf32>, vector<1x8xf32>, vector<1x8xf32> -> vector<1x32xf32>
    %cst_144 = arith.constant dense<0.000000e+00> : vector<1x32xf32>
    %325 = tpu.matmul %324, %35, %cst_144 {dimension_numbers = #tpu.dot_dimension_numbers<[1], [0], [0], [1], [0, 0, 1, 1], [], []>} : vector<1x32xf32>, vector<32x32xf32>, vector<1x32xf32> -> vector<1x32xf32>
    %326 = arith.addf %325, %36 : vector<1x32xf32>
    %cst_145 = arith.constant 0.000000e+00 : f32
    %327 = vector.broadcast %cst_145 : f32 to vector<1x32xf32>
    %328 = arith.maximumf %326, %327 : vector<1x32xf32>
    %329 = arith.addf %324, %328 : vector<1x32xf32>
    %cst_146 = arith.constant dense<0.000000e+00> : vector<1x32xf32>
    %330 = tpu.matmul %329, %37, %cst_146 {dimension_numbers = #tpu.dot_dimension_numbers<[1], [0], [0], [1], [0, 0, 1, 1], [], []>} : vector<1x32xf32>, vector<32x32xf32>, vector<1x32xf32> -> vector<1x32xf32>
    %331 = arith.addf %330, %38 : vector<1x32xf32>
    %cst_147 = arith.constant dense<0.000000e+00> : vector<1x32xf32>
    %332 = tpu.matmul %331, %39, %cst_147 {dimension_numbers = #tpu.dot_dimension_numbers<[1], [0], [0], [1], [0, 0, 1, 1], [], []>} : vector<1x32xf32>, vector<32x32xf32>, vector<1x32xf32> -> vector<1x32xf32>
    %333 = arith.addf %332, %40 : vector<1x32xf32>
    %cst_148 = arith.constant 0.000000e+00 : f32
    %334 = vector.broadcast %cst_148 : f32 to vector<1x32xf32>
    %335 = arith.maximumf %333, %334 : vector<1x32xf32>
    %cst_149 = arith.constant dense<0.000000e+00> : vector<1x16xf32>
    %336 = tpu.matmul %335, %41, %cst_149 {dimension_numbers = #tpu.dot_dimension_numbers<[1], [0], [0], [1], [0, 0, 1, 1], [], []>} : vector<1x32xf32>, vector<32x16xf32>, vector<1x16xf32> -> vector<1x16xf32>
    %337 = arith.addf %336, %42 : vector<1x16xf32>
    %cst_150 = arith.constant 0.000000e+00 : f32
    %338 = vector.broadcast %cst_150 : f32 to vector<1x16xf32>
    %339 = arith.maximumf %337, %338 : vector<1x16xf32>
    %cst_151 = arith.constant dense<0.000000e+00> : vector<1x5xf32>
    %340 = tpu.matmul %339, %43, %cst_151 {dimension_numbers = #tpu.dot_dimension_numbers<[1], [0], [0], [1], [0, 0, 1, 1], [], []>} : vector<1x16xf32>, vector<16x5xf32>, vector<1x5xf32> -> vector<1x5xf32>
    %341 = arith.addf %340, %44 : vector<1x5xf32>
    %cst_152 = arith.constant dense<0xFF800000> : vector<1xf32>
    %342 = vector.multi_reduction <maximumf>, %341, %cst_152 [1] : vector<1x5xf32> to vector<1xf32>
    %343 = vector.shape_cast %342 : vector<1xf32> to vector<1x1xf32>
    %344 = vector.broadcast %343 : vector<1x1xf32> to vector<1x5xf32>
    %345 = arith.subf %341, %344 : vector<1x5xf32>
    %346 = math.exp %345 : vector<1x5xf32>
    %cst_153 = arith.constant dense<0.000000e+00> : vector<1xf32>
    %347 = vector.multi_reduction <add>, %346, %cst_153 [1] : vector<1x5xf32> to vector<1xf32>
    %348 = vector.shape_cast %347 : vector<1xf32> to vector<1x1xf32>
    %349 = math.log %348 : vector<1x1xf32>
    %350 = vector.broadcast %349 : vector<1x1xf32> to vector<1x5xf32>
    %351 = arith.subf %345, %350 : vector<1x5xf32>
    %c1 = arith.constant 1 : index
    %352 = memref.load %arg0[%c1] : memref<2xi32, #tpu.memory_space<smem>>
    %c1_154 = arith.constant 1 : index
    %353 = memref.load %arg1[%c1_154] : memref<2xi32, #tpu.memory_space<smem>>
    %354 = vector.broadcast %352 : i32 to vector<6x16xi32>
    %355 = arith.addi %354, %45 : vector<6x16xi32>
    %356 = arith.cmpi eq, %46, %355 : vector<6x16xi32>
    %357 = vector.broadcast %353 : i32 to vector<6x16xi32>
    %358 = arith.cmpi slt, %45, %357 : vector<6x16xi32>
    %359 = arith.andi %356, %358 : vector<6x16xi1>
    %cst_155 = arith.constant 1.000000e+00 : f32
    %cst_156 = arith.constant 0.000000e+00 : f32
    %360 = vector.broadcast %cst_155 : f32 to vector<6x16xf32>
    %361 = vector.broadcast %cst_156 : f32 to vector<6x16xf32>
    %362 = arith.select %359, %360, %361 : vector<6x16xi1>, vector<6x16xf32>
    %cst_157 = arith.constant dense<0.000000e+00> : vector<6x64xf32>
    %363 = tpu.matmul %362, %18, %cst_157 {dimension_numbers = #tpu.dot_dimension_numbers<[1], [0], [0], [1], [0, 0, 1, 1], [], []>} : vector<6x16xf32>, vector<16x64xf32>, vector<6x64xf32> -> vector<6x64xf32>
    %364 = vector.broadcast %353 : i32 to vector<1x6xi32>
    %365 = arith.cmpi slt, %47, %364 : vector<1x6xi32>
    %cst_158 = arith.constant 0.000000e+00 : f32
    %cst_159 = arith.constant -1.000000e+09 : f32
    %366 = vector.broadcast %cst_158 : f32 to vector<1x6xf32>
    %367 = vector.broadcast %cst_159 : f32 to vector<1x6xf32>
    %368 = arith.select %365, %366, %367 : vector<1x6xi1>, vector<1x6xf32>
    %cst_160 = arith.constant dense<0.000000e+00> : vector<4x64xf32>
    %369 = tpu.matmul %19, %20, %cst_160 {dimension_numbers = #tpu.dot_dimension_numbers<[1], [0], [0], [1], [0, 0, 1, 1], [], []>} : vector<4x64xf32>, vector<64x64xf32>, vector<4x64xf32> -> vector<4x64xf32>
    %370 = vector.broadcast %21 : vector<1x64xf32> to vector<4x64xf32>
    %371 = arith.addf %369, %370 : vector<4x64xf32>
    %cst_161 = arith.constant dense<0.000000e+00> : vector<6x128xf32>
    %372 = tpu.matmul %363, %22, %cst_161 {dimension_numbers = #tpu.dot_dimension_numbers<[1], [0], [0], [1], [0, 0, 1, 1], [], []>} : vector<6x64xf32>, vector<64x128xf32>, vector<6x128xf32> -> vector<6x128xf32>
    %373 = vector.broadcast %23 : vector<1x128xf32> to vector<6x128xf32>
    %374 = arith.addf %372, %373 : vector<6x128xf32>
    %375 = vector.extract_strided_slice %374 {offsets = [0, 0], sizes = [6, 64], strides = [1, 1]} : vector<6x128xf32> to vector<6x64xf32>
    %376 = vector.extract_strided_slice %374 {offsets = [0, 64], sizes = [6, 64], strides = [1, 1]} : vector<6x128xf32> to vector<6x64xf32>
    %377 = vector.extract_strided_slice %371 {offsets = [0, 0], sizes = [4, 16], strides = [1, 1]} : vector<4x64xf32> to vector<4x16xf32>
    %378 = vector.extract_strided_slice %375 {offsets = [0, 0], sizes = [6, 16], strides = [1, 1]} : vector<6x64xf32> to vector<6x16xf32>
    %379 = vector.extract_strided_slice %376 {offsets = [0, 0], sizes = [6, 16], strides = [1, 1]} : vector<6x64xf32> to vector<6x16xf32>
    %cst_162 = arith.constant dense<0.000000e+00> : vector<4x6xf32>
    %380 = tpu.matmul %377, %378, %cst_162 {dimension_numbers = #tpu.dot_dimension_numbers<[1], [1], [0], [0], [0, 0, 1, 0], [], []>} : vector<4x16xf32>, vector<6x16xf32>, vector<4x6xf32> -> vector<4x6xf32>
    %cst_163 = arith.constant 1.250000e-01 : f32
    %381 = vector.broadcast %cst_163 : f32 to vector<4x6xf32>
    %382 = arith.mulf %380, %381 : vector<4x6xf32>
    %383 = vector.broadcast %368 : vector<1x6xf32> to vector<4x6xf32>
    %384 = arith.addf %382, %383 : vector<4x6xf32>
    %cst_164 = arith.constant dense<0xFF800000> : vector<4xf32>
    %385 = vector.multi_reduction <maximumf>, %384, %cst_164 [1] : vector<4x6xf32> to vector<4xf32>
    %386 = vector.shape_cast %385 : vector<4xf32> to vector<4x1xf32>
    %387 = vector.broadcast %386 : vector<4x1xf32> to vector<4x6xf32>
    %388 = arith.subf %384, %387 : vector<4x6xf32>
    %389 = math.exp %388 : vector<4x6xf32>
    %cst_165 = arith.constant dense<0.000000e+00> : vector<4xf32>
    %390 = vector.multi_reduction <add>, %389, %cst_165 [1] : vector<4x6xf32> to vector<4xf32>
    %391 = vector.shape_cast %390 : vector<4xf32> to vector<4x1xf32>
    %392 = tpu.reciprocal %391 {approx = true} : vector<4x1xf32> -> vector<4x1xf32>
    %393 = vector.broadcast %392 : vector<4x1xf32> to vector<4x6xf32>
    %394 = arith.mulf %389, %393 : vector<4x6xf32>
    %cst_166 = arith.constant dense<0.000000e+00> : vector<4x16xf32>
    %395 = tpu.matmul %394, %379, %cst_166 {dimension_numbers = #tpu.dot_dimension_numbers<[1], [0], [0], [1], [0, 0, 1, 1], [], []>} : vector<4x6xf32>, vector<6x16xf32>, vector<4x16xf32> -> vector<4x16xf32>
    %396 = arith.addf %377, %395 : vector<4x16xf32>
    %397 = vector.extract_strided_slice %371 {offsets = [0, 16], sizes = [4, 16], strides = [1, 1]} : vector<4x64xf32> to vector<4x16xf32>
    %398 = vector.extract_strided_slice %375 {offsets = [0, 16], sizes = [6, 16], strides = [1, 1]} : vector<6x64xf32> to vector<6x16xf32>
    %399 = vector.extract_strided_slice %376 {offsets = [0, 16], sizes = [6, 16], strides = [1, 1]} : vector<6x64xf32> to vector<6x16xf32>
    %cst_167 = arith.constant dense<0.000000e+00> : vector<4x6xf32>
    %400 = tpu.matmul %397, %398, %cst_167 {dimension_numbers = #tpu.dot_dimension_numbers<[1], [1], [0], [0], [0, 0, 1, 0], [], []>} : vector<4x16xf32>, vector<6x16xf32>, vector<4x6xf32> -> vector<4x6xf32>
    %cst_168 = arith.constant 1.250000e-01 : f32
    %401 = vector.broadcast %cst_168 : f32 to vector<4x6xf32>
    %402 = arith.mulf %400, %401 : vector<4x6xf32>
    %403 = vector.broadcast %368 : vector<1x6xf32> to vector<4x6xf32>
    %404 = arith.addf %402, %403 : vector<4x6xf32>
    %cst_169 = arith.constant dense<0xFF800000> : vector<4xf32>
    %405 = vector.multi_reduction <maximumf>, %404, %cst_169 [1] : vector<4x6xf32> to vector<4xf32>
    %406 = vector.shape_cast %405 : vector<4xf32> to vector<4x1xf32>
    %407 = vector.broadcast %406 : vector<4x1xf32> to vector<4x6xf32>
    %408 = arith.subf %404, %407 : vector<4x6xf32>
    %409 = math.exp %408 : vector<4x6xf32>
    %cst_170 = arith.constant dense<0.000000e+00> : vector<4xf32>
    %410 = vector.multi_reduction <add>, %409, %cst_170 [1] : vector<4x6xf32> to vector<4xf32>
    %411 = vector.shape_cast %410 : vector<4xf32> to vector<4x1xf32>
    %412 = tpu.reciprocal %411 {approx = true} : vector<4x1xf32> -> vector<4x1xf32>
    %413 = vector.broadcast %412 : vector<4x1xf32> to vector<4x6xf32>
    %414 = arith.mulf %409, %413 : vector<4x6xf32>
    %cst_171 = arith.constant dense<0.000000e+00> : vector<4x16xf32>
    %415 = tpu.matmul %414, %399, %cst_171 {dimension_numbers = #tpu.dot_dimension_numbers<[1], [0], [0], [1], [0, 0, 1, 1], [], []>} : vector<4x6xf32>, vector<6x16xf32>, vector<4x16xf32> -> vector<4x16xf32>
    %416 = arith.addf %397, %415 : vector<4x16xf32>
    %417 = vector.extract_strided_slice %371 {offsets = [0, 32], sizes = [4, 16], strides = [1, 1]} : vector<4x64xf32> to vector<4x16xf32>
    %418 = vector.extract_strided_slice %375 {offsets = [0, 32], sizes = [6, 16], strides = [1, 1]} : vector<6x64xf32> to vector<6x16xf32>
    %419 = vector.extract_strided_slice %376 {offsets = [0, 32], sizes = [6, 16], strides = [1, 1]} : vector<6x64xf32> to vector<6x16xf32>
    %cst_172 = arith.constant dense<0.000000e+00> : vector<4x6xf32>
    %420 = tpu.matmul %417, %418, %cst_172 {dimension_numbers = #tpu.dot_dimension_numbers<[1], [1], [0], [0], [0, 0, 1, 0], [], []>} : vector<4x16xf32>, vector<6x16xf32>, vector<4x6xf32> -> vector<4x6xf32>
    %cst_173 = arith.constant 1.250000e-01 : f32
    %421 = vector.broadcast %cst_173 : f32 to vector<4x6xf32>
    %422 = arith.mulf %420, %421 : vector<4x6xf32>
    %423 = vector.broadcast %368 : vector<1x6xf32> to vector<4x6xf32>
    %424 = arith.addf %422, %423 : vector<4x6xf32>
    %cst_174 = arith.constant dense<0xFF800000> : vector<4xf32>
    %425 = vector.multi_reduction <maximumf>, %424, %cst_174 [1] : vector<4x6xf32> to vector<4xf32>
    %426 = vector.shape_cast %425 : vector<4xf32> to vector<4x1xf32>
    %427 = vector.broadcast %426 : vector<4x1xf32> to vector<4x6xf32>
    %428 = arith.subf %424, %427 : vector<4x6xf32>
    %429 = math.exp %428 : vector<4x6xf32>
    %cst_175 = arith.constant dense<0.000000e+00> : vector<4xf32>
    %430 = vector.multi_reduction <add>, %429, %cst_175 [1] : vector<4x6xf32> to vector<4xf32>
    %431 = vector.shape_cast %430 : vector<4xf32> to vector<4x1xf32>
    %432 = tpu.reciprocal %431 {approx = true} : vector<4x1xf32> -> vector<4x1xf32>
    %433 = vector.broadcast %432 : vector<4x1xf32> to vector<4x6xf32>
    %434 = arith.mulf %429, %433 : vector<4x6xf32>
    %cst_176 = arith.constant dense<0.000000e+00> : vector<4x16xf32>
    %435 = tpu.matmul %434, %419, %cst_176 {dimension_numbers = #tpu.dot_dimension_numbers<[1], [0], [0], [1], [0, 0, 1, 1], [], []>} : vector<4x6xf32>, vector<6x16xf32>, vector<4x16xf32> -> vector<4x16xf32>
    %436 = arith.addf %417, %435 : vector<4x16xf32>
    %437 = vector.extract_strided_slice %371 {offsets = [0, 48], sizes = [4, 16], strides = [1, 1]} : vector<4x64xf32> to vector<4x16xf32>
    %438 = vector.extract_strided_slice %375 {offsets = [0, 48], sizes = [6, 16], strides = [1, 1]} : vector<6x64xf32> to vector<6x16xf32>
    %439 = vector.extract_strided_slice %376 {offsets = [0, 48], sizes = [6, 16], strides = [1, 1]} : vector<6x64xf32> to vector<6x16xf32>
    %cst_177 = arith.constant dense<0.000000e+00> : vector<4x6xf32>
    %440 = tpu.matmul %437, %438, %cst_177 {dimension_numbers = #tpu.dot_dimension_numbers<[1], [1], [0], [0], [0, 0, 1, 0], [], []>} : vector<4x16xf32>, vector<6x16xf32>, vector<4x6xf32> -> vector<4x6xf32>
    %cst_178 = arith.constant 1.250000e-01 : f32
    %441 = vector.broadcast %cst_178 : f32 to vector<4x6xf32>
    %442 = arith.mulf %440, %441 : vector<4x6xf32>
    %443 = vector.broadcast %368 : vector<1x6xf32> to vector<4x6xf32>
    %444 = arith.addf %442, %443 : vector<4x6xf32>
    %cst_179 = arith.constant dense<0xFF800000> : vector<4xf32>
    %445 = vector.multi_reduction <maximumf>, %444, %cst_179 [1] : vector<4x6xf32> to vector<4xf32>
    %446 = vector.shape_cast %445 : vector<4xf32> to vector<4x1xf32>
    %447 = vector.broadcast %446 : vector<4x1xf32> to vector<4x6xf32>
    %448 = arith.subf %444, %447 : vector<4x6xf32>
    %449 = math.exp %448 : vector<4x6xf32>
    %cst_180 = arith.constant dense<0.000000e+00> : vector<4xf32>
    %450 = vector.multi_reduction <add>, %449, %cst_180 [1] : vector<4x6xf32> to vector<4xf32>
    %451 = vector.shape_cast %450 : vector<4xf32> to vector<4x1xf32>
    %452 = tpu.reciprocal %451 {approx = true} : vector<4x1xf32> -> vector<4x1xf32>
    %453 = vector.broadcast %452 : vector<4x1xf32> to vector<4x6xf32>
    %454 = arith.mulf %449, %453 : vector<4x6xf32>
    %cst_181 = arith.constant dense<0.000000e+00> : vector<4x16xf32>
    %455 = tpu.matmul %454, %439, %cst_181 {dimension_numbers = #tpu.dot_dimension_numbers<[1], [0], [0], [1], [0, 0, 1, 1], [], []>} : vector<4x6xf32>, vector<6x16xf32>, vector<4x16xf32> -> vector<4x16xf32>
    %456 = arith.addf %437, %455 : vector<4x16xf32>
    %457 = tpu.concatenate %396, %416, %436, %456 in 1 : vector<4x16xf32>, vector<4x16xf32>, vector<4x16xf32>, vector<4x16xf32> -> vector<4x64xf32>
    %cst_182 = arith.constant dense<0.000000e+00> : vector<4x64xf32>
    %458 = tpu.matmul %457, %24, %cst_182 {dimension_numbers = #tpu.dot_dimension_numbers<[1], [0], [0], [1], [0, 0, 1, 1], [], []>} : vector<4x64xf32>, vector<64x64xf32>, vector<4x64xf32> -> vector<4x64xf32>
    %459 = vector.broadcast %25 : vector<1x64xf32> to vector<4x64xf32>
    %460 = arith.addf %458, %459 : vector<4x64xf32>
    %cst_183 = arith.constant 0.000000e+00 : f32
    %461 = vector.broadcast %cst_183 : f32 to vector<4x64xf32>
    %462 = arith.maximumf %460, %461 : vector<4x64xf32>
    %463 = arith.addf %457, %462 : vector<4x64xf32>
    %cst_184 = arith.constant dense<0.000000e+00> : vector<4x96xf32>
    %464 = tpu.matmul %463, %26, %cst_184 {dimension_numbers = #tpu.dot_dimension_numbers<[1], [0], [0], [1], [0, 0, 1, 1], [], []>} : vector<4x64xf32>, vector<64x96xf32>, vector<4x96xf32> -> vector<4x96xf32>
    %465 = vector.broadcast %27 : vector<1x96xf32> to vector<4x96xf32>
    %466 = arith.addf %464, %465 : vector<4x96xf32>
    %467 = vector.extract_strided_slice %466 {offsets = [0, 0], sizes = [4, 32], strides = [1, 1]} : vector<4x96xf32> to vector<4x32xf32>
    %468 = vector.extract_strided_slice %466 {offsets = [0, 32], sizes = [4, 32], strides = [1, 1]} : vector<4x96xf32> to vector<4x32xf32>
    %469 = vector.extract_strided_slice %466 {offsets = [0, 64], sizes = [4, 32], strides = [1, 1]} : vector<4x96xf32> to vector<4x32xf32>
    %470 = vector.extract_strided_slice %467 {offsets = [0, 0], sizes = [4, 8], strides = [1, 1]} : vector<4x32xf32> to vector<4x8xf32>
    %471 = vector.extract_strided_slice %468 {offsets = [0, 0], sizes = [4, 8], strides = [1, 1]} : vector<4x32xf32> to vector<4x8xf32>
    %472 = vector.extract_strided_slice %469 {offsets = [0, 0], sizes = [4, 8], strides = [1, 1]} : vector<4x32xf32> to vector<4x8xf32>
    %cst_185 = arith.constant dense<0.000000e+00> : vector<4x4xf32>
    %473 = tpu.matmul %470, %471, %cst_185 {dimension_numbers = #tpu.dot_dimension_numbers<[1], [1], [0], [0], [0, 0, 1, 0], [], []>} : vector<4x8xf32>, vector<4x8xf32>, vector<4x4xf32> -> vector<4x4xf32>
    %cst_186 = arith.constant 0.176776692 : f32
    %474 = vector.broadcast %cst_186 : f32 to vector<4x4xf32>
    %475 = arith.mulf %473, %474 : vector<4x4xf32>
    %cst_187 = arith.constant dense<0xFF800000> : vector<4xf32>
    %476 = vector.multi_reduction <maximumf>, %475, %cst_187 [1] : vector<4x4xf32> to vector<4xf32>
    %477 = vector.shape_cast %476 : vector<4xf32> to vector<4x1xf32>
    %478 = vector.broadcast %477 : vector<4x1xf32> to vector<4x4xf32>
    %479 = arith.subf %475, %478 : vector<4x4xf32>
    %480 = math.exp %479 : vector<4x4xf32>
    %cst_188 = arith.constant dense<0.000000e+00> : vector<4xf32>
    %481 = vector.multi_reduction <add>, %480, %cst_188 [1] : vector<4x4xf32> to vector<4xf32>
    %482 = vector.shape_cast %481 : vector<4xf32> to vector<4x1xf32>
    %483 = tpu.reciprocal %482 {approx = true} : vector<4x1xf32> -> vector<4x1xf32>
    %484 = vector.broadcast %483 : vector<4x1xf32> to vector<4x4xf32>
    %485 = arith.mulf %480, %484 : vector<4x4xf32>
    %cst_189 = arith.constant dense<0.000000e+00> : vector<4x8xf32>
    %486 = tpu.matmul %485, %472, %cst_189 {dimension_numbers = #tpu.dot_dimension_numbers<[1], [0], [0], [1], [0, 0, 1, 1], [], []>} : vector<4x4xf32>, vector<4x8xf32>, vector<4x8xf32> -> vector<4x8xf32>
    %487 = arith.addf %470, %486 : vector<4x8xf32>
    %488 = vector.extract_strided_slice %467 {offsets = [0, 8], sizes = [4, 8], strides = [1, 1]} : vector<4x32xf32> to vector<4x8xf32>
    %489 = vector.extract_strided_slice %468 {offsets = [0, 8], sizes = [4, 8], strides = [1, 1]} : vector<4x32xf32> to vector<4x8xf32>
    %490 = vector.extract_strided_slice %469 {offsets = [0, 8], sizes = [4, 8], strides = [1, 1]} : vector<4x32xf32> to vector<4x8xf32>
    %cst_190 = arith.constant dense<0.000000e+00> : vector<4x4xf32>
    %491 = tpu.matmul %488, %489, %cst_190 {dimension_numbers = #tpu.dot_dimension_numbers<[1], [1], [0], [0], [0, 0, 1, 0], [], []>} : vector<4x8xf32>, vector<4x8xf32>, vector<4x4xf32> -> vector<4x4xf32>
    %cst_191 = arith.constant 0.176776692 : f32
    %492 = vector.broadcast %cst_191 : f32 to vector<4x4xf32>
    %493 = arith.mulf %491, %492 : vector<4x4xf32>
    %cst_192 = arith.constant dense<0xFF800000> : vector<4xf32>
    %494 = vector.multi_reduction <maximumf>, %493, %cst_192 [1] : vector<4x4xf32> to vector<4xf32>
    %495 = vector.shape_cast %494 : vector<4xf32> to vector<4x1xf32>
    %496 = vector.broadcast %495 : vector<4x1xf32> to vector<4x4xf32>
    %497 = arith.subf %493, %496 : vector<4x4xf32>
    %498 = math.exp %497 : vector<4x4xf32>
    %cst_193 = arith.constant dense<0.000000e+00> : vector<4xf32>
    %499 = vector.multi_reduction <add>, %498, %cst_193 [1] : vector<4x4xf32> to vector<4xf32>
    %500 = vector.shape_cast %499 : vector<4xf32> to vector<4x1xf32>
    %501 = tpu.reciprocal %500 {approx = true} : vector<4x1xf32> -> vector<4x1xf32>
    %502 = vector.broadcast %501 : vector<4x1xf32> to vector<4x4xf32>
    %503 = arith.mulf %498, %502 : vector<4x4xf32>
    %cst_194 = arith.constant dense<0.000000e+00> : vector<4x8xf32>
    %504 = tpu.matmul %503, %490, %cst_194 {dimension_numbers = #tpu.dot_dimension_numbers<[1], [0], [0], [1], [0, 0, 1, 1], [], []>} : vector<4x4xf32>, vector<4x8xf32>, vector<4x8xf32> -> vector<4x8xf32>
    %505 = arith.addf %488, %504 : vector<4x8xf32>
    %506 = vector.extract_strided_slice %467 {offsets = [0, 16], sizes = [4, 8], strides = [1, 1]} : vector<4x32xf32> to vector<4x8xf32>
    %507 = vector.extract_strided_slice %468 {offsets = [0, 16], sizes = [4, 8], strides = [1, 1]} : vector<4x32xf32> to vector<4x8xf32>
    %508 = vector.extract_strided_slice %469 {offsets = [0, 16], sizes = [4, 8], strides = [1, 1]} : vector<4x32xf32> to vector<4x8xf32>
    %cst_195 = arith.constant dense<0.000000e+00> : vector<4x4xf32>
    %509 = tpu.matmul %506, %507, %cst_195 {dimension_numbers = #tpu.dot_dimension_numbers<[1], [1], [0], [0], [0, 0, 1, 0], [], []>} : vector<4x8xf32>, vector<4x8xf32>, vector<4x4xf32> -> vector<4x4xf32>
    %cst_196 = arith.constant 0.176776692 : f32
    %510 = vector.broadcast %cst_196 : f32 to vector<4x4xf32>
    %511 = arith.mulf %509, %510 : vector<4x4xf32>
    %cst_197 = arith.constant dense<0xFF800000> : vector<4xf32>
    %512 = vector.multi_reduction <maximumf>, %511, %cst_197 [1] : vector<4x4xf32> to vector<4xf32>
    %513 = vector.shape_cast %512 : vector<4xf32> to vector<4x1xf32>
    %514 = vector.broadcast %513 : vector<4x1xf32> to vector<4x4xf32>
    %515 = arith.subf %511, %514 : vector<4x4xf32>
    %516 = math.exp %515 : vector<4x4xf32>
    %cst_198 = arith.constant dense<0.000000e+00> : vector<4xf32>
    %517 = vector.multi_reduction <add>, %516, %cst_198 [1] : vector<4x4xf32> to vector<4xf32>
    %518 = vector.shape_cast %517 : vector<4xf32> to vector<4x1xf32>
    %519 = tpu.reciprocal %518 {approx = true} : vector<4x1xf32> -> vector<4x1xf32>
    %520 = vector.broadcast %519 : vector<4x1xf32> to vector<4x4xf32>
    %521 = arith.mulf %516, %520 : vector<4x4xf32>
    %cst_199 = arith.constant dense<0.000000e+00> : vector<4x8xf32>
    %522 = tpu.matmul %521, %508, %cst_199 {dimension_numbers = #tpu.dot_dimension_numbers<[1], [0], [0], [1], [0, 0, 1, 1], [], []>} : vector<4x4xf32>, vector<4x8xf32>, vector<4x8xf32> -> vector<4x8xf32>
    %523 = arith.addf %506, %522 : vector<4x8xf32>
    %524 = vector.extract_strided_slice %467 {offsets = [0, 24], sizes = [4, 8], strides = [1, 1]} : vector<4x32xf32> to vector<4x8xf32>
    %525 = vector.extract_strided_slice %468 {offsets = [0, 24], sizes = [4, 8], strides = [1, 1]} : vector<4x32xf32> to vector<4x8xf32>
    %526 = vector.extract_strided_slice %469 {offsets = [0, 24], sizes = [4, 8], strides = [1, 1]} : vector<4x32xf32> to vector<4x8xf32>
    %cst_200 = arith.constant dense<0.000000e+00> : vector<4x4xf32>
    %527 = tpu.matmul %524, %525, %cst_200 {dimension_numbers = #tpu.dot_dimension_numbers<[1], [1], [0], [0], [0, 0, 1, 0], [], []>} : vector<4x8xf32>, vector<4x8xf32>, vector<4x4xf32> -> vector<4x4xf32>
    %cst_201 = arith.constant 0.176776692 : f32
    %528 = vector.broadcast %cst_201 : f32 to vector<4x4xf32>
    %529 = arith.mulf %527, %528 : vector<4x4xf32>
    %cst_202 = arith.constant dense<0xFF800000> : vector<4xf32>
    %530 = vector.multi_reduction <maximumf>, %529, %cst_202 [1] : vector<4x4xf32> to vector<4xf32>
    %531 = vector.shape_cast %530 : vector<4xf32> to vector<4x1xf32>
    %532 = vector.broadcast %531 : vector<4x1xf32> to vector<4x4xf32>
    %533 = arith.subf %529, %532 : vector<4x4xf32>
    %534 = math.exp %533 : vector<4x4xf32>
    %cst_203 = arith.constant dense<0.000000e+00> : vector<4xf32>
    %535 = vector.multi_reduction <add>, %534, %cst_203 [1] : vector<4x4xf32> to vector<4xf32>
    %536 = vector.shape_cast %535 : vector<4xf32> to vector<4x1xf32>
    %537 = tpu.reciprocal %536 {approx = true} : vector<4x1xf32> -> vector<4x1xf32>
    %538 = vector.broadcast %537 : vector<4x1xf32> to vector<4x4xf32>
    %539 = arith.mulf %534, %538 : vector<4x4xf32>
    %cst_204 = arith.constant dense<0.000000e+00> : vector<4x8xf32>
    %540 = tpu.matmul %539, %526, %cst_204 {dimension_numbers = #tpu.dot_dimension_numbers<[1], [0], [0], [1], [0, 0, 1, 1], [], []>} : vector<4x4xf32>, vector<4x8xf32>, vector<4x8xf32> -> vector<4x8xf32>
    %541 = arith.addf %524, %540 : vector<4x8xf32>
    %542 = tpu.concatenate %487, %505, %523, %541 in 1 : vector<4x8xf32>, vector<4x8xf32>, vector<4x8xf32>, vector<4x8xf32> -> vector<4x32xf32>
    %cst_205 = arith.constant dense<0.000000e+00> : vector<4x32xf32>
    %543 = tpu.matmul %542, %28, %cst_205 {dimension_numbers = #tpu.dot_dimension_numbers<[1], [0], [0], [1], [0, 0, 1, 1], [], []>} : vector<4x32xf32>, vector<32x32xf32>, vector<4x32xf32> -> vector<4x32xf32>
    %544 = vector.broadcast %29 : vector<1x32xf32> to vector<4x32xf32>
    %545 = arith.addf %543, %544 : vector<4x32xf32>
    %cst_206 = arith.constant 0.000000e+00 : f32
    %546 = vector.broadcast %cst_206 : f32 to vector<4x32xf32>
    %547 = arith.maximumf %545, %546 : vector<4x32xf32>
    %548 = arith.addf %542, %547 : vector<4x32xf32>
    %cst_207 = arith.constant dense<0.000000e+00> : vector<1x32xf32>
    %549 = tpu.matmul %30, %31, %cst_207 {dimension_numbers = #tpu.dot_dimension_numbers<[1], [0], [0], [1], [0, 0, 1, 1], [], []>} : vector<1x32xf32>, vector<32x32xf32>, vector<1x32xf32> -> vector<1x32xf32>
    %550 = arith.addf %549, %32 : vector<1x32xf32>
    %cst_208 = arith.constant dense<0.000000e+00> : vector<4x64xf32>
    %551 = tpu.matmul %548, %33, %cst_208 {dimension_numbers = #tpu.dot_dimension_numbers<[1], [0], [0], [1], [0, 0, 1, 1], [], []>} : vector<4x32xf32>, vector<32x64xf32>, vector<4x64xf32> -> vector<4x64xf32>
    %552 = vector.broadcast %34 : vector<1x64xf32> to vector<4x64xf32>
    %553 = arith.addf %551, %552 : vector<4x64xf32>
    %554 = vector.extract_strided_slice %553 {offsets = [0, 0], sizes = [4, 32], strides = [1, 1]} : vector<4x64xf32> to vector<4x32xf32>
    %555 = vector.extract_strided_slice %553 {offsets = [0, 32], sizes = [4, 32], strides = [1, 1]} : vector<4x64xf32> to vector<4x32xf32>
    %556 = vector.extract_strided_slice %550 {offsets = [0, 0], sizes = [1, 8], strides = [1, 1]} : vector<1x32xf32> to vector<1x8xf32>
    %557 = vector.extract_strided_slice %554 {offsets = [0, 0], sizes = [4, 8], strides = [1, 1]} : vector<4x32xf32> to vector<4x8xf32>
    %558 = vector.extract_strided_slice %555 {offsets = [0, 0], sizes = [4, 8], strides = [1, 1]} : vector<4x32xf32> to vector<4x8xf32>
    %cst_209 = arith.constant dense<0.000000e+00> : vector<1x4xf32>
    %559 = tpu.matmul %556, %557, %cst_209 {dimension_numbers = #tpu.dot_dimension_numbers<[1], [1], [0], [0], [0, 0, 1, 0], [], []>} : vector<1x8xf32>, vector<4x8xf32>, vector<1x4xf32> -> vector<1x4xf32>
    %cst_210 = arith.constant 0.176776692 : f32
    %560 = vector.broadcast %cst_210 : f32 to vector<1x4xf32>
    %561 = arith.mulf %559, %560 : vector<1x4xf32>
    %cst_211 = arith.constant dense<0xFF800000> : vector<1xf32>
    %562 = vector.multi_reduction <maximumf>, %561, %cst_211 [1] : vector<1x4xf32> to vector<1xf32>
    %563 = vector.shape_cast %562 : vector<1xf32> to vector<1x1xf32>
    %564 = vector.broadcast %563 : vector<1x1xf32> to vector<1x4xf32>
    %565 = arith.subf %561, %564 : vector<1x4xf32>
    %566 = math.exp %565 : vector<1x4xf32>
    %cst_212 = arith.constant dense<0.000000e+00> : vector<1xf32>
    %567 = vector.multi_reduction <add>, %566, %cst_212 [1] : vector<1x4xf32> to vector<1xf32>
    %568 = vector.shape_cast %567 : vector<1xf32> to vector<1x1xf32>
    %569 = tpu.reciprocal %568 {approx = true} : vector<1x1xf32> -> vector<1x1xf32>
    %570 = vector.broadcast %569 : vector<1x1xf32> to vector<1x4xf32>
    %571 = arith.mulf %566, %570 : vector<1x4xf32>
    %cst_213 = arith.constant dense<0.000000e+00> : vector<1x8xf32>
    %572 = tpu.matmul %571, %558, %cst_213 {dimension_numbers = #tpu.dot_dimension_numbers<[1], [0], [0], [1], [0, 0, 1, 1], [], []>} : vector<1x4xf32>, vector<4x8xf32>, vector<1x8xf32> -> vector<1x8xf32>
    %573 = arith.addf %556, %572 : vector<1x8xf32>
    %574 = vector.extract_strided_slice %550 {offsets = [0, 8], sizes = [1, 8], strides = [1, 1]} : vector<1x32xf32> to vector<1x8xf32>
    %575 = vector.extract_strided_slice %554 {offsets = [0, 8], sizes = [4, 8], strides = [1, 1]} : vector<4x32xf32> to vector<4x8xf32>
    %576 = vector.extract_strided_slice %555 {offsets = [0, 8], sizes = [4, 8], strides = [1, 1]} : vector<4x32xf32> to vector<4x8xf32>
    %cst_214 = arith.constant dense<0.000000e+00> : vector<1x4xf32>
    %577 = tpu.matmul %574, %575, %cst_214 {dimension_numbers = #tpu.dot_dimension_numbers<[1], [1], [0], [0], [0, 0, 1, 0], [], []>} : vector<1x8xf32>, vector<4x8xf32>, vector<1x4xf32> -> vector<1x4xf32>
    %cst_215 = arith.constant 0.176776692 : f32
    %578 = vector.broadcast %cst_215 : f32 to vector<1x4xf32>
    %579 = arith.mulf %577, %578 : vector<1x4xf32>
    %cst_216 = arith.constant dense<0xFF800000> : vector<1xf32>
    %580 = vector.multi_reduction <maximumf>, %579, %cst_216 [1] : vector<1x4xf32> to vector<1xf32>
    %581 = vector.shape_cast %580 : vector<1xf32> to vector<1x1xf32>
    %582 = vector.broadcast %581 : vector<1x1xf32> to vector<1x4xf32>
    %583 = arith.subf %579, %582 : vector<1x4xf32>
    %584 = math.exp %583 : vector<1x4xf32>
    %cst_217 = arith.constant dense<0.000000e+00> : vector<1xf32>
    %585 = vector.multi_reduction <add>, %584, %cst_217 [1] : vector<1x4xf32> to vector<1xf32>
    %586 = vector.shape_cast %585 : vector<1xf32> to vector<1x1xf32>
    %587 = tpu.reciprocal %586 {approx = true} : vector<1x1xf32> -> vector<1x1xf32>
    %588 = vector.broadcast %587 : vector<1x1xf32> to vector<1x4xf32>
    %589 = arith.mulf %584, %588 : vector<1x4xf32>
    %cst_218 = arith.constant dense<0.000000e+00> : vector<1x8xf32>
    %590 = tpu.matmul %589, %576, %cst_218 {dimension_numbers = #tpu.dot_dimension_numbers<[1], [0], [0], [1], [0, 0, 1, 1], [], []>} : vector<1x4xf32>, vector<4x8xf32>, vector<1x8xf32> -> vector<1x8xf32>
    %591 = arith.addf %574, %590 : vector<1x8xf32>
    %592 = vector.extract_strided_slice %550 {offsets = [0, 16], sizes = [1, 8], strides = [1, 1]} : vector<1x32xf32> to vector<1x8xf32>
    %593 = vector.extract_strided_slice %554 {offsets = [0, 16], sizes = [4, 8], strides = [1, 1]} : vector<4x32xf32> to vector<4x8xf32>
    %594 = vector.extract_strided_slice %555 {offsets = [0, 16], sizes = [4, 8], strides = [1, 1]} : vector<4x32xf32> to vector<4x8xf32>
    %cst_219 = arith.constant dense<0.000000e+00> : vector<1x4xf32>
    %595 = tpu.matmul %592, %593, %cst_219 {dimension_numbers = #tpu.dot_dimension_numbers<[1], [1], [0], [0], [0, 0, 1, 0], [], []>} : vector<1x8xf32>, vector<4x8xf32>, vector<1x4xf32> -> vector<1x4xf32>
    %cst_220 = arith.constant 0.176776692 : f32
    %596 = vector.broadcast %cst_220 : f32 to vector<1x4xf32>
    %597 = arith.mulf %595, %596 : vector<1x4xf32>
    %cst_221 = arith.constant dense<0xFF800000> : vector<1xf32>
    %598 = vector.multi_reduction <maximumf>, %597, %cst_221 [1] : vector<1x4xf32> to vector<1xf32>
    %599 = vector.shape_cast %598 : vector<1xf32> to vector<1x1xf32>
    %600 = vector.broadcast %599 : vector<1x1xf32> to vector<1x4xf32>
    %601 = arith.subf %597, %600 : vector<1x4xf32>
    %602 = math.exp %601 : vector<1x4xf32>
    %cst_222 = arith.constant dense<0.000000e+00> : vector<1xf32>
    %603 = vector.multi_reduction <add>, %602, %cst_222 [1] : vector<1x4xf32> to vector<1xf32>
    %604 = vector.shape_cast %603 : vector<1xf32> to vector<1x1xf32>
    %605 = tpu.reciprocal %604 {approx = true} : vector<1x1xf32> -> vector<1x1xf32>
    %606 = vector.broadcast %605 : vector<1x1xf32> to vector<1x4xf32>
    %607 = arith.mulf %602, %606 : vector<1x4xf32>
    %cst_223 = arith.constant dense<0.000000e+00> : vector<1x8xf32>
    %608 = tpu.matmul %607, %594, %cst_223 {dimension_numbers = #tpu.dot_dimension_numbers<[1], [0], [0], [1], [0, 0, 1, 1], [], []>} : vector<1x4xf32>, vector<4x8xf32>, vector<1x8xf32> -> vector<1x8xf32>
    %609 = arith.addf %592, %608 : vector<1x8xf32>
    %610 = vector.extract_strided_slice %550 {offsets = [0, 24], sizes = [1, 8], strides = [1, 1]} : vector<1x32xf32> to vector<1x8xf32>
    %611 = vector.extract_strided_slice %554 {offsets = [0, 24], sizes = [4, 8], strides = [1, 1]} : vector<4x32xf32> to vector<4x8xf32>
    %612 = vector.extract_strided_slice %555 {offsets = [0, 24], sizes = [4, 8], strides = [1, 1]} : vector<4x32xf32> to vector<4x8xf32>
    %cst_224 = arith.constant dense<0.000000e+00> : vector<1x4xf32>
    %613 = tpu.matmul %610, %611, %cst_224 {dimension_numbers = #tpu.dot_dimension_numbers<[1], [1], [0], [0], [0, 0, 1, 0], [], []>} : vector<1x8xf32>, vector<4x8xf32>, vector<1x4xf32> -> vector<1x4xf32>
    %cst_225 = arith.constant 0.176776692 : f32
    %614 = vector.broadcast %cst_225 : f32 to vector<1x4xf32>
    %615 = arith.mulf %613, %614 : vector<1x4xf32>
    %cst_226 = arith.constant dense<0xFF800000> : vector<1xf32>
    %616 = vector.multi_reduction <maximumf>, %615, %cst_226 [1] : vector<1x4xf32> to vector<1xf32>
    %617 = vector.shape_cast %616 : vector<1xf32> to vector<1x1xf32>
    %618 = vector.broadcast %617 : vector<1x1xf32> to vector<1x4xf32>
    %619 = arith.subf %615, %618 : vector<1x4xf32>
    %620 = math.exp %619 : vector<1x4xf32>
    %cst_227 = arith.constant dense<0.000000e+00> : vector<1xf32>
    %621 = vector.multi_reduction <add>, %620, %cst_227 [1] : vector<1x4xf32> to vector<1xf32>
    %622 = vector.shape_cast %621 : vector<1xf32> to vector<1x1xf32>
    %623 = tpu.reciprocal %622 {approx = true} : vector<1x1xf32> -> vector<1x1xf32>
    %624 = vector.broadcast %623 : vector<1x1xf32> to vector<1x4xf32>
    %625 = arith.mulf %620, %624 : vector<1x4xf32>
    %cst_228 = arith.constant dense<0.000000e+00> : vector<1x8xf32>
    %626 = tpu.matmul %625, %612, %cst_228 {dimension_numbers = #tpu.dot_dimension_numbers<[1], [0], [0], [1], [0, 0, 1, 1], [], []>} : vector<1x4xf32>, vector<4x8xf32>, vector<1x8xf32> -> vector<1x8xf32>
    %627 = arith.addf %610, %626 : vector<1x8xf32>
    %628 = tpu.concatenate %573, %591, %609, %627 in 1 : vector<1x8xf32>, vector<1x8xf32>, vector<1x8xf32>, vector<1x8xf32> -> vector<1x32xf32>
    %cst_229 = arith.constant dense<0.000000e+00> : vector<1x32xf32>
    %629 = tpu.matmul %628, %35, %cst_229 {dimension_numbers = #tpu.dot_dimension_numbers<[1], [0], [0], [1], [0, 0, 1, 1], [], []>} : vector<1x32xf32>, vector<32x32xf32>, vector<1x32xf32> -> vector<1x32xf32>
    %630 = arith.addf %629, %36 : vector<1x32xf32>
    %cst_230 = arith.constant 0.000000e+00 : f32
    %631 = vector.broadcast %cst_230 : f32 to vector<1x32xf32>
    %632 = arith.maximumf %630, %631 : vector<1x32xf32>
    %633 = arith.addf %628, %632 : vector<1x32xf32>
    %cst_231 = arith.constant dense<0.000000e+00> : vector<1x32xf32>
    %634 = tpu.matmul %633, %37, %cst_231 {dimension_numbers = #tpu.dot_dimension_numbers<[1], [0], [0], [1], [0, 0, 1, 1], [], []>} : vector<1x32xf32>, vector<32x32xf32>, vector<1x32xf32> -> vector<1x32xf32>
    %635 = arith.addf %634, %38 : vector<1x32xf32>
    %cst_232 = arith.constant dense<0.000000e+00> : vector<1x32xf32>
    %636 = tpu.matmul %635, %39, %cst_232 {dimension_numbers = #tpu.dot_dimension_numbers<[1], [0], [0], [1], [0, 0, 1, 1], [], []>} : vector<1x32xf32>, vector<32x32xf32>, vector<1x32xf32> -> vector<1x32xf32>
    %637 = arith.addf %636, %40 : vector<1x32xf32>
    %cst_233 = arith.constant 0.000000e+00 : f32
    %638 = vector.broadcast %cst_233 : f32 to vector<1x32xf32>
    %639 = arith.maximumf %637, %638 : vector<1x32xf32>
    %cst_234 = arith.constant dense<0.000000e+00> : vector<1x16xf32>
    %640 = tpu.matmul %639, %41, %cst_234 {dimension_numbers = #tpu.dot_dimension_numbers<[1], [0], [0], [1], [0, 0, 1, 1], [], []>} : vector<1x32xf32>, vector<32x16xf32>, vector<1x16xf32> -> vector<1x16xf32>
    %641 = arith.addf %640, %42 : vector<1x16xf32>
    %cst_235 = arith.constant 0.000000e+00 : f32
    %642 = vector.broadcast %cst_235 : f32 to vector<1x16xf32>
    %643 = arith.maximumf %641, %642 : vector<1x16xf32>
    %cst_236 = arith.constant dense<0.000000e+00> : vector<1x5xf32>
    %644 = tpu.matmul %643, %43, %cst_236 {dimension_numbers = #tpu.dot_dimension_numbers<[1], [0], [0], [1], [0, 0, 1, 1], [], []>} : vector<1x16xf32>, vector<16x5xf32>, vector<1x5xf32> -> vector<1x5xf32>
    %645 = arith.addf %644, %44 : vector<1x5xf32>
    %cst_237 = arith.constant dense<0xFF800000> : vector<1xf32>
    %646 = vector.multi_reduction <maximumf>, %645, %cst_237 [1] : vector<1x5xf32> to vector<1xf32>
    %647 = vector.shape_cast %646 : vector<1xf32> to vector<1x1xf32>
    %648 = vector.broadcast %647 : vector<1x1xf32> to vector<1x5xf32>
    %649 = arith.subf %645, %648 : vector<1x5xf32>
    %650 = math.exp %649 : vector<1x5xf32>
    %cst_238 = arith.constant dense<0.000000e+00> : vector<1xf32>
    %651 = vector.multi_reduction <add>, %650, %cst_238 [1] : vector<1x5xf32> to vector<1xf32>
    %652 = vector.shape_cast %651 : vector<1xf32> to vector<1x1xf32>
    %653 = math.log %652 : vector<1x1xf32>
    %654 = vector.broadcast %653 : vector<1x1xf32> to vector<1x5xf32>
    %655 = arith.subf %649, %654 : vector<1x5xf32>
    %656 = tpu.concatenate %351, %655 in 0 : vector<1x5xf32>, vector<1x5xf32> -> vector<2x5xf32>
    %c0_239 = arith.constant 0 : index
    %c0_240 = arith.constant 0 : index
    %657 = vector.load %arg34[%c0_239, %c0_240] : memref<2x5xf32, #tpu.memory_space<vmem>>, vector<2x5xf32>
    tpu.vector_store %arg34[%c0_239, %c0_240], %656 {strides = array<i32>} : memref<2x5xf32, #tpu.memory_space<vmem>>, vector<2x5xf32>,
    return
  }
}

</mosaic_0001>

<bundles_post_ra>
// kernel: tpu_custom_call.1
= control target key start
LH: loop header
LB: loop body
LE: loop exit
PB: predicated region body
PF: predicated region fallthrough
CT: control target
= control target key end

     0   :  { %s8676_s6 = smov 1   ;;  %s8677_s10 = smov 2   ;;  %s9812_s0 = inlined_call_operand.smem [shape: u32[35], index: -1, kind: input, shape index: {}] }
   0x1   :  { %s8764_s5 = sld [smem:[%s9812_s0]]   ;;  %s8678_s14 = smov 3  }
   0x2   :  { %s8769_s9 = sld [smem:[%s9812_s0 + %s8676_s6]]   ;;  %s8679_s18 = smov 4  }
   0x3   :  { %s8774_s13 = sld [smem:[%s9812_s0 + %s8677_s10]]   ;;  %s8680_s22 = smov 5  }
   0x4   :  { %s8779_s17 = sld [smem:[%s9812_s0 + %s8678_s14]]   ;;  %s8681_s26 = smov 6  }
   0x5   :  { %s8784_s21 = sld [smem:[%s9812_s0 + %s8679_s18]]   ;;  %s8682_s30 = smov 7  }
   0x6   :  { %s8789_s25 = sld [smem:[%s9812_s0 + %s8680_s22]]   ;;  %s8683_s4 = smov 8  }
   0x7   :  { %s8794_s29 = sld [smem:[%s9812_s0 + %s8681_s26]]   ;;  %s8684_s10 = smov 9  }
   0x8   :  { %s8799_s3 = sld [smem:[%s9812_s0 + %s8682_s30]]   ;;  %s8685_s15 = smov 10  }
   0x9   :  { %9819 = sst [smem:[#allocation61_spill]] %s8774_s13  ;;  %s8686_s20 = smov 11  }
   0xa   :  { %s8804_s8 = sld [smem:[%s9812_s0 + %s8683_s4]]   ;;  %s8687_s26 = smov 12  }
   0xb   :  { %s8809_s14 = sld [smem:[%s9812_s0 + %s8684_s10]]   ;;  %s8688_s1 = smov 13  }
   0xc   :  { %9820 = sst [smem:[#allocation62_spill]] %s8789_s25  ;;  %s8689_s7 = smov 14  }
   0xd   :  { %9821 = sst [smem:[#allocation63_spill]] %s8794_s29  ;;  %s8691_s22 = smov 16  }
   0xe   :  { %s8814_s19 = sld [smem:[%s9812_s0 + %s8685_s15]]   ;;  %s8690_s15 = smov 15  }
   0xf   :  { %s8819_s24 = sld [smem:[%s9812_s0 + %s8686_s20]]   ;;  %s8692_s28 = smov 17  }
  0x10   :  { %9822 = sst [smem:[#allocation64_spill]] %s8804_s8 }
  0x11   :  { %9823 = sst [smem:[#allocation65_spill]] %s8809_s14 }
  0x12   :  { %s8824_s30 = sld [smem:[%s9812_s0 + %s8687_s26]]  }
  0x13   :  { %s8829_s6 = sld [smem:[%s9812_s0 + %s8688_s1]]  }
  0x14   :  { %s8834_s12 = sld [smem:[%s9812_s0 + %s8689_s7]]   ;;  %s8693_s7 = smov 18  }
  0x15   :  { %9824 = sst [smem:[#allocation66_spill]] %s8819_s24 }
  0x16   :  { %s8839_s20 = sld [smem:[%s9812_s0 + %s8690_s15]]   ;;  %s8694_s15 = smov 19  }
  0x17   :  { %s8844_s27 = sld [smem:[%s9812_s0 + %s8691_s22]]   ;;  %s8695_s22 = smov 20  }
  0x18   :  { %s8849_s4 = sld [smem:[%s9812_s0 + %s8692_s28]]   ;;  %s8696_s28 = smov 21  }
  0x19   :  { %9825 = sst [smem:[#allocation67_spill]] %s8829_s6 }
  0x1a   :  { %s8854_s14 = sld [smem:[%s9812_s0 + %s8693_s7]]   ;;  %s8697_s7 = smov 22  }
  0x1b   :  { %s8859_s29 = sld [smem:[%s9812_s0 + %s8694_s15]]   ;;  %s8698_s15 = smov 23  }
  0x1c   :  { %9826 = sst [smem:[#allocation68_spill]] %s8839_s20 }
  0x1d   :  { %s8864_s13 = sld [smem:[%s9812_s0 + %s8695_s22]]   ;;  %s8699_s22 = smov 24  }
  0x1e   :  { %9827 = sst [smem:[#allocation69_spill]] %s8849_s4 }
  0x1f   :  { %s8869_s4 = sld [smem:[%s9812_s0 + %s8696_s28]]   ;;  %s8700_s28 = smov 25  }
  0x20   :  { %s8874_s20 = sld [smem:[%s9812_s0 + %s8697_s7]]   ;;  %s8701_s7 = smov 26  }
  0x21   :  { %9828 = sst [smem:[#allocation70_spill]] %s8859_s29 }
  0x22   :  { %s8879_s29 = sld [smem:[%s9812_s0 + %s8698_s15]]   ;;  %s8702_s15 = smov 27  }
  0x23   :  { %9829 = sst [smem:[#allocation71_spill]] %s8864_s13 }
  0x24   :  { %s8884_s13 = sld [smem:[%s9812_s0 + %s8699_s22]]   ;;  %s8703_s22 = smov 28  }
  0x25   :  { %s8889_s6 = sld [smem:[%s9812_s0 + %s8700_s28]]   ;;  %s8704_s28 = smov 29  }
  0x26   :  { %9830 = sst [smem:[#allocation72_spill]] %s8874_s20 }
  0x27   :  { %s8894_s20 = sld [smem:[%s9812_s0 + %s8701_s7]]   ;;  %s8705_s7 = smov 30  }
  0x28   :  { %s8899_s24 = sld [smem:[%s9812_s0 + %s8702_s15]]   ;;  %s8706_s15 = smov 31  }
  0x29   :  { %s8909_s8 = sld [smem:[%s9812_s0 + %s8704_s28]]   ;;  %s8708_s28 = smov 33  }
  0x2a   :  { %9831 = sst [smem:[#allocation73_spill]] %s8884_s13 }
  0x2b   :  { %s8904_s13 = sld [smem:[%s9812_s0 + %s8703_s22]]   ;;  %s8707_s22 = smov 32  }
  0x2c   :  { %s8919_s25 = sld [smem:[%s9812_s0 + %s8706_s15]]  }
  0x2d   :  { %9832 = sst [smem:[#allocation74_spill]] %s8894_s20 }
  0x2e   :  { %s8914_s20 = sld [smem:[%s9812_s0 + %s8705_s7]]   ;;  %s8709_s7 = smov 34  }
  0x2f   :  { %9834 = sst [smem:[#allocation76_spill]] %s8909_s8 }
  0x30   :  { %s8929_s8 = sld [smem:[%s9812_s0 + %s8708_s28]]  }
  0x31   :  { %9833 = sst [smem:[#allocation75_spill]] %s8904_s13 }
  0x32   :  { %s8924_s13 = sld [smem:[%s9812_s0 + %s8707_s22]]  }
  0x34   :  { %9835 = sst [smem:[#allocation77_spill]] %s8914_s20 }
  0x35   :  { %s8934_s20 = sld [smem:[%s9812_s0 + %s8709_s7]]  }
  0x36   :  { %74 = vsyncpa [#allocation5], 0 }
  0x37   :  { %75 = vsyncpa [#allocation7], 0 }
  0x38   :  { %76 = vsyncpa [#allocation3], 0 }
  0x39   :  { %77 = vsyncpa [#allocation10], 0 }
  0x3a   :  { %78 = vsyncpa [#allocation13], 0 }
  0x3b   :  { %79 = vsyncpa [#allocation16], 0 }
  0x3c   :  { %80 = vsyncpa [#allocation19], 0 }
  0x3d   :  { %81 = vsyncpa [#allocation22], 0 }
  0x3e   :  { %82 = vsyncpa [#allocation25], 0 }
  0x3f   :  { %83 = vsyncpa [#allocation28], 0 }
  0x40   :  { %84 = vsyncpa [#allocation31], 0 }
  0x41   :  { %85 = vsyncpa [#allocation34], 0 }
  0x42   :  { %86 = vsyncpa [#allocation37], 0 }
  0x43   :  { %87 = vsyncpa [#allocation40], 0 }
  0x44   :  { %88 = vsyncpa [#allocation43], 0 }
  0x45   :  { %89 = vsyncpa [#allocation4], 0  ;;  %s8710_s15 = smov [#allocation9]   ;;  %s8711_s0 = smov [#allocation12]  }
  0x46   :  { %s126_s16 = sshll.u32 %s8710_s15, 4  ;;  %s148_s18 = sshll.u32 %s8711_s0, 4  ;;  %s127_s16 = int_to_ptr.vmem [resolvable:$true] %s126_s16  ;;  %s149_s18 = int_to_ptr.vmem [resolvable:$true] %s148_s18 }
  0x47   :  { %s8136_s22 = scalar_lea.vmem %s127_s16, 64  ;;  %p8141_p1 = scmp.lt.s32.totalorder %s127_s16, %s127_s16 }
  0x48   :  { %p8137_p0 = scmp.ne.s32.totalorder %s127_s16, %s8136_s22  ;;  %p8142_p2 = scmp.lt.s32.totalorder %s8136_s22, %s8136_s22 }
  0x4a   :  { %p8143_p3 = por %p8142_p2, %p8141_p1 }
  0x4c   :  { %p8144_p4 = pnand %p8143_p3, %p8137_p0 }
  0x4e   :  { %8147 = shalt.err (!%p8144_p4)
}
  0x4f   :  { %129 = dma.hbm_to_vmem [thread:$0]  %s8784_s21, 64, %s127_s16, [#allocation10]  }
  0x50   :  { %s8156_s23 = scalar_lea.vmem %s149_s18, 16  ;;  %s8160_s26 = scalar_lea.vmem %s149_s18, 32 }
  0x51   :  { %p8157_p5 = scmp.ne.s32.totalorder %s149_s18, %s8156_s23  ;;  %p8161_p6 = scmp.lt.s32.totalorder %s149_s18, %s149_s18 }
  0x52   :  { %p8162_p7 = scmp.lt.s32.totalorder %s8160_s26, %s8156_s23 }
  0x54   :  { %p8163_p8 = por %p8162_p7, %p8161_p6 }
  0x56   :  { %p8164_p9 = pnand %p8163_p8, %p8157_p5 }
  0x58   :  { %8167 = shalt.err (!%p8164_p9)
}
  0x59   :  { %151 = dma.hbm_to_vmem [thread:$0]  %s8799_s3, 16, %s149_s18, [#allocation13]  }
  0x5a   :  { %s8712_s28 = smov [#allocation15]   ;;  %s8713_s2 = smov [#allocation18]  }
  0x5b   :  { %s170_s1 = sshll.u32 %s8712_s28, 4  ;;  %s192_s7 = sshll.u32 %s8713_s2, 4  ;;  %s171_s1 = int_to_ptr.vmem [resolvable:$true] %s170_s1  ;;  %s193_s7 = int_to_ptr.vmem [resolvable:$true] %s192_s7 }
  0x5c   :  { %s8176_s10 = scalar_lea.vmem %s171_s1, 16  ;;  %s8180_s11 = scalar_lea.vmem %s171_s1, 32 }
  0x5d   :  { %p8177_p10 = scmp.ne.s32.totalorder %s171_s1, %s8176_s10  ;;  %p8181_p11 = scmp.lt.s32.totalorder %s171_s1, %s171_s1 }
  0x5e   :  { %p8182_p12 = scmp.lt.s32.totalorder %s8180_s11, %s8176_s10 }
  0x60   :  { %p8183_p13 = por %p8182_p12, %p8181_p11 }
  0x62   :  { %p8184_p0 = pnand %p8183_p13, %p8177_p10 }
  0x64   :  { %8187 = shalt.err (!%p8184_p0)
}
  0x65   :  { %173 = dma.hbm_to_vmem [thread:$0]  %s8814_s19, 16, %s171_s1, [#allocation16]  }
  0x66   :  { %s8196_s21 = scalar_lea.vmem %s193_s7, 16  ;;  %s8200_s15 = scalar_lea.vmem %s193_s7, 32 }
  0x67   :  { %p8197_p1 = scmp.ne.s32.totalorder %s193_s7, %s8196_s21  ;;  %p8201_p2 = scmp.lt.s32.totalorder %s193_s7, %s193_s7 }
  0x68   :  { %p8202_p3 = scmp.lt.s32.totalorder %s8200_s15, %s8196_s21 }
  0x6a   :  { %p8203_p4 = por %p8202_p3, %p8201_p2 }
  0x6c   :  { %p8204_p5 = pnand %p8203_p4, %p8197_p1 }
  0x6e   :  { %8207 = shalt.err (!%p8204_p5)
}
  0x6f   :  { %195 = dma.hbm_to_vmem [thread:$0]  %s8824_s30, 16, %s193_s7, [#allocation19]  }
  0x70   :  { %s8714_s3 = smov [#allocation21]   ;;  %s8715_s0 = smov [#allocation24]  }
  0x71   :  { %s214_s16 = sshll.u32 %s8714_s3, 4  ;;  %s236_s18 = sshll.u32 %s8715_s0, 4  ;;  %s215_s16 = int_to_ptr.vmem [resolvable:$true] %s214_s16  ;;  %s237_s18 = int_to_ptr.vmem [resolvable:$true] %s236_s18 }
  0x72   :  { %s8216_s22 = scalar_lea.vmem %s215_s16, 16  ;;  %s8220_s23 = scalar_lea.vmem %s215_s16, 32 }
  0x73   :  { %p8217_p6 = scmp.ne.s32.totalorder %s215_s16, %s8216_s22  ;;  %p8221_p7 = scmp.lt.s32.totalorder %s215_s16, %s215_s16 }
  0x74   :  { %p8222_p8 = scmp.lt.s32.totalorder %s8220_s23, %s8216_s22 }
  0x76   :  { %p8223_p9 = por %p8222_p8, %p8221_p7 }
  0x78   :  { %p8224_p10 = pnand %p8223_p9, %p8217_p6 }
  0x7a   :  { %8227 = shalt.err (!%p8224_p10)
}
  0x7b   :  { %217 = dma.hbm_to_vmem [thread:$0]  %s8834_s12, 16, %s215_s16, [#allocation22]  }
  0x7c   :  { %s8236_s19 = scalar_lea.vmem %s237_s18, 16  ;;  %s8240_s26 = scalar_lea.vmem %s237_s18, 32 }
  0x7d   :  { %p8237_p11 = scmp.ne.s32.totalorder %s237_s18, %s8236_s19  ;;  %p8241_p12 = scmp.lt.s32.totalorder %s237_s18, %s237_s18 }
  0x7e   :  { %p8242_p13 = scmp.lt.s32.totalorder %s8240_s26, %s8236_s19 }
  0x80   :  { %p8243_p0 = por %p8242_p13, %p8241_p12 }
  0x82   :  { %p8244_p1 = pnand %p8243_p0, %p8237_p11 }
  0x84   :  { %8247 = shalt.err (!%p8244_p1)
}
  0x85   :  { %239 = dma.hbm_to_vmem [thread:$0]  %s8844_s27, 16, %s237_s18, [#allocation25]  }
  0x86   :  { %s8716_s30 = smov [#allocation27]   ;;  %s8717_s1 = smov [#allocation30]  }
  0x87   :  { %s258_s28 = sshll.u32 %s8716_s30, 4  ;;  %s280_s2 = sshll.u32 %s8717_s1, 4  ;;  %s259_s28 = int_to_ptr.vmem [resolvable:$true] %s258_s28  ;;  %s281_s2 = int_to_ptr.vmem [resolvable:$true] %s280_s2 }
  0x88   :  { %s8256_s7 = scalar_lea.vmem %s259_s28, 16  ;;  %s8260_s10 = scalar_lea.vmem %s259_s28, 32 }
  0x89   :  { %p8257_p2 = scmp.ne.s32.totalorder %s259_s28, %s8256_s7  ;;  %p8261_p3 = scmp.lt.s32.totalorder %s259_s28, %s259_s28 }
  0x8a   :  { %p8262_p4 = scmp.lt.s32.totalorder %s8260_s10, %s8256_s7 }
  0x8c   :  { %p8263_p5 = por %p8262_p4, %p8261_p3 }
  0x8e   :  { %p8264_p6 = pnand %p8263_p5, %p8257_p2 }
  0x90   :  { %8267 = shalt.err (!%p8264_p6)
}
  0x91   :  { %261 = dma.hbm_to_vmem [thread:$0]  %s8854_s14, 16, %s259_s28, [#allocation28]  }
  0x92   :  { %s8276_s12 = scalar_lea.vmem %s281_s2, 16  ;;  %s8280_s11 = scalar_lea.vmem %s281_s2, 32 }
  0x93   :  { %p8277_p7 = scmp.ne.s32.totalorder %s281_s2, %s8276_s12  ;;  %p8281_p8 = scmp.lt.s32.totalorder %s281_s2, %s281_s2 }
  0x94   :  { %p8282_p9 = scmp.lt.s32.totalorder %s8280_s11, %s8276_s12 }
  0x96   :  { %p8283_p10 = por %p8282_p9, %p8281_p8 }
  0x98   :  { %p8284_p11 = pnand %p8283_p10, %p8277_p7 }
  0x9a   :  { %8287 = shalt.err (!%p8284_p11)
}
  0x9b   :  { %283 = dma.hbm_to_vmem [thread:$0]  %s8869_s4, 16, %s281_s2, [#allocation31]  }
  0x9c   :  { %s8718_s27 = smov [#allocation33]   ;;  %s8719_s15 = smov [#allocation36]  }
  0x9d   :  { %s302_s21 = sshll.u32 %s8718_s27, 4  ;;  %s324_s3 = sshll.u32 %s8719_s15, 4  ;;  %s303_s21 = int_to_ptr.vmem [resolvable:$true] %s302_s21  ;;  %s325_s3 = int_to_ptr.vmem [resolvable:$true] %s324_s3 }
  0x9e   :  { %s8296_s16 = scalar_lea.vmem %s303_s21, 16  ;;  %s8300_s0 = scalar_lea.vmem %s303_s21, 32 }
  0x9f   :  { %p8297_p12 = scmp.ne.s32.totalorder %s303_s21, %s8296_s16  ;;  %p8301_p13 = scmp.lt.s32.totalorder %s303_s21, %s303_s21 }
  0xa0   :  { %p8302_p0 = scmp.lt.s32.totalorder %s8300_s0, %s8296_s16 }
  0xa2   :  { %p8303_p1 = por %p8302_p0, %p8301_p13 }
  0xa4   :  { %p8304_p2 = pnand %p8303_p1, %p8297_p12 }
  0xa6   :  { %8307 = shalt.err (!%p8304_p2)
}
  0xa7   :  { %305 = dma.hbm_to_vmem [thread:$0]  %s8879_s29, 16, %s303_s21, [#allocation34]  }
  0xa8   :  { %s8316_s14 = scalar_lea.vmem %s325_s3, 16  ;;  %s8320_s18 = scalar_lea.vmem %s325_s3, 32 }
  0xa9   :  { %p8317_p3 = scmp.ne.s32.totalorder %s325_s3, %s8316_s14  ;;  %p8321_p4 = scmp.lt.s32.totalorder %s325_s3, %s325_s3 }
  0xaa   :  { %p8322_p5 = scmp.lt.s32.totalorder %s8320_s18, %s8316_s14 }
  0xac   :  { %p8323_p6 = por %p8322_p5, %p8321_p4 }
  0xae   :  { %p8324_p7 = pnand %p8323_p6, %p8317_p3 }
  0xb0   :  { %8327 = shalt.err (!%p8324_p7)
}
  0xb1   :  { %327 = dma.hbm_to_vmem [thread:$0]  %s8889_s6, 16, %s325_s3, [#allocation37]  }
  0xb2   :  { %s8720_s4 = smov [#allocation39]  }
  0xb3   :  { %s346_s22 = sshll.u32 %s8720_s4, 4  ;;  %s347_s22 = int_to_ptr.vmem [resolvable:$true] %s346_s22 }
  0xb4   :  { %s8336_s23 = scalar_lea.vmem %s347_s22, 16  ;;  %s8340_s19 = scalar_lea.vmem %s347_s22, 32 }
  0xb5   :  { %p8337_p8 = scmp.ne.s32.totalorder %s347_s22, %s8336_s23  ;;  %p8341_p9 = scmp.lt.s32.totalorder %s347_s22, %s347_s22 }
  0xb6   :  { %p8342_p10 = scmp.lt.s32.totalorder %s8340_s19, %s8336_s23 }
  0xb8   :  { %p8343_p11 = por %p8342_p10, %p8341_p9 }
  0xba   :  { %p8344_p12 = pnand %p8343_p11, %p8337_p8 }
  0xbc   :  { %8347 = shalt.err (!%p8344_p12)
}
  0xbd   :  { %349 = dma.hbm_to_vmem [thread:$0]  %s8899_s24, 16, %s347_s22, [#allocation40]  }
  0xbe   :  { %s8721_s29 = smov [#allocation2]   ;;  %s8722_s26 = smov [#allocation6]  }
  0xbf   :  { %97 = dma.hbm_to_smem %s8764_s5, 16, %s8721_s29, [#allocation5]  }
  0xc0   :  { %105 = dma.hbm_to_smem %s8769_s9, 16, %s8722_s26, [#allocation7]  }
  0xc1   :  { %s8723_s6 = smov [#allocation8]  }
  0xc2   :  { %s113_s30 = sshll.u32 %s8723_s6, 4  ;;  %s114_s30 = int_to_ptr.vmem [resolvable:$true] %s113_s30 }
  0xc3   :  { %s8372_s28 = scalar_lea.vmem %s114_s30, 256  ;;  %p8377_p0 = scmp.lt.s32.totalorder %s114_s30, %s114_s30 }
  0xc4   :  { %p8373_p13 = scmp.ne.s32.totalorder %s114_s30, %s8372_s28  ;;  %p8378_p1 = scmp.lt.s32.totalorder %s8372_s28, %s8372_s28 }
  0xc6   :  { %p8379_p2 = por %p8378_p1, %p8377_p0 }
  0xc8   :  { %p8380_p3 = pnand %p8379_p2, %p8373_p13 }
  0xca   :  { %8383 = shalt.err (!%p8380_p3)
}
  0xcb   :  { %s8724_s1 = smov 128   ;;  %s8725_s2 = smov 8  }
  0xcc   :  { %119 = dma.hbm_to_vmem [thread:$0]  %s8779_s17, 256, %s114_s30, [#allocation3], %s8724_s1, %s8724_s1, %s8725_s2  }
  0xcd   :  { %s8726_s5 = smov [#allocation11]   ;;  %s8727_s9 = smov [#allocation14]  }
  0xce   :  { %s136_s24 = sshll.u32 %s8726_s5, 4  ;;  %s158_s7 = sshll.u32 %s8727_s9, 4  ;;  %s137_s24 = int_to_ptr.vmem [resolvable:$true] %s136_s24  ;;  %s159_s7 = int_to_ptr.vmem [resolvable:$true] %s158_s7 }
  0xcf   :  { %s8392_s10 = scalar_lea.vmem %s137_s24, 16  ;;  %s8396_s12 = scalar_lea.vmem %s137_s24, 32 }
  0xd0   :  { %p8393_p4 = scmp.ne.s32.totalorder %s137_s24, %s8392_s10  ;;  %p8397_p5 = scmp.lt.s32.totalorder %s137_s24, %s137_s24 }
  0xd1   :  { %p8398_p6 = scmp.lt.s32.totalorder %s8396_s12, %s8392_s10 }
  0xd3   :  { %p8399_p7 = por %p8398_p6, %p8397_p5 }
  0xd5   :  { %p8400_p8 = pnand %p8399_p7, %p8393_p4 }
  0xd7   :  { %8403 = shalt.err (!%p8400_p8)
}
  0xd8   :  { %s9836_s11 = sld [smem:[#allocation62_spill]]  ;;  %s8412_s27 = scalar_lea.vmem %s159_s7, 64 }
  0xd9   :  { %p8413_p9 = scmp.ne.s32.totalorder %s159_s7, %s8412_s27  ;;  %p8417_p10 = scmp.lt.s32.totalorder %s159_s7, %s159_s7 }
  0xda   :  { %p8418_p11 = scmp.lt.s32.totalorder %s8412_s27, %s8412_s27 }
  0xdc   :  { %p8419_p12 = por %p8418_p11, %p8417_p10 }
  0xde   :  { %139 = dma.hbm_to_vmem [thread:$0]  %s9836_s11, 16, %s137_s24, [#allocation10]  }
  0xdf   :  { %p8420_p13 = pnand %p8419_p12, %p8413_p9 }
  0xe1   :  { %8423 = shalt.err (!%p8420_p13)
}
  0xe2   :  { %s9837_s17 = sld [smem:[#allocation64_spill]]  ;;  %s8728_s21 = smov [#allocation17]  }
  0xe3   :  { %s179_s15 = sshll.u32 %s8728_s21, 4  ;;  %s8729_s3 = smov [#allocation20]   ;;  %s180_s15 = int_to_ptr.vmem [resolvable:$true] %s179_s15 }
  0xe4   :  { %s201_s16 = sshll.u32 %s8729_s3, 4  ;;  %s8432_s0 = scalar_lea.vmem %s180_s15, 1024  ;;  %s202_s16 = int_to_ptr.vmem [resolvable:$true] %s201_s16 }
  0xe5   :  { %p8433_p0 = scmp.ne.s32.totalorder %s180_s15, %s8432_s0  ;;  %p8437_p1 = scmp.lt.s32.totalorder %s180_s15, %s180_s15 }
  0xe6   :  { %p8438_p2 = scmp.lt.s32.totalorder %s8432_s0, %s8432_s0 }
  0xe8   :  { %161 = dma.hbm_to_vmem [thread:$0]  %s9837_s17, 64, %s159_s7, [#allocation13]  }
  0xe9   :  { %p8439_p3 = por %p8438_p2, %p8437_p1 }
  0xeb   :  { %p8440_p4 = pnand %p8439_p3, %p8433_p0 }
  0xed   :  { %8443 = shalt.err (!%p8440_p4)
}
  0xee   :  { %s9838_s14 = sld [smem:[#allocation66_spill]]  ;;  %s8452_s18 = scalar_lea.vmem %s202_s16, 1024 }
  0xef   :  { %p8453_p5 = scmp.ne.s32.totalorder %s202_s16, %s8452_s18  ;;  %p8457_p6 = scmp.lt.s32.totalorder %s202_s16, %s202_s16 }
  0xf0   :  { %p8458_p7 = scmp.lt.s32.totalorder %s8452_s18, %s8452_s18 }
  0xf2   :  { %p8459_p8 = por %p8458_p7, %p8457_p6 }
  0xf4   :  { %185 = dma.hbm_to_vmem [thread:$0]  %s9838_s14, 1024, %s180_s15, [#allocation16], %s8724_s1, %s8724_s1, %s8725_s2  }
  0xf5   :  { %p8460_p9 = pnand %p8459_p8, %p8453_p5 }
  0xf7   :  { %8463 = shalt.err (!%p8460_p9)
}
  0xf8   :  { %s9839_s4 = sld [smem:[#allocation67_spill]]  ;;  %s8730_s22 = smov [#allocation23]  }
  0xf9   :  { %s223_s23 = sshll.u32 %s8730_s22, 4  ;;  %s8731_s19 = smov [#allocation26]   ;;  %s224_s23 = int_to_ptr.vmem [resolvable:$true] %s223_s23 }
  0xfa   :  { %s245_s29 = sshll.u32 %s8731_s19, 4  ;;  %s8472_s26 = scalar_lea.vmem %s224_s23, 1024  ;;  %s246_s29 = int_to_ptr.vmem [resolvable:$true] %s245_s29 }
  0xfb   :  { %p8473_p10 = scmp.ne.s32.totalorder %s224_s23, %s8472_s26  ;;  %p8477_p11 = scmp.lt.s32.totalorder %s224_s23, %s224_s23 }
  0xfc   :  { %p8478_p12 = scmp.lt.s32.totalorder %s8472_s26, %s8472_s26 }
  0xfe   :  { %207 = dma.hbm_to_vmem [thread:$0]  %s9839_s4, 1024, %s202_s16, [#allocation19], %s8724_s1, %s8724_s1, %s8725_s2  }
  0xff   :  { %p8479_p13 = por %p8478_p12, %p8477_p11 }
 0x101   :  { %p8480_p0 = pnand %p8479_p13, %p8473_p10 }
 0x103   :  { %8483 = shalt.err (!%p8480_p0)
}
 0x104   :  { %s9840_s6 = sld [smem:[#allocation68_spill]]  ;;  %s8492_s30 = scalar_lea.vmem %s246_s29, 512 }
 0x105   :  { %p8493_p1 = scmp.ne.s32.totalorder %s246_s29, %s8492_s30  ;;  %p8497_p2 = scmp.lt.s32.totalorder %s246_s29, %s246_s29 }
 0x106   :  { %p8498_p3 = scmp.lt.s32.totalorder %s8492_s30, %s8492_s30 }
 0x108   :  { %p8499_p4 = por %p8498_p3, %p8497_p2 }
 0x10a   :  { %229 = dma.hbm_to_vmem [thread:$0]  %s9840_s6, 1024, %s224_s23, [#allocation22], %s8724_s1, %s8724_s1, %s8725_s2  }
 0x10b   :  { %p8500_p5 = pnand %p8499_p4, %p8493_p1 }
 0x10d   :  { %8503 = shalt.err (!%p8500_p5)
}
 0x10e   :  { %s9841_s28 = sld [smem:[#allocation69_spill]]  ;;  %s8732_s5 = smov [#allocation29]  }
 0x10f   :  { %s268_s24 = sshll.u32 %s8732_s5, 4  ;;  %s8733_s9 = smov [#allocation32]   ;;  %s269_s24 = int_to_ptr.vmem [resolvable:$true] %s268_s24 }
 0x110   :  { %s289_s7 = sshll.u32 %s8733_s9, 4  ;;  %s8512_s10 = scalar_lea.vmem %s269_s24, 16  ;;  %s290_s7 = int_to_ptr.vmem [resolvable:$true] %s289_s7 }
 0x111   :  { %p8513_p6 = scmp.ne.s32.totalorder %s269_s24, %s8512_s10  ;;  %s8516_s12 = scalar_lea.vmem %s269_s24, 32 }
 0x112   :  { %p8517_p7 = scmp.lt.s32.totalorder %s269_s24, %s269_s24  ;;  %p8518_p8 = scmp.lt.s32.totalorder %s8516_s12, %s8512_s10 }
 0x114   :  { %251 = dma.hbm_to_vmem [thread:$0]  %s9841_s28, 512, %s246_s29, [#allocation25], %s8724_s1, %s8724_s1, %s8725_s2  }
 0x115   :  { %p8519_p9 = por %p8518_p8, %p8517_p7 }
 0x117   :  { %p8520_p10 = pnand %p8519_p9, %p8513_p6 }
 0x119   :  { %8523 = shalt.err (!%p8520_p10)
}
 0x11a   :  { %s9842_s11 = sld [smem:[#allocation70_spill]]  ;;  %s8532_s27 = scalar_lea.vmem %s290_s7, 512 }
 0x11b   :  { %p8533_p11 = scmp.ne.s32.totalorder %s290_s7, %s8532_s27  ;;  %p8537_p12 = scmp.lt.s32.totalorder %s290_s7, %s290_s7 }
 0x11c   :  { %p8538_p13 = scmp.lt.s32.totalorder %s8532_s27, %s8532_s27 }
 0x11e   :  { %p8539_p0 = por %p8538_p13, %p8537_p12 }
 0x120   :  { %271 = dma.hbm_to_vmem [thread:$0]  %s9842_s11, 16, %s269_s24, [#allocation28]  }
 0x121   :  { %p8540_p1 = pnand %p8539_p0, %p8533_p11 }
 0x123   :  { %8543 = shalt.err (!%p8540_p1)
}
 0x124   :  { %s9843_s17 = sld [smem:[#allocation72_spill]]  ;;  %s8734_s21 = smov [#allocation35]  }
 0x125   :  { %s311_s15 = sshll.u32 %s8734_s21, 4  ;;  %s8735_s3 = smov [#allocation38]   ;;  %s312_s15 = int_to_ptr.vmem [resolvable:$true] %s311_s15 }
 0x126   :  { %s333_s16 = sshll.u32 %s8735_s3, 4  ;;  %s8552_s0 = scalar_lea.vmem %s312_s15, 512  ;;  %s334_s16 = int_to_ptr.vmem [resolvable:$true] %s333_s16 }
 0x127   :  { %p8553_p2 = scmp.ne.s32.totalorder %s312_s15, %s8552_s0  ;;  %p8557_p3 = scmp.lt.s32.totalorder %s312_s15, %s312_s15 }
 0x128   :  { %p8558_p4 = scmp.lt.s32.totalorder %s8552_s0, %s8552_s0 }
 0x12a   :  { %295 = dma.hbm_to_vmem [thread:$0]  %s9843_s17, 512, %s290_s7, [#allocation31], %s8724_s1, %s8724_s1, %s8725_s2  }
 0x12b   :  { %p8559_p5 = por %p8558_p4, %p8557_p3 }
 0x12d   :  { %p8560_p6 = pnand %p8559_p5, %p8553_p2 }
 0x12f   :  { %8563 = shalt.err (!%p8560_p6)
}
 0x130   :  { %s9844_s14 = sld [smem:[#allocation73_spill]]  ;;  %s8572_s18 = scalar_lea.vmem %s334_s16, 512 }
 0x131   :  { %p8573_p7 = scmp.ne.s32.totalorder %s334_s16, %s8572_s18  ;;  %p8577_p8 = scmp.lt.s32.totalorder %s334_s16, %s334_s16 }
 0x132   :  { %p8578_p9 = scmp.lt.s32.totalorder %s8572_s18, %s8572_s18 }
 0x134   :  { %p8579_p10 = por %p8578_p9, %p8577_p8 }
 0x136   :  { %317 = dma.hbm_to_vmem [thread:$0]  %s9844_s14, 512, %s312_s15, [#allocation34], %s8724_s1, %s8724_s1, %s8725_s2  }
 0x137   :  { %p8580_p11 = pnand %p8579_p10, %p8573_p7 }
 0x139   :  { %8583 = shalt.err (!%p8580_p11)
}
 0x13a   :  { %s9845_s4 = sld [smem:[#allocation74_spill]]  ;;  %s8736_s22 = smov [#allocation41]  }
 0x13b   :  { %s355_s23 = sshll.u32 %s8736_s22, 4  ;;  %s8737_s19 = smov [#allocation42]   ;;  %s356_s23 = int_to_ptr.vmem [resolvable:$true] %s355_s23 }
 0x13c   :  { %s368_s29 = sshll.u32 %s8737_s19, 4  ;;  %s8592_s26 = scalar_lea.vmem %s356_s23, 512  ;;  %s369_s29 = int_to_ptr.vmem [resolvable:$true] %s368_s29 }
 0x13d   :  { %p8593_p12 = scmp.ne.s32.totalorder %s356_s23, %s8592_s26  ;;  %p8597_p13 = scmp.lt.s32.totalorder %s356_s23, %s356_s23 }
 0x13e   :  { %p8598_p0 = scmp.lt.s32.totalorder %s8592_s26, %s8592_s26 }
 0x140   :  { %339 = dma.hbm_to_vmem [thread:$0]  %s9845_s4, 512, %s334_s16, [#allocation37], %s8724_s1, %s8724_s1, %s8725_s2  }
 0x141   :  { %p8599_p1 = por %p8598_p0, %p8597_p13 }
 0x143   :  { %p8600_p2 = pnand %p8599_p1, %p8593_p12 }
 0x145   :  { %8603 = shalt.err (!%p8600_p2)
}
 0x146   :  { %s9846_s6 = sld [smem:[#allocation75_spill]]  ;;  %s8612_s30 = scalar_lea.vmem %s369_s29, 16 }
 0x147   :  { %p8613_p3 = scmp.ne.s32.totalorder %s369_s29, %s8612_s30  ;;  %s8616_s28 = scalar_lea.vmem %s369_s29, 32 }
 0x148   :  { %p8617_p4 = scmp.lt.s32.totalorder %s369_s29, %s369_s29  ;;  %p8618_p5 = scmp.lt.s32.totalorder %s8616_s28, %s8612_s30 }
 0x14a   :  { %p8619_p6 = por %p8618_p5, %p8617_p4 }
 0x14c   :  { %361 = dma.hbm_to_vmem [thread:$0]  %s9846_s6, 512, %s356_s23, [#allocation40], %s8724_s1, %s8724_s1, %s8725_s2  }
 0x14d   :  { %p8620_p7 = pnand %p8619_p6, %p8613_p3 }
 0x14f   :  { %8623 = shalt.err (!%p8620_p7)
}
 0x150   :  { %s9847_s5 = sld [smem:[#allocation76_spill]] }
 0x156   :  { %371 = dma.hbm_to_vmem [thread:$0]  %s9847_s5, 16, %s369_s29, [#allocation43]  }
 0x157   :  { %8644 = dma.done.wait [#allocation5], 16  }
 0x158   :  { %8645 = vsyncadd [#allocation5], 4294967280 }
 0x159   :  { %8646 = dma.done.wait [#allocation7], 16  }
 0x15a   :  { %8647 = vsyncadd [#allocation7], 4294967280 }
 0x15b   :  { %8648 = dma.done.wait [#allocation3], 256  }
 0x15c   :  { %8649 = vsyncadd [#allocation3], 4294967040 }
 0x15d   :  { %8650 = dma.done.wait [#allocation10], 80  }
 0x15e   :  { %8651 = vsyncadd [#allocation10], 4294967216 }
 0x15f   :  { %8652 = dma.done.wait [#allocation13], 80  }
 0x160   :  { %8653 = vsyncadd [#allocation13], 4294967216 }
 0x161   :  { %8654 = dma.done.wait [#allocation16], 1040  }
 0x162   :  { %8655 = vsyncadd [#allocation16], 4294966256 }
 0x163   :  { %8656 = dma.done.wait [#allocation19], 1040  }
 0x164   :  { %8657 = vsyncadd [#allocation19], 4294966256 }
 0x165   :  { %8658 = dma.done.wait [#allocation22], 1040  }
 0x166   :  { %8659 = vsyncadd [#allocation22], 4294966256 }
 0x167   :  { %8660 = dma.done.wait [#allocation25], 528  }
 0x168   :  { %8661 = vsyncadd [#allocation25], 4294966768 }
 0x169   :  { %8662 = dma.done.wait [#allocation28], 32  }
 0x16a   :  { %8663 = vsyncadd [#allocation28], 4294967264 }
 0x16b   :  { %8664 = dma.done.wait [#allocation31], 528  }
 0x16c   :  { %8665 = vsyncadd [#allocation31], 4294966768 }
 0x16d   :  { %8666 = dma.done.wait [#allocation34], 528  }
 0x16e   :  { %8667 = vsyncadd [#allocation34], 4294966768 }
 0x16f   :  { %8668 = dma.done.wait [#allocation37], 528  }
 0x170   :  { %8669 = vsyncadd [#allocation37], 4294966768 }
 0x171   :  { %8670 = dma.done.wait [#allocation40], 528  }
 0x172   :  { %8671 = vsyncadd [#allocation40], 4294966768 }
 0x173   :  { %8672 = dma.done.wait [#allocation43], 16  }
 0x174   :  { %8673 = vsyncadd [#allocation43], 4294967280 }
 0x175   :  { %458 = sfence }
 0x176   :  { %v463_v0 = vld [vmem:[#allocation9] sm:$0xf]  ;;  %s9848_s1 = sld [smem:[#allocation61_spill]]  ;;  %vm471_vm0 = vcmask 1043456   ;;  %vm464_vm1 = vcmask 31744   ;;  %v461_v3 = vld [vmem:[#allocation8] sm:$0xff]  ;;  %v897_v34 = vlaneseq }
 0x177   :  { %7313 = vmatprep.subr.msk.mxu0 %vm471_vm0, %v463_v0  ;;  %s9849_s24 = sld [smem:[#allocation63_spill]]  ;;  %vm557_vm2 = vcmask 130048   ;;  %v462_v6 = vld [vmem:[#allocation8 + $0x8] sm:$0xff]  ;;  %v6924_v11 = vld [vmem:[#allocation11] ss:$0 sm:$0xff]  ;;  %vm645_vm3 = vcmask 261120  }
 0x178   :  { %7314 = vmatpush3.msk.msra.mxu0 %vm471_vm0, %v463_v0  ;;  %7322 = vmatprep.mubr.msk.f32.mxu1 %vm557_vm2, %v461_v3  ;;  %s9850_s9 = sld [smem:[#allocation65_spill]]  ;;  %v8738_v20 = vmov 0.0   ;;  %vm8739_vm4 = vmmov 0   ;;  %v6929_v21 = vld [vmem:[#allocation12] ss:$0 sm:$0xff]  ;;  %s8740_s7 = smov 32  }
 0x179   :  { %s901_s10 = sld [smem:[#allocation2]]  ;;  %v9032_v35 = vshrl.u32 %v897_v34, 7  ;;  %v9034_v37 = vand.u32 127, %v897_v34  ;;  %v838_v45 = vld [vmem:[#allocation17 + $0x38] sm:$0xff]  ;;  %v837_v46 = vld [vmem:[#allocation17 + $0x30] sm:$0xff]  ;;  %v836_v47 = vld [vmem:[#allocation17 + $0x28] sm:$0xff] }
 0x17a   :  { %s9030_s12 = sld [smem:[#allocation6]]  ;;  %v835_v48 = vld [vmem:[#allocation17 + $0x20] sm:$0xff]  ;;  %v834_v49 = vld [vmem:[#allocation17 + $0x18] sm:$0xff]  ;;  %v833_v50 = vld [vmem:[#allocation17 + $0x10] sm:$0xff]  ;;  %vm991_vm8 = vcmask 523264   ;;  %s8741_s11 = smov 96  }
 0x17b   :  { %v832_v51 = vld [vmem:[#allocation17 + $0x8] sm:$0xff]  ;;  %v831_v53 = vld [vmem:[#allocation17] sm:$0xff]  ;;  %v821_v55 = vld [vmem:[#allocation14] sm:$0xf]  ;;  %s8742_s27 = smov 112   ;;  %s8743_s17 = smov 80  }
 0x17c   :  { %v459_v1 = vld [vmem:[%s9848_s1] sm:$0xff]  ;;  %v460_v2 = vld [vmem:[%s9848_s1 + $0x8] sm:$0xff]  ;;  %v6935_v60 = vld [vmem:[#allocation18] ss:$0 sm:$0xff]  ;;  %vm1222_vm10 = vcmask 44032   ;;  %s8745_s21 = smov 64  }
 0x17d   :  { %7315 = vmatprep.mubr.msk.f32.mxu0 %vm464_vm1, %v459_v1  ;;  %v644_v7 = vld [vmem:[%s9849_s24 + $0x18] sm:$0xff]  ;;  %v643_v8 = vld [vmem:[%s9849_s24 + $0x10] sm:$0xff]  ;;  %v642_v9 = vld [vmem:[%s9849_s24 + $0x8] sm:$0xff]  ;;  %vm1240_vm11 = vcmask 1045504   ;;  %s8746_s15 = smov 16   ;;  %s8747_s3 = smov 48  }
 0x17e   :  { %7316 = vmatmul.mubr.msk.f32.vlgmr.msra.gmra.mxu0 %vm464_vm1, %v460_v2  ;;  %7325 = vmatprep.subr.mxu0 %v644_v7  ;;  %v641_v10 = vld [vmem:[%s9849_s24] sm:$0xff]  ;;  %v829_v23 = vld [vmem:[%s9850_s9 + $0x38] sm:$0xff]  ;;  %v828_v26 = vld [vmem:[%s9850_s9 + $0x30] sm:$0xff]  ;;  %vm1236_vm12 = vcmask 48128   ;;  %vm1835_vm13 = vcmask 392192   ;;  %s8748_s16 = smov 88  }
 0x17f   :  { %7326 = vmatpush3.msra.mxu0 %v644_v7  ;;  %v827_v29 = vld [vmem:[%s9850_s9 + $0x28] sm:$0xff]  ;;  %v826_v30 = vld [vmem:[%s9850_s9 + $0x20] sm:$0xff]  ;;  %v825_v32 = vld [vmem:[%s9850_s9 + $0x18] sm:$0xff]  ;;  %v903_v36 = vstv %s901_s10  ;;  %s8749_s0 = smov 120   ;;  %s8750_s14 = smov 72   ;;  %vm2000_vm14 = vcmask 64512  }
 0x180   :  { %7327 = vmatprep.subr.mxu0 %v643_v8  ;;  %v824_v33 = vld [vmem:[%s9850_s9 + $0x10] sm:$0xff]  ;;  %v904_v38 = vadd.s32 %v903_v36, %v9032_v35  ;;  %v906_v39 = vstv %s9030_s12  ;;  %v823_v52 = vld [vmem:[%s9850_s9 + $0x8] sm:$0xff]  ;;  %v822_v54 = vld [vmem:[%s9850_s9] sm:$0xff]  ;;  %s8751_s18 = smov 104   ;;  %vm2076_vm15 = vcmask 27648   ;;  %s8752_s4 = smov 40  }
 0x181   :  { %7328 = vmatpush3.msra.mxu0 %v643_v8  ;;  %vm907_vm6 = vcmp.lt.s32.totalorder %v9032_v35, %v906_v39  ;;  %v6933_v62 = vld [vmem:[#allocation15] ss:$0 sm:$0xff]  ;;  %vm983_vm9 = vcmp.lt.s32.totalorder %v9034_v37, %v906_v39  ;;  %s8753_s22 = smov 56   ;;  %s9851_s23 = sld [smem:[#allocation71_spill]] }
 0x182   :  { %7329 = vmatprep.subr.mxu0 %v642_v9  ;;  %vm905_vm5 = vcmp.eq.s32.totalorder %v9034_v37, %v904_v38  ;;  %s8754_s19 = smov 24   ;;  %s9852_s29 = sld [smem:[#allocation77_spill]] }
 0x183   :  { %7330 = vmatpush3.msra.mxu0 %v642_v9  ;;  %vm908_vm7 = vmand %vm905_vm5, %vm907_vm6  ;;  %v8744_v9 = vmov -1e+09   ;;  %vm2684_vm5 = vcmask 195584   ;;  %vm9818_vm6 = vcmask 24576   ;;  %s6999_s26 = sld [smem:[#allocation2 + $0x1]] }
 0x184   :  { %7331 = vmatprep.subr.mxu0 %v641_v10  ;;  %v909_v43 = vsel %vm908_vm7, 1.0, %v8738_v20  ;;  %s9431_s6 = sld [smem:[#allocation6 + $0x1]] }
 0x185   :  { %7332 = vmatpush3.msra.mxu0 %v641_v10  ;;  %v984_v10 = vsel %vm983_vm9, 0.0, %v8744_v9 }
 0x186   :  { %7350 = vmatprep.subr.mxu0 %v8738_v20 }
 0x23e   :  { %v7317_v4 = vpop.f32.mrf.mxu0 }
 0x23f   :  { %7318 = vmatprep.subr.mxu1 %v7317_v4 }
 0x240   :  { %v541_v5 = vpop.f32.mrf.mxu0  ;;  %7319 = vmatpush3.msra.mxu1 %v7317_v4 }
 0x241   :  { %7320 = vmatprep.subr.mxu1 %v541_v5 }
 0x242   :  { %7321 = vmatpush3.msra.mxu1 %v541_v5 }
 0x243   :  { %7323 = vmatmul.mubr.msk.f32.vlgmr.msra.gmra.mxu1 %vm557_vm2, %v462_v6 }
 0x244   :  { %7340 = vmatprep.mubr.msk.f32.mxu1 %vm557_vm2, %v461_v3 }
 0x303   :  { %v7324_v12 = vpop.f32.mrf.mxu1 }
 0x304   :  { %v636_v13 = vadd.f32 %v7324_v12, %v6924_v11 }
 0x305   :  { %v630_v14 = vpop.f32.mrf.mxu1 }
 0x306   :  { %v9002_v15 = vadd.f32 %v6924_v11, %v630_v14  ;;  %v640_v17 = vmax.f32 %v636_v13, 0.0 }
 0x308   :  { %v639_v16 = vmax.f32 %v9002_v15, 0.0 }
 0x30a   :  { %7333 = vmatprep.mubr.msk.f32.mxu0 %vm645_vm3, %v639_v16 }
 0x30b   :  { %7334 = vmatmul.mubr.msk.f32.vlgmr.msra.gmra.mxu0 %vm645_vm3, %v640_v17 }
 0x30c   :  { %7366 = vmatprep.mubr.msk.f32.mxu0 %vm8739_vm4, %v8738_v20  ;;  %7351 = vmatpush3.msra.mxu0 %v829_v23 }
 0x30d   :  { %7352 = vmatprep.subr.mxu0 %v8738_v20 }
 0x30e   :  { %7353 = vmatpush3.msra.mxu0 %v828_v26 }
 0x30f   :  { %7354 = vmatprep.subr.mxu0 %v8738_v20 }
 0x310   :  { %7355 = vmatpush3.msra.mxu0 %v827_v29 }
 0x311   :  { %7356 = vmatprep.subr.mxu0 %v8738_v20 }
 0x312   :  { %7357 = vmatpush3.msra.mxu0 %v826_v30 }
 0x313   :  { %7358 = vmatprep.subr.mxu0 %v8738_v20 }
 0x314   :  { %7359 = vmatpush3.msra.mxu0 %v825_v32 }
 0x315   :  { %7360 = vmatprep.subr.mxu0 %v8738_v20 }
 0x316   :  { %7361 = vmatpush3.msra.mxu0 %v824_v33 }
 0x317   :  { %7362 = vmatprep.subr.mxu0 %v8738_v20 }
 0x318   :  { %7363 = vmatpush3.msra.mxu0 %v823_v52 }
 0x319   :  { %7364 = vmatprep.subr.mxu0 %v8738_v20 }
 0x31a   :  { %7365 = vmatpush3.msra.mxu0 %v822_v54 }
 0x31b   :  { %7367 = vmatmul.mubr.msk.f32.vlgmr.msra.gmra.mxu0 %vm991_vm8, %v821_v55  ;;  %7388 = vmatprep.subr.mxu0 %v8738_v20 }
 0x31c   :  { %7390 = vmatprep.mubr.msk.f32.mxu0 %vm8739_vm4, %v8738_v20 }
 0x3cb   :  { %v7335_v18 = vpop.f32.mrf.mxu0 }
 0x3cc   :  { %7336 = vmatprep.subr.mxu1 %v7335_v18 }
 0x3cd   :  { %v718_v19 = vpop.f32.mrf.mxu0  ;;  %7337 = vmatpush3.msra.mxu1 %v7335_v18 }
 0x3ce   :  { %7338 = vmatprep.subr.mxu1 %v718_v19 }
 0x3cf   :  { %7339 = vmatpush3.msra.mxu1 %v718_v19 }
 0x3d0   :  { %7341 = vmatmul.mubr.msk.f32.vlgmr.msra.gmra.mxu1 %vm557_vm2, %v462_v6  ;;  %7343 = vmatprep.subr.mxu1 %v8738_v20 }
 0x3d1   :  { %7347 = vmatprep.mubr.msk.f32.mxu1 %vm8739_vm4, %v8738_v20 }
 0x3db   :  { %v1061_v58 = vpop.f32.mrf.mxu0 }
 0x3dc   :  { %v9078_v1 = vadd.f32 %v6933_v62, %v1061_v58 }
 0x3dd   :  { %v7368_v59 = vpop.f32.mrf.mxu0 }
 0x490   :  { %v7342_v22 = vpop.f32.mrf.mxu1 }
 0x491   :  { %v806_v24 = vadd.f32 %v7342_v22, %v6929_v21 }
 0x492   :  { %v800_v25 = vpop.f32.mrf.mxu1 }
 0x493   :  { %v810_v27 = vmax.f32 %v806_v24, 0.0  ;;  %v801_v28 = vadd.f32 %v6929_v21, %v800_v25 }
 0x495   :  { %815 = vrot.lane.b32.xlu0 %v810_v27, %s8740_s7  ;;  %v809_v31 = vmax.f32 %v801_v28, 0.0 }
 0x499   :  { %813 = vrot.lane.b32.xlu0 %v809_v31, %s8740_s7 }
 0x507   :  { %v816_v40 = vpop.permute.xlu0 %815 }
 0x508   :  { %v9043_v41 = vsel %vm645_vm3, %v640_v17, %v816_v40 }
 0x509   :  { %7344 = vmatpush3.msra.mxu1 %v9043_v41 }
 0x50a   :  { %7345 = vmatprep.subr.mxu1 %v8738_v20 }
 0x50b   :  { %v814_v42 = vpop.permute.xlu0 %813 }
 0x50c   :  { %v9051_v44 = vsel %vm645_vm3, %v639_v16, %v814_v42 }
 0x50d   :  { %7346 = vmatpush3.msra.mxu1 %v9051_v44 }
 0x50e   :  { %7348 = vmatmul.mubr.msk.f32.vlgmr.msra.gmra.mxu1 %vm557_vm2, %v909_v43  ;;  %7369 = vmatprep.subr.mxu1 %v8738_v20 }
 0x50f   :  { %7370 = vmatpush3.msra.mxu1 %v838_v45  ;;  %7385 = vmatprep.mubr.msk.f32.mxu1 %vm8739_vm4, %v8738_v20 }
 0x510   :  { %7371 = vmatprep.subr.mxu1 %v8738_v20 }
 0x511   :  { %7372 = vmatpush3.msra.mxu1 %v837_v46 }
 0x512   :  { %7373 = vmatprep.subr.mxu1 %v8738_v20 }
 0x513   :  { %7374 = vmatpush3.msra.mxu1 %v836_v47 }
 0x514   :  { %7375 = vmatprep.subr.mxu1 %v8738_v20 }
 0x515   :  { %7376 = vmatpush3.msra.mxu1 %v835_v48 }
 0x516   :  { %7377 = vmatprep.subr.mxu1 %v8738_v20 }
 0x517   :  { %7378 = vmatpush3.msra.mxu1 %v834_v49 }
 0x518   :  { %7379 = vmatprep.subr.mxu1 %v8738_v20 }
 0x519   :  { %7380 = vmatpush3.msra.mxu1 %v833_v50 }
 0x51a   :  { %7381 = vmatprep.subr.mxu1 %v8738_v20 }
 0x51b   :  { %7382 = vmatpush3.msra.mxu1 %v832_v51 }
 0x51c   :  { %7383 = vmatprep.subr.mxu1 %v8738_v20 }
 0x51d   :  { %7384 = vmatpush3.msra.mxu1 %v831_v53 }
 0x51e   :  { %7393 = vmatprep.subr.mxu1 %v8738_v20 }
 0x5ce   :  { %v979_v56 = vpop.f32.mrf.mxu1 }
 0x5cf   :  { %7386 = vmatmul.mubr.msk.f32.vlgmr.msra.gmra.mxu1 %vm991_vm8, %v979_v56 }
 0x5d0   :  { %v7349_v57 = vpop.f32.mrf.mxu1  ;;  %7395 = vmatprep.mubr.msk.f32.mxu1 %vm8739_vm4, %v8738_v20 }
 0x68f   :  { %v1140_v61 = vpop.f32.mrf.mxu1 }
 0x690   :  { %v9076_v63 = vadd.f32 %v6935_v60, %v1140_v61 }
 0x691   :  { %v7387_v0 = vpop.f32.mrf.mxu1 }
 0x692   :  { %1489 = vrot.lane.b32.xlu0 %v9076_v63, %s8741_s11  ;;  %1316 = vrot.lane.b32.xlu1 %v9076_v63, %s8742_s27 }
 0x693   :  { %7389 = vmatpush3.xpose.msk.msra.mxu0 %vm557_vm2, %v9076_v63 }
 0x694   :  { %7398 = vmatprep.subr.mxu0 %v8738_v20 }
 0x696   :  { %7391 = vmatmul.mubr.msk.f32.vlgmr.msra.gmra.mxu0 %vm557_vm2, %v9078_v1  ;;  %1662 = vrot.lane.b32.xlu0 %v9076_v63, %s8743_s17 }
 0x697   :  { %1314 = vrot.lane.b32.xlu1 %v9078_v1, %s8742_s27  ;;  %7400 = vmatprep.mubr.msk.f32.mxu0 %vm8739_vm4, %v8738_v20 }
 0x69b   :  { %1487 = vrot.lane.b32.xlu1 %v9078_v1, %s8741_s11 }
 0x69f   :  { %1660 = vrot.lane.b32.xlu1 %v9078_v1, %s8743_s17 }
 0x704   :  { %v1317_v2 = vpop.permute.xlu1 %1316  ;;  %v1490_v3 = vpop.permute.xlu0 %1489 }
 0x705   :  { %7399 = vmatpush3.xpose.msk.msra.mxu0 %vm557_vm2, %v1317_v2 }
 0x706   :  { %7408 = vmatprep.subr.mxu0 %v8738_v20 }
 0x708   :  { %v1663_v6 = vpop.permute.xlu0 %1662 }
 0x709   :  { %v9101_v4 = vpop.permute.xlu1 %1314 }
 0x70a   :  { %7401 = vmatmul.mubr.msk.f32.vlgmr.msra.gmra.mxu0 %vm557_vm2, %v9101_v4 }
 0x70b   :  { %7409 = vmatpush3.xpose.msk.msra.mxu0 %vm557_vm2, %v1490_v3  ;;  %7410 = vmatprep.mubr.msk.f32.mxu0 %vm8739_vm4, %v8738_v20 }
 0x70c   :  { %7418 = vmatprep.subr.mxu0 %v8738_v20 }
 0x70d   :  { %v9109_v5 = vpop.permute.xlu1 %1487 }
 0x70e   :  { %7411 = vmatmul.mubr.msk.f32.vlgmr.msra.gmra.mxu0 %vm557_vm2, %v9109_v5 }
 0x70f   :  { %7419 = vmatpush3.xpose.msk.msra.mxu0 %vm557_vm2, %v1663_v6  ;;  %7420 = vmatprep.mubr.msk.f32.mxu0 %vm8739_vm4, %v8738_v20 }
 0x710   :  { %7428 = vmatprep.subr.mxu0 %v8738_v20 }
 0x711   :  { %v9117_v7 = vpop.permute.xlu1 %1660 }
 0x712   :  { %7421 = vmatmul.mubr.msk.f32.vlgmr.msra.gmra.mxu0 %vm557_vm2, %v9117_v7 }
 0x713   :  { %7444 = vmatprep.mubr.msk.f32.mxu0 %vm8739_vm4, %v8738_v20 }
 0x756   :  { %v1216_v8 = vpop.f32.mrf.mxu0 }
 0x757   :  { %v1220_v11 = vmul.f32 0.125, %v1216_v8 }
 0x758   :  { %v7392_v12 = vpop.f32.mrf.mxu0 }
 0x759   :  { %v1221_v13 = vadd.f32 %v1220_v11, %v984_v10  ;;  %v847_v12 = vld [vmem:[#allocation20 + $0x38] sm:$0xff] }
 0x75a   :  { %7429 = vmatpush3.msra.mxu0 %v847_v12 }
 0x75b   :  { %v1223_v14 = vsel %vm1222_vm10, %v1221_v13, -inf  ;;  %7430 = vmatprep.subr.mxu0 %v8738_v20 }
 0x75c   :  { %1224 = vmax.xlane.f32.xlu0 %v1223_v14 }
 0x7ca   :  { %v1388_v15 = vpop.f32.mrf.mxu0 }
 0x7cb   :  { %v1392_v16 = vmul.f32 0.125, %v1388_v15 }
 0x7cc   :  { %v7402_v17 = vpop.f32.mrf.mxu0 }
 0x7cd   :  { %v1393_v18 = vadd.f32 %v1392_v16, %v984_v10  ;;  %v845_v16 = vld [vmem:[#allocation20 + $0x28] sm:$0xff]  ;;  %v844_v17 = vld [vmem:[#allocation20 + $0x20] sm:$0xff] }
 0x7ce   :  { %v1561_v19 = vpop.f32.mrf.mxu0 }
 0x7cf   :  { %v1565_v21 = vmul.f32 0.125, %v1561_v19  ;;  %v1394_v22 = vsel %vm1222_vm10, %v1393_v18, -inf  ;;  %v842_v19 = vld [vmem:[#allocation20 + $0x10] sm:$0xff] }
 0x7d0   :  { %1395 = vmax.xlane.f32.xlu1 %v1394_v22  ;;  %v7412_v23 = vpop.f32.mrf.mxu0  ;;  %v840_v22 = vld [vmem:[#allocation20] sm:$0xff] }
 0x7d1   :  { %v1566_v24 = vadd.f32 %v1565_v21, %v984_v10  ;;  %v841_v21 = vld [vmem:[#allocation20 + $0x8] sm:$0xff]  ;;  %v856_v23 = vld [vmem:[#allocation23 + $0x38] sm:$0xff] }
 0x7d2   :  { %v1734_v25 = vpop.f32.mrf.mxu0 }
 0x7d3   :  { %v1738_v26 = vmul.f32 0.125, %v1734_v25  ;;  %v1567_v27 = vsel %vm1222_vm10, %v1566_v24, -inf }
 0x7d4   :  { %1568 = vmax.xlane.f32.xlu0 %v1567_v27  ;;  %v7422_v28 = vpop.f32.mrf.mxu0 }
 0x7d5   :  { %v1739_v29 = vadd.f32 %v1738_v26, %v984_v10  ;;  %v854_v26 = vld [vmem:[#allocation23 + $0x28] sm:$0xff]  ;;  %v853_v28 = vld [vmem:[#allocation23 + $0x20] sm:$0xff] }
 0x7d7   :  { %v1740_v30 = vsel %vm1222_vm10, %v1739_v29, -inf }
 0x7d8   :  { %1741 = vmax.xlane.f32.xlu0 %v1740_v30 }
 0x7e1   :  { %1234 = vrot.lane.b32.xlu1 %v9076_v63, %s8745_s21 }
 0x7e5   :  { %v1225_v31 = vpop.xlane.xlu0 %1224 }
 0x7e6   :  { %v1226_v32 = vsub.f32 %v1221_v13, %v1225_v31  ;;  %v846_v13 = vld [vmem:[#allocation20 + $0x30] sm:$0xff] }
 0x7e7   :  { %7431 = vmatpush3.msra.mxu0 %v846_v13 }
 0x7e8   :  { %v1227_v33 = vmul.f32 1.442695, %v1226_v32  ;;  %7432 = vmatprep.subr.mxu0 %v8738_v20 }
 0x7e9   :  { %7433 = vmatpush3.msra.mxu0 %v845_v16 }
 0x7ea   :  { %7967 = vpow2.f32 %v1227_v33  ;;  %7434 = vmatprep.subr.mxu0 %v8738_v20 }
 0x7eb   :  { %7435 = vmatpush3.msra.mxu0 %v844_v17 }
 0x7ec   :  { %7436 = vmatprep.subr.mxu0 %v8738_v20 }
 0x7f7   :  { %v7968_v34 = vpop.eup %7967 }
 0x7f8   :  { %v1229_v36 = vsel %vm1222_vm10, %v7968_v34, 0.0 }
 0x805   :  { %1230 = vadd.xlane.f32.xlu1 %v1229_v36 }
 0x859   :  { %v1396_v38 = vpop.xlane.xlu1 %1395 }
 0x85a   :  { %v1397_v39 = vsub.f32 %v1393_v18, %v1396_v38  ;;  %v843_v18 = vld [vmem:[#allocation20 + $0x18] sm:$0xff] }
 0x85b   :  { %7437 = vmatpush3.msra.mxu0 %v843_v18 }
 0x85c   :  { %v1398_v40 = vmul.f32 1.442695, %v1397_v39  ;;  %7438 = vmatprep.subr.mxu0 %v8738_v20 }
 0x85d   :  { %v1235_v42 = vpop.permute.xlu1 %1234  ;;  %v1569_v43 = vpop.xlane.xlu0 %1568  ;;  %7439 = vmatpush3.msra.mxu0 %v842_v19 }
 0x85e   :  { %7969 = vpow2.f32 %v1398_v40  ;;  %v1570_v45 = vsub.f32 %v1566_v24, %v1569_v43  ;;  %7394 = vmatpush3.msk.msra.mxu1 %vm1240_vm11, %v1235_v42  ;;  %7440 = vmatprep.subr.mxu0 %v8738_v20  ;;  %v855_v24 = vld [vmem:[#allocation23 + $0x30] sm:$0xff] }
 0x85f   :  { %7403 = vmatprep.subr.mxu1 %v8738_v20  ;;  %7441 = vmatpush3.msra.mxu0 %v841_v21 }
 0x860   :  { %v1571_v46 = vmul.f32 1.442695, %v1570_v45  ;;  %7442 = vmatprep.subr.mxu0 %v8738_v20 }
 0x861   :  { %v1742_v47 = vpop.xlane.xlu0 %1741  ;;  %7443 = vmatpush3.msra.mxu0 %v840_v22 }
 0x862   :  { %7971 = vpow2.f32 %v1571_v46  ;;  %v1743_v48 = vsub.f32 %v1739_v29, %v1742_v47  ;;  %7466 = vmatprep.subr.mxu0 %v8738_v20  ;;  %v852_v47 = vld [vmem:[#allocation23 + $0x18] sm:$0xff] }
 0x864   :  { %v1744_v49 = vmul.f32 1.442695, %v1743_v48  ;;  %v851_v48 = vld [vmem:[#allocation23 + $0x10] sm:$0xff] }
 0x866   :  { %7973 = vpow2.f32 %v1744_v49  ;;  %v850_v49 = vld [vmem:[#allocation23 + $0x8] sm:$0xff] }
 0x86b   :  { %v7970_v50 = vpop.eup %7969 }
 0x86c   :  { %v1400_v51 = vsel %vm1222_vm10, %v7970_v50, 0.0 }
 0x86d   :  { %1401 = vadd.xlane.f32.xlu0 %v1400_v51  ;;  %v6953_v51 = vld [vmem:[#allocation21] ss:$0 sm:$0xff] }
 0x86f   :  { %v7972_v52 = vpop.eup %7971 }
 0x870   :  { %v1573_v53 = vsel %vm1222_vm10, %v7972_v52, 0.0 }
 0x871   :  { %1574 = vadd.xlane.f32.xlu1 %v1573_v53 }
 0x873   :  { %v7974_v54 = vpop.eup %7973 }
 0x874   :  { %v1746_v55 = vsel %vm1222_vm10, %v7974_v54, 0.0 }
 0x875   :  { %1747 = vadd.xlane.f32.xlu0 %v1746_v55 }
 0x882   :  { %1578 = vrot.lane.b32.xlu1 %v9076_v63, %s8740_s7 }
 0x886   :  { %1751 = vrot.lane.b32.xlu1 %v9076_v63, %s8746_s15 }
 0x88b   :  { %1405 = vrot.lane.b32.xlu0 %v9076_v63, %s8747_s3 }
 0x88e   :  { %v1231_v56 = vpop.xlane.xlu1 %1230 }
 0x88f   :  { %7975 = vrcp.f32 %v1231_v56 }
 0x89c   :  { %v7976_v57 = vpop.eup %7975 }
 0x89d   :  { %v1233_v58 = vmul.f32 %v7976_v57, %v7968_v34  ;;  %v6955_v57 = vld [vmem:[#allocation24] ss:$0 sm:$0xff] }
 0x89f   :  { %7396 = vmatmul.mubr.msk.f32.vlgmr.msra.gmra.mxu1 %vm1236_vm12, %v1233_v58 }
 0x8a0   :  { %7405 = vmatprep.mubr.msk.f32.mxu1 %vm8739_vm4, %v8738_v20 }
 0x8f6   :  { %v1402_v59 = vpop.xlane.xlu0 %1401 }
 0x8f7   :  { %7977 = vrcp.f32 %v1402_v59 }
 0x8fa   :  { %v1575_v60 = vpop.xlane.xlu1 %1574 }
 0x8fb   :  { %7979 = vrcp.f32 %v1575_v60 }
 0x8fe   :  { %v1748_v61 = vpop.xlane.xlu0 %1747  ;;  %v1579_v0 = vpop.permute.xlu1 %1578 }
 0x8ff   :  { %7981 = vrcp.f32 %v1748_v61 }
 0x902   :  { %v1406_v62 = vpop.permute.xlu0 %1405  ;;  %v1752_v8 = vpop.permute.xlu1 %1751 }
 0x903   :  { %7404 = vmatpush3.msk.msra.mxu1 %vm1240_vm11, %v1406_v62 }
 0x904   :  { %v7978_v63 = vpop.eup %7977  ;;  %7413 = vmatprep.subr.mxu1 %v8738_v20 }
 0x905   :  { %v1404_v2 = vmul.f32 %v7978_v63, %v7970_v50  ;;  %v849_v50 = vld [vmem:[#allocation23] sm:$0xff] }
 0x907   :  { %7406 = vmatmul.mubr.msk.f32.vlgmr.msra.gmra.mxu1 %vm1236_vm12, %v1404_v2 }
 0x908   :  { %v7980_v3 = vpop.eup %7979  ;;  %7414 = vmatpush3.msk.msra.mxu1 %vm1240_vm11, %v1579_v0  ;;  %7415 = vmatprep.mubr.msk.f32.mxu1 %vm8739_vm4, %v8738_v20 }
 0x909   :  { %7423 = vmatprep.subr.mxu1 %v8738_v20  ;;  %v1577_v6 = vmul.f32 %v7980_v3, %v7972_v52 }
 0x90b   :  { %7416 = vmatmul.mubr.msk.f32.vlgmr.msra.gmra.mxu1 %vm1236_vm12, %v1577_v6 }
 0x90c   :  { %v7982_v10 = vpop.eup %7981  ;;  %7424 = vmatpush3.msk.msra.mxu1 %vm1240_vm11, %v1752_v8  ;;  %7425 = vmatprep.mubr.msk.f32.mxu1 %vm8739_vm4, %v8738_v20 }
 0x90d   :  { %v1750_v11 = vmul.f32 %v7982_v10, %v7974_v54  ;;  %7447 = vmatprep.subr.mxu1 %v8738_v20 }
 0x90f   :  { %7426 = vmatmul.mubr.msk.f32.vlgmr.msra.gmra.mxu1 %vm1236_vm12, %v1750_v11 }
 0x910   :  { %7463 = vmatprep.mubr.msk.f32.mxu1 %vm8739_vm4, %v8738_v20  ;;  %7448 = vmatpush3.msra.mxu1 %v856_v23 }
 0x911   :  { %7449 = vmatprep.subr.mxu1 %v8738_v20 }
 0x912   :  { %7450 = vmatpush3.msra.mxu1 %v855_v24 }
 0x913   :  { %7451 = vmatprep.subr.mxu1 %v8738_v20 }
 0x914   :  { %7452 = vmatpush3.msra.mxu1 %v854_v26 }
 0x915   :  { %7453 = vmatprep.subr.mxu1 %v8738_v20 }
 0x916   :  { %7454 = vmatpush3.msra.mxu1 %v853_v28 }
 0x917   :  { %7455 = vmatprep.subr.mxu1 %v8738_v20 }
 0x918   :  { %7456 = vmatpush3.msra.mxu1 %v852_v47 }
 0x919   :  { %7457 = vmatprep.subr.mxu1 %v8738_v20 }
 0x91a   :  { %7458 = vmatpush3.msra.mxu1 %v851_v48 }
 0x91b   :  { %7459 = vmatprep.subr.mxu1 %v8738_v20 }
 0x91c   :  { %7460 = vmatpush3.msra.mxu1 %v850_v49 }
 0x91d   :  { %7461 = vmatprep.subr.mxu1 %v8738_v20 }
 0x91e   :  { %7462 = vmatpush3.msra.mxu1 %v849_v50 }
 0x91f   :  { %7471 = vmatprep.subr.mxu1 %v8738_v20 }
 0x95f   :  { %v1309_v14 = vpop.f32.mrf.mxu1 }
 0x960   :  { %v1313_v39 = vadd.f32 %v1309_v14, %v9078_v1 }
 0x961   :  { %v7397_v15 = vpop.f32.mrf.mxu1 }
 0x9c7   :  { %v1478_v25 = vpop.f32.mrf.mxu1 }
 0x9c8   :  { %1483 = vrot.lane.b32.xlu0 %v1478_v25, %s8746_s15 }
 0x9c9   :  { %v7407_v27 = vpop.f32.mrf.mxu1 }
 0x9cb   :  { %v1651_v29 = vpop.f32.mrf.mxu1 }
 0x9cc   :  { %1656 = vrot.lane.b32.xlu1 %v1651_v29, %s8740_s7 }
 0x9cd   :  { %v7417_v30 = vpop.f32.mrf.mxu1 }
 0x9cf   :  { %v1824_v31 = vpop.f32.mrf.mxu1 }
 0x9d0   :  { %1829 = vrot.lane.b32.xlu0 %v1824_v31, %s8747_s3 }
 0x9d1   :  { %v7427_v32 = vpop.f32.mrf.mxu1 }
 0xa3a   :  { %v1484_v33 = vpop.permute.xlu0 %1483 }
 0xa3b   :  { %v1486_v36 = vadd.f32 %v1484_v33, %v9078_v1 }
 0xa3d   :  { %v1833_v42 = vsel %vm557_vm2, %v1313_v39, %v1486_v36 }
 0xa3e   :  { %v1657_v34 = vpop.permute.xlu1 %1656 }
 0xa3f   :  { %v1659_v38 = vadd.f32 %v1657_v34, %v9078_v1 }
 0xa41   :  { %v1834_v45 = vsel %vm645_vm3, %v1833_v42, %v1659_v38 }
 0xa42   :  { %v1830_v40 = vpop.permute.xlu0 %1829 }
 0xa43   :  { %v1832_v43 = vadd.f32 %v1830_v40, %v9078_v1 }
 0xa45   :  { %v1836_v46 = vsel %vm1835_vm13, %v1834_v45, %v1832_v43 }
 0xa46   :  { %7445 = vmatmul.mubr.msk.f32.vlgmr.msra.gmra.mxu0 %vm991_vm8, %v1836_v46 }
 0xa47   :  { %7468 = vmatprep.mubr.msk.f32.mxu0 %vm8739_vm4, %v8738_v20 }
 0xb06   :  { %v1912_v52 = vpop.f32.mrf.mxu0 }
 0xb07   :  { %v1913_v53 = vadd.f32 %v6953_v51, %v1912_v52 }
 0xb08   :  { %v7446_v54 = vpop.f32.mrf.mxu0 }
 0xb09   :  { %v1916_v55 = vmax.f32 %v1913_v53, 0.0 }
 0xb0b   :  { %v1917_v56 = vadd.f32 %v1916_v55, %v1836_v46 }
 0xb0d   :  { %7464 = vmatmul.mubr.msk.f32.vlgmr.msra.gmra.mxu1 %vm991_vm8, %v1917_v56 }
 0xb0e   :  { %7473 = vmatprep.mubr.msk.f32.mxu1 %vm8739_vm4, %v8738_v20 }
 0xbcd   :  { %v1993_v58 = vpop.f32.mrf.mxu1 }
 0xbce   :  { %v9195_v59 = vadd.f32 %v6955_v57, %v1993_v58 }
 0xbcf   :  { %v7465_v60 = vpop.f32.mrf.mxu1 }
 0xbd0   :  { %2168 = vrot.lane.b32.xlu0 %v9195_v59, %s8748_s16  ;;  %1998 = vrot.lane.b32.xlu1 %v9195_v59, %s8741_s11 }
 0xbd4   :  { %2340 = vrot.lane.b32.xlu0 %v9195_v59, %s8743_s17  ;;  %2166 = vrot.lane.b32.xlu1 %v9195_v59, %s8749_s0 }
 0xbd8   :  { %2512 = vrot.lane.b32.xlu0 %v9195_v59, %s8750_s14  ;;  %2338 = vrot.lane.b32.xlu1 %v9195_v59, %s8742_s27 }
 0xbdc   :  { %2510 = vrot.lane.b32.xlu1 %v9195_v59, %s8751_s18 }
 0xc42   :  { %v2169_v61 = vpop.permute.xlu0 %2168  ;;  %v1999_v62 = vpop.permute.xlu1 %1998 }
 0xc43   :  { %7467 = vmatpush3.xpose.msk.msra.mxu0 %vm2000_vm14, %v1999_v62 }
 0xc44   :  { %7476 = vmatprep.subr.mxu0 %v8738_v20 }
 0xc46   :  { %7469 = vmatmul.mubr.msk.f32.vlgmr.msra.gmra.mxu0 %vm2000_vm14, %v9195_v59  ;;  %v2167_v63 = vpop.permute.xlu1 %2166  ;;  %v2341_v0 = vpop.permute.xlu0 %2340 }
 0xc47   :  { %7477 = vmatpush3.xpose.msk.msra.mxu0 %vm2000_vm14, %v2169_v61  ;;  %7478 = vmatprep.mubr.msk.f32.mxu0 %vm8739_vm4, %v8738_v20 }
 0xc48   :  { %7486 = vmatprep.subr.mxu0 %v8738_v20 }
 0xc4a   :  { %7479 = vmatmul.mubr.msk.f32.vlgmr.msra.gmra.mxu0 %vm2000_vm14, %v2167_v63  ;;  %v2339_v2 = vpop.permute.xlu1 %2338  ;;  %v2513_v3 = vpop.permute.xlu0 %2512 }
 0xc4b   :  { %7487 = vmatpush3.xpose.msk.msra.mxu0 %vm2000_vm14, %v2341_v0  ;;  %7488 = vmatprep.mubr.msk.f32.mxu0 %vm8739_vm4, %v8738_v20 }
 0xc4c   :  { %7496 = vmatprep.subr.mxu0 %v8738_v20 }
 0xc4e   :  { %7489 = vmatmul.mubr.msk.f32.vlgmr.msra.gmra.mxu0 %vm2000_vm14, %v2339_v2  ;;  %v2511_v6 = vpop.permute.xlu1 %2510 }
 0xc4f   :  { %7497 = vmatpush3.xpose.msk.msra.mxu0 %vm2000_vm14, %v2513_v3  ;;  %7498 = vmatprep.mubr.msk.f32.mxu0 %vm8739_vm4, %v8738_v20 }
 0xc50   :  { %7506 = vmatprep.subr.mxu0 %v8738_v20 }
 0xc52   :  { %7499 = vmatmul.mubr.msk.f32.vlgmr.msra.gmra.mxu0 %vm2000_vm14, %v2511_v6  ;;  %v861_v6 = vld [vmem:[#allocation26 + $0x18] sm:$0xff] }
 0xc53   :  { %7514 = vmatprep.mubr.msk.f32.mxu0 %vm8739_vm4, %v8738_v20  ;;  %7507 = vmatpush3.msra.mxu0 %v861_v6 }
 0xc54   :  { %7508 = vmatprep.subr.mxu0 %v8738_v20 }
 0xd06   :  { %v2071_v8 = vpop.f32.mrf.mxu0 }
 0xd07   :  { %v2075_v10 = vmul.f32 0.17677669, %v2071_v8  ;;  %v860_v8 = vld [vmem:[#allocation26 + $0x10] sm:$0xff] }
 0xd08   :  { %v7470_v11 = vpop.f32.mrf.mxu0  ;;  %7509 = vmatpush3.msra.mxu0 %v860_v8 }
 0xd09   :  { %v2077_v12 = vsel %vm2076_vm15, %v2075_v10, -inf  ;;  %7510 = vmatprep.subr.mxu0 %v8738_v20  ;;  %v859_v11 = vld [vmem:[#allocation26 + $0x8] sm:$0xff] }
 0xd0a   :  { %2078 = vmax.xlane.f32.xlu0 %v2077_v12  ;;  %v2240_v13 = vpop.f32.mrf.mxu0  ;;  %7511 = vmatpush3.msra.mxu0 %v859_v11 }
 0xd0b   :  { %v2244_v14 = vmul.f32 0.17677669, %v2240_v13  ;;  %7512 = vmatprep.subr.mxu0 %v8738_v20  ;;  %v858_v13 = vld [vmem:[#allocation26] sm:$0xff] }
 0xd0c   :  { %v7480_v15 = vpop.f32.mrf.mxu0  ;;  %7513 = vmatpush3.msra.mxu0 %v858_v13 }
 0xd0d   :  { %v2245_v16 = vsel %vm2076_vm15, %v2244_v14, -inf  ;;  %v866_v15 = vld [vmem:[%s9851_s23 + $0x10] sm:$0xff]  ;;  %7528 = vmatprep.subr.mxu0 %v8738_v20 }
 0xd0e   :  { %2246 = vmax.xlane.f32.xlu1 %v2245_v16  ;;  %v2412_v17 = vpop.f32.mrf.mxu0 }
 0xd0f   :  { %v2416_v18 = vmul.f32 0.17677669, %v2412_v17  ;;  %v865_v17 = vld [vmem:[%s9851_s23 + $0x8] sm:$0xff] }
 0xd10   :  { %v7490_v19 = vpop.f32.mrf.mxu0 }
 0xd11   :  { %v2417_v21 = vsel %vm2076_vm15, %v2416_v18, -inf }
 0xd12   :  { %2418 = vmax.xlane.f32.xlu0 %v2417_v21  ;;  %v2584_v22 = vpop.f32.mrf.mxu0 }
 0xd13   :  { %v2588_v23 = vmul.f32 0.17677669, %v2584_v22 }
 0xd14   :  { %v7500_v24 = vpop.f32.mrf.mxu0 }
 0xd15   :  { %v2589_v25 = vsel %vm2076_vm15, %v2588_v23, -inf }
 0xd16   :  { %2590 = vmax.xlane.f32.xlu0 %v2589_v25 }
 0xd1f   :  { %2088 = vrot.lane.b32.xlu1 %v9195_v59, %s8745_s21 }
 0xd93   :  { %v2079_v26 = vpop.xlane.xlu0 %2078 }
 0xd94   :  { %v2080_v27 = vsub.f32 %v2075_v10, %v2079_v26 }
 0xd96   :  { %v2081_v28 = vmul.f32 1.442695, %v2080_v27 }
 0xd97   :  { %v2247_v29 = vpop.xlane.xlu1 %2246 }
 0xd98   :  { %7983 = vpow2.f32 %v2081_v28  ;;  %v2248_v30 = vsub.f32 %v2244_v14, %v2247_v29  ;;  %v867_v14 = vld [vmem:[%s9851_s23 + $0x18] sm:$0xff] }
 0xd9a   :  { %v2249_v31 = vmul.f32 1.442695, %v2248_v30 }
 0xd9b   :  { %v2419_v32 = vpop.xlane.xlu0 %2418  ;;  %v2089_v33 = vpop.permute.xlu1 %2088 }
 0xd9c   :  { %7985 = vpow2.f32 %v2249_v31  ;;  %v2420_v34 = vsub.f32 %v2416_v18, %v2419_v32  ;;  %7472 = vmatpush3.msk.msra.mxu1 %vm471_vm0, %v2089_v33 }
 0xd9d   :  { %7481 = vmatprep.subr.mxu1 %v8738_v20 }
 0xd9e   :  { %v2421_v36 = vmul.f32 1.442695, %v2420_v34  ;;  %v872_v34 = vld [vmem:[#allocation32 + $0x18] sm:$0xff] }
 0xd9f   :  { %v2591_v38 = vpop.xlane.xlu0 %2590 }
 0xda0   :  { %7987 = vpow2.f32 %v2421_v36  ;;  %v2592_v39 = vsub.f32 %v2588_v23, %v2591_v38  ;;  %v864_v36 = vld [vmem:[%s9851_s23] sm:$0xff] }
 0xda1   :  { %v863_v38 = vld [vmem:[#allocation29] sm:$0x1] }
 0xda2   :  { %v2593_v40 = vmul.f32 1.442695, %v2592_v39  ;;  %v871_v39 = vld [vmem:[#allocation32 + $0x10] sm:$0xff] }
 0xda4   :  { %7989 = vpow2.f32 %v2593_v40  ;;  %v869_v40 = vld [vmem:[#allocation32] sm:$0xff] }
 0xda5   :  { %v7984_v42 = vpop.eup %7983 }
 0xda6   :  { %v2083_v43 = vsel %vm2076_vm15, %v7984_v42, 0.0 }
 0xda7   :  { %2084 = vadd.xlane.f32.xlu1 %v2083_v43 }
 0xda9   :  { %v7986_v45 = vpop.eup %7985 }
 0xdaa   :  { %v2251_v46 = vsel %vm2076_vm15, %v7986_v45, 0.0 }
 0xdab   :  { %2252 = vadd.xlane.f32.xlu0 %v2251_v46 }
 0xdad   :  { %v7988_v47 = vpop.eup %7987 }
 0xdae   :  { %v2423_v48 = vsel %vm2076_vm15, %v7988_v47, 0.0 }
 0xdaf   :  { %2424 = vadd.xlane.f32.xlu1 %v2423_v48 }
 0xdb1   :  { %v7990_v49 = vpop.eup %7989 }
 0xdb2   :  { %v2595_v50 = vsel %vm2076_vm15, %v7990_v49, 0.0 }
 0xdb3   :  { %2596 = vadd.xlane.f32.xlu0 %v2595_v50 }
 0xdc0   :  { %2428 = vrot.lane.b32.xlu1 %v9195_v59, %s8747_s3 }
 0xdc4   :  { %2600 = vrot.lane.b32.xlu1 %v9195_v59, %s8752_s4 }
 0xdc9   :  { %2256 = vrot.lane.b32.xlu0 %v9195_v59, %s8753_s22 }
 0xe30   :  { %v2085_v51 = vpop.xlane.xlu1 %2084 }
 0xe31   :  { %7991 = vrcp.f32 %v2085_v51 }
 0xe34   :  { %v2253_v52 = vpop.xlane.xlu0 %2252 }
 0xe35   :  { %7993 = vrcp.f32 %v2253_v52 }
 0xe38   :  { %v2425_v53 = vpop.xlane.xlu1 %2424 }
 0xe39   :  { %7995 = vrcp.f32 %v2425_v53  ;;  %v6976_v53 = vld [vmem:[#allocation33] ss:$0 sm:$0xff] }
 0xe3c   :  { %v2597_v54 = vpop.xlane.xlu0 %2596  ;;  %v2429_v60 = vpop.permute.xlu1 %2428 }
 0xe3d   :  { %7997 = vrcp.f32 %v2597_v54 }
 0xe3e   :  { %v7992_v55 = vpop.eup %7991 }
 0xe3f   :  { %v2087_v56 = vmul.f32 %v7992_v55, %v7984_v42  ;;  %v6973_v42 = vld [vmem:[#allocation27] ss:$0 sm:$0xff] }
 0xe40   :  { %v2257_v57 = vpop.permute.xlu0 %2256  ;;  %v2601_v0 = vpop.permute.xlu1 %2600 }
 0xe41   :  { %7474 = vmatmul.mubr.msk.f32.vlgmr.msra.gmra.mxu1 %vm464_vm1, %v2087_v56 }
 0xe42   :  { %v7994_v58 = vpop.eup %7993  ;;  %7482 = vmatpush3.msk.msra.mxu1 %vm471_vm0, %v2257_v57  ;;  %7483 = vmatprep.mubr.msk.f32.mxu1 %vm8739_vm4, %v8738_v20 }
 0xe43   :  { %7491 = vmatprep.subr.mxu1 %v8738_v20  ;;  %v2255_v61 = vmul.f32 %v7994_v58, %v7986_v45 }
 0xe45   :  { %7484 = vmatmul.mubr.msk.f32.vlgmr.msra.gmra.mxu1 %vm464_vm1, %v2255_v61 }
 0xe46   :  { %v7996_v62 = vpop.eup %7995  ;;  %7492 = vmatpush3.msk.msra.mxu1 %vm471_vm0, %v2429_v60  ;;  %7493 = vmatprep.mubr.msk.f32.mxu1 %vm8739_vm4, %v8738_v20 }
 0xe47   :  { %7501 = vmatprep.subr.mxu1 %v8738_v20  ;;  %v2427_v63 = vmul.f32 %v7996_v62, %v7988_v47 }
 0xe49   :  { %7494 = vmatmul.mubr.msk.f32.vlgmr.msra.gmra.mxu1 %vm464_vm1, %v2427_v63 }
 0xe4a   :  { %v7998_v2 = vpop.eup %7997  ;;  %7502 = vmatpush3.msk.msra.mxu1 %vm471_vm0, %v2601_v0  ;;  %7503 = vmatprep.mubr.msk.f32.mxu1 %vm8739_vm4, %v8738_v20 }
 0xe4b   :  { %v2599_v3 = vmul.f32 %v7998_v2, %v7990_v49  ;;  %7517 = vmatprep.subr.mxu1 %v8738_v20  ;;  %v868_v49 = vld [vmem:[#allocation30] sm:$0x1] }
 0xe4d   :  { %7504 = vmatmul.mubr.msk.f32.vlgmr.msra.gmra.mxu1 %vm464_vm1, %v2599_v3 }
 0xe4e   :  { %7525 = vmatprep.mubr.msk.f32.mxu1 %vm8739_vm4, %v8738_v20  ;;  %7518 = vmatpush3.msra.mxu1 %v867_v14 }
 0xe4f   :  { %7519 = vmatprep.subr.mxu1 %v8738_v20 }
 0xe50   :  { %7520 = vmatpush3.msra.mxu1 %v866_v15 }
 0xe51   :  { %7521 = vmatprep.subr.mxu1 %v8738_v20 }
 0xe52   :  { %7522 = vmatpush3.msra.mxu1 %v865_v17 }
 0xe53   :  { %7523 = vmatprep.subr.mxu1 %v8738_v20 }
 0xe54   :  { %7524 = vmatpush3.msra.mxu1 %v864_v36 }
 0xe55   :  { %7526 = vmatmul.mubr.msk.f32.vlgmr.msra.gmra.mxu1 %vm645_vm3, %v863_v38  ;;  %7539 = vmatprep.subr.mxu1 %v8738_v20 }
 0xe56   :  { %7541 = vmatprep.mubr.msk.f32.mxu1 %vm8739_vm4, %v8738_v20 }
 0xf01   :  { %v2161_v10 = vpop.f32.mrf.mxu1 }
 0xf02   :  { %v2165_v28 = vadd.f32 %v2161_v10, %v9195_v59 }
 0xf03   :  { %v7475_v12 = vpop.f32.mrf.mxu1 }
 0xf05   :  { %v2329_v16 = vpop.f32.mrf.mxu1 }
 0xf06   :  { %2334 = vrot.lane.b32.xlu0 %v2329_v16, %s8725_s2 }
 0xf07   :  { %v7485_v18 = vpop.f32.mrf.mxu1 }
 0xf09   :  { %v2501_v19 = vpop.f32.mrf.mxu1 }
 0xf0a   :  { %2506 = vrot.lane.b32.xlu1 %v2501_v19, %s8746_s15 }
 0xf0b   :  { %v7495_v21 = vpop.f32.mrf.mxu1 }
 0xf0d   :  { %v2673_v22 = vpop.f32.mrf.mxu1 }
 0xf0e   :  { %2678 = vrot.lane.b32.xlu0 %v2673_v22, %s8754_s19 }
 0xf0f   :  { %v7505_v23 = vpop.f32.mrf.mxu1 }
 0xf15   :  { %v2836_v50 = vpop.f32.mrf.mxu1 }
 0xf16   :  { %v9303_v51 = vadd.f32 %v2836_v50, %v868_v49 }
 0xf17   :  { %v7527_v52 = vpop.f32.mrf.mxu1 }
 0xf18   :  { %3086 = vrot.lane.b32.xlu0 %v9303_v51, %s8749_s0 }
 0xf1c   :  { %3258 = vrot.lane.b32.xlu0 %v9303_v51, %s8742_s27 }
 0xf20   :  { %3430 = vrot.lane.b32.xlu0 %v9303_v51, %s8751_s18 }
 0xf78   :  { %v2335_v24 = vpop.permute.xlu0 %2334 }
 0xf79   :  { %v2337_v26 = vadd.f32 %v2335_v24, %v9195_v59 }
 0xf7b   :  { %v2682_v30 = vsel %vm2000_vm14, %v2165_v28, %v2337_v26 }
 0xf7c   :  { %v2507_v25 = vpop.permute.xlu1 %2506 }
 0xf7d   :  { %v2509_v27 = vadd.f32 %v2507_v25, %v9195_v59 }
 0xf7f   :  { %v2683_v32 = vsel %vm557_vm2, %v2682_v30, %v2509_v27 }
 0xf80   :  { %v2679_v29 = vpop.permute.xlu0 %2678 }
 0xf81   :  { %v2681_v31 = vadd.f32 %v2679_v29, %v9195_v59  ;;  %v870_v59 = vld [vmem:[#allocation32 + $0x8] sm:$0xff] }
 0xf83   :  { %v2685_v33 = vsel %vm2684_vm5, %v2683_v32, %v2681_v31 }
 0xf84   :  { %7515 = vmatmul.mubr.msk.f32.vlgmr.msra.gmra.mxu0 %vm645_vm3, %v2685_v33 }
 0xf85   :  { %7536 = vmatprep.mubr.msk.f32.mxu0 %vm8739_vm4, %v8738_v20  ;;  %7529 = vmatpush3.msra.mxu0 %v872_v34 }
 0xf86   :  { %7530 = vmatprep.subr.mxu0 %v8738_v20 }
 0xf87   :  { %7531 = vmatpush3.msra.mxu0 %v871_v39 }
 0xf88   :  { %7532 = vmatprep.subr.mxu0 %v8738_v20 }
 0xf89   :  { %7533 = vmatpush3.msra.mxu0 %v870_v59 }
 0xf8a   :  { %7534 = vmatprep.subr.mxu0 %v8738_v20  ;;  %v9326_v57 = vpop.permute.xlu0 %3086 }
 0xf8b   :  { %7535 = vmatpush3.msra.mxu0 %v869_v40 }
 0xf8c   :  { %7549 = vmatprep.subr.mxu0 %v8738_v20 }
 0xf8e   :  { %v9332_v61 = vpop.permute.xlu0 %3258 }
 0xf92   :  { %v9344_v63 = vpop.permute.xlu0 %3430 }
0x1044   :  { %v2761_v43 = vpop.f32.mrf.mxu0 }
0x1045   :  { %v2762_v45 = vadd.f32 %v6973_v42, %v2761_v43 }
0x1046   :  { %v7516_v46 = vpop.f32.mrf.mxu0 }
0x1047   :  { %v2765_v47 = vmax.f32 %v2762_v45, 0.0 }
0x1049   :  { %v2766_v48 = vadd.f32 %v2765_v47, %v2685_v33 }
0x104b   :  { %7537 = vmatmul.mubr.msk.f32.vlgmr.msra.gmra.mxu0 %vm645_vm3, %v2766_v48 }
0x104c   :  { %7551 = vmatprep.mubr.msk.f32.mxu0 %vm8739_vm4, %v8738_v20 }
0x110b   :  { %v2915_v54 = vpop.f32.mrf.mxu0 }
0x110c   :  { %v9311_v55 = vadd.f32 %v6976_v53, %v2915_v54 }
0x110d   :  { %v7538_v56 = vpop.f32.mrf.mxu0 }
0x110e   :  { %3088 = vrot.lane.b32.xlu1 %v9311_v55, %s8749_s0  ;;  %7540 = vmatpush3.xpose.msk.msra.mxu1 %vm2000_vm14, %v9311_v55 }
0x110f   :  { %7544 = vmatprep.subr.mxu1 %v8738_v20 }
0x1111   :  { %7542 = vmatmul.mubr.msk.f32.vlgmr.msra.gmra.mxu1 %vm2000_vm14, %v9303_v51 }
0x1112   :  { %3260 = vrot.lane.b32.xlu1 %v9311_v55, %s8742_s27  ;;  %7546 = vmatprep.mubr.msk.f32.mxu1 %vm8739_vm4, %v8738_v20 }
0x1116   :  { %3432 = vrot.lane.b32.xlu1 %v9311_v55, %s8751_s18 }
0x1180   :  { %v3089_v58 = vpop.permute.xlu1 %3088 }
0x1181   :  { %7550 = vmatpush3.xpose.msk.msra.mxu0 %vm2000_vm14, %v3089_v58 }
0x1182   :  { %7559 = vmatprep.subr.mxu0 %v8738_v20 }
0x1184   :  { %v3261_v60 = vpop.permute.xlu1 %3260  ;;  %7552 = vmatmul.mubr.msk.f32.vlgmr.msra.gmra.mxu0 %vm2000_vm14, %v9326_v57 }
0x1185   :  { %7560 = vmatpush3.xpose.msk.msra.mxu0 %vm2000_vm14, %v3261_v60  ;;  %7561 = vmatprep.mubr.msk.f32.mxu0 %vm8739_vm4, %v8738_v20 }
0x1186   :  { %7569 = vmatprep.subr.mxu0 %v8738_v20 }
0x1188   :  { %v3433_v62 = vpop.permute.xlu1 %3432  ;;  %7562 = vmatmul.mubr.msk.f32.vlgmr.msra.gmra.mxu0 %vm2000_vm14, %v9332_v61 }
0x1189   :  { %7570 = vmatpush3.xpose.msk.msra.mxu0 %vm2000_vm14, %v3433_v62  ;;  %7571 = vmatprep.mubr.msk.f32.mxu0 %vm8739_vm4, %v8738_v20 }
0x118a   :  { %7579 = vmatprep.subr.mxu0 %v8738_v20 }
0x118c   :  { %7572 = vmatmul.mubr.msk.f32.vlgmr.msra.gmra.mxu0 %vm2000_vm14, %v9344_v63 }
0x118d   :  { %7587 = vmatprep.mubr.msk.f32.mxu0 %vm8739_vm4, %v8738_v20 }
0x11d1   :  { %v2991_v0 = vpop.f32.mrf.mxu1 }
0x11d2   :  { %v2995_v2 = vmul.f32 0.17677669, %v2991_v0 }
0x11d3   :  { %v7543_v3 = vpop.f32.mrf.mxu1 }
0x11d4   :  { %v2997_v6 = vsel %vm9818_vm6, %v2995_v2, -inf }
0x11d5   :  { %2998 = vmax.xlane.f32.xlu1 %v2997_v6 }
0x1244   :  { %v3160_v8 = vpop.f32.mrf.mxu0 }
0x1245   :  { %v3164_v10 = vmul.f32 0.17677669, %v3160_v8  ;;  %v877_v8 = vld [vmem:[#allocation35 + $0x18] sm:$0xff] }
0x1246   :  { %v7553_v11 = vpop.f32.mrf.mxu0  ;;  %7580 = vmatpush3.msra.mxu0 %v877_v8 }
0x1247   :  { %v3165_v12 = vsel %vm9818_vm6, %v3164_v10, -inf  ;;  %7581 = vmatprep.subr.mxu0 %v8738_v20  ;;  %v9388_v11 = vld [vmem:[#allocation35 + $0x8] sm:$0xff] }
0x1248   :  { %3166 = vmax.xlane.f32.xlu0 %v3165_v12  ;;  %v3332_v13 = vpop.f32.mrf.mxu0  ;;  %v9392_v12 = vld [vmem:[#allocation35] sm:$0xff] }
0x1249   :  { %v3336_v14 = vmul.f32 0.17677669, %v3332_v13 }
0x124a   :  { %v7563_v15 = vpop.f32.mrf.mxu0 }
0x124b   :  { %v3337_v16 = vsel %vm9818_vm6, %v3336_v14, -inf }
0x124c   :  { %3338 = vmax.xlane.f32.xlu0 %v3337_v16  ;;  %v3504_v17 = vpop.f32.mrf.mxu0 }
0x124d   :  { %v3508_v18 = vmul.f32 0.17677669, %v3504_v17 }
0x124e   :  { %v7573_v19 = vpop.f32.mrf.mxu0 }
0x124f   :  { %v3509_v21 = vsel %vm9818_vm6, %v3508_v18, -inf }
0x1250   :  { %3510 = vmax.xlane.f32.xlu1 %v3509_v21 }
0x125e   :  { %v2999_v22 = vpop.xlane.xlu1 %2998 }
0x125f   :  { %v3000_v23 = vsub.f32 %v2995_v2, %v2999_v22 }
0x1261   :  { %v3001_v24 = vmul.f32 1.442695, %v3000_v23  ;;  %3176 = vrot.lane.b32.xlu1 %v9311_v55, %s8748_s16 }
0x1263   :  { %7999 = vpow2.f32 %v3001_v24 }
0x1270   :  { %v8000_v25 = vpop.eup %7999 }
0x1271   :  { %v3003_v26 = vsel %vm9818_vm6, %v8000_v25, 0.0 }
0x1272   :  { %3004 = vadd.xlane.f32.xlu0 %v3003_v26 }
0x1288   :  { %3008 = vrot.lane.b32.xlu0 %v9311_v55, %s8741_s11 }
0x12d1   :  { %v3167_v27 = vpop.xlane.xlu0 %3166 }
0x12d2   :  { %v3168_v28 = vsub.f32 %v3164_v10, %v3167_v27  ;;  %v876_v10 = vld [vmem:[#allocation35 + $0x10] sm:$0xff] }
0x12d3   :  { %7582 = vmatpush3.msra.mxu0 %v876_v10  ;;  %v893_v10 = vld [vmem:[%s8919_s25] sm:$0x1] }
0x12d4   :  { %v3169_v29 = vmul.f32 1.442695, %v3168_v28  ;;  %7583 = vmatprep.subr.mxu0 %v8738_v20 }
0x12d5   :  { %v3339_v30 = vpop.xlane.xlu0 %3338  ;;  %7584 = vmatpush3.msra.mxu0 %v9388_v11 }
0x12d6   :  { %8001 = vpow2.f32 %v3169_v29  ;;  %v3340_v31 = vsub.f32 %v3336_v14, %v3339_v30  ;;  %7585 = vmatprep.subr.mxu0 %v8738_v20  ;;  %v882_v30 = vld [vmem:[#allocation38 + $0x18] sm:$0xff] }
0x12d7   :  { %7586 = vmatpush3.msra.mxu0 %v9392_v12 }
0x12d8   :  { %v3341_v32 = vmul.f32 1.442695, %v3340_v31  ;;  %7601 = vmatprep.subr.mxu0 %v8738_v20  ;;  %v881_v31 = vld [vmem:[#allocation38 + $0x10] sm:$0xff] }
0x12d9   :  { %v3511_v33 = vpop.xlane.xlu1 %3510 }
0x12da   :  { %8003 = vpow2.f32 %v3341_v32  ;;  %v3512_v34 = vsub.f32 %v3508_v18, %v3511_v33  ;;  %v880_v32 = vld [vmem:[#allocation38 + $0x8] sm:$0xff]  ;;  %v879_v33 = vld [vmem:[#allocation38] sm:$0xff] }
0x12dc   :  { %v3513_v36 = vmul.f32 1.442695, %v3512_v34  ;;  %v887_v34 = vld [vmem:[#allocation41 + $0x18] sm:$0xff] }
0x12dd   :  { %v3177_v49 = vpop.permute.xlu1 %3176 }
0x12de   :  { %8005 = vpow2.f32 %v3513_v36  ;;  %v886_v36 = vld [vmem:[#allocation41 + $0x10] sm:$0xff] }
0x12e3   :  { %v8002_v38 = vpop.eup %8001 }
0x12e4   :  { %v3171_v39 = vsel %vm9818_vm6, %v8002_v38, 0.0 }
0x12e5   :  { %3172 = vadd.xlane.f32.xlu1 %v3171_v39 }
0x12e7   :  { %v8004_v59 = vpop.eup %8003 }
0x12e8   :  { %v3343_v40 = vsel %vm9818_vm6, %v8004_v59, 0.0 }
0x12e9   :  { %3344 = vadd.xlane.f32.xlu0 %v3343_v40 }
0x12eb   :  { %v8006_v42 = vpop.eup %8005 }
0x12ec   :  { %v3515_v43 = vsel %vm9818_vm6, %v8006_v42, 0.0 }
0x12ed   :  { %3516 = vadd.xlane.f32.xlu1 %v3515_v43 }
0x12fb   :  { %v3005_v45 = vpop.xlane.xlu0 %3004 }
0x12fc   :  { %8007 = vrcp.f32 %v3005_v45  ;;  %v885_v45 = vld [vmem:[#allocation41 + $0x8] sm:$0xff] }
0x12fe   :  { %3348 = vrot.lane.b32.xlu1 %v9311_v55, %s8743_s17 }
0x12ff   :  { %3520 = vrot.lane.b32.xlu0 %v9311_v55, %s8750_s14  ;;  %v3009_v46 = vpop.permute.xlu0 %3008 }
0x1300   :  { %7545 = vmatpush3.msk.msra.mxu1 %vm471_vm0, %v3009_v46  ;;  %v884_v46 = vld [vmem:[#allocation41] sm:$0xff] }
0x1301   :  { %7554 = vmatprep.subr.mxu1 %v8738_v20 }
0x1309   :  { %v8008_v47 = vpop.eup %8007 }
0x130a   :  { %v3007_v48 = vmul.f32 %v8008_v47, %v8000_v25  ;;  %v892_v47 = vld [vmem:[%s9852_s29 + $0x18] sm:$0xff] }
0x130c   :  { %7547 = vmatmul.mubr.msk.f32.vlgmr.msra.gmra.mxu1 %vm464_vm1, %v3007_v48  ;;  %v891_v48 = vld [vmem:[%s9852_s29 + $0x10] sm:$0xff] }
0x130d   :  { %7555 = vmatpush3.msk.msra.mxu1 %vm471_vm0, %v3177_v49  ;;  %7556 = vmatprep.mubr.msk.f32.mxu1 %vm8739_vm4, %v8738_v20  ;;  %v883_v49 = vld [vmem:[#allocation39] sm:$0x1] }
0x130e   :  { %7564 = vmatprep.subr.mxu1 %v8738_v20 }
0x136e   :  { %v3173_v50 = vpop.xlane.xlu1 %3172 }
0x136f   :  { %8009 = vrcp.f32 %v3173_v50 }
0x1372   :  { %v3345_v52 = vpop.xlane.xlu0 %3344 }
0x1373   :  { %8011 = vrcp.f32 %v3345_v52 }
0x1376   :  { %v3517_v53 = vpop.xlane.xlu1 %3516  ;;  %v3521_v62 = vpop.permute.xlu0 %3520 }
0x1377   :  { %8013 = vrcp.f32 %v3517_v53 }
0x137a   :  { %v3349_v56 = vpop.permute.xlu1 %3348 }
0x137c   :  { %v8010_v54 = vpop.eup %8009 }
0x137d   :  { %v3175_v55 = vmul.f32 %v8010_v54, %v8002_v38  ;;  %v878_v38 = vld [vmem:[#allocation36] sm:$0x1] }
0x137e   :  { %v890_v54 = vld [vmem:[%s9852_s29 + $0x8] sm:$0xff] }
0x137f   :  { %7557 = vmatmul.mubr.msk.f32.vlgmr.msra.gmra.mxu1 %vm464_vm1, %v3175_v55  ;;  %v889_v55 = vld [vmem:[%s9852_s29] sm:$0xff] }
0x1380   :  { %v8012_v58 = vpop.eup %8011  ;;  %7565 = vmatpush3.msk.msra.mxu1 %vm471_vm0, %v3349_v56  ;;  %7566 = vmatprep.mubr.msk.f32.mxu1 %vm8739_vm4, %v8738_v20  ;;  %v3989_v56 = vstv %s6999_s26 }
0x1381   :  { %7574 = vmatprep.subr.mxu1 %v8738_v20  ;;  %v3347_v60 = vmul.f32 %v8012_v58, %v8004_v59  ;;  %v3990_v58 = vadd.s32 %v3989_v56, %v9032_v35  ;;  %v8085_v56 = vld [vmem:[#allocation20 + $0x10] sm:$0xff] }
0x1383   :  { %7567 = vmatmul.mubr.msk.f32.vlgmr.msra.gmra.mxu1 %vm464_vm1, %v3347_v60  ;;  %v3992_v60 = vstv %s9431_s6  ;;  %vm3991_vm7 = vcmp.eq.s32.totalorder %v9034_v37, %v3990_v58  ;;  %v8086_v58 = vld [vmem:[#allocation20 + $0x8] sm:$0xff] }
0x1384   :  { %v8014_v0 = vpop.eup %8013  ;;  %7575 = vmatpush3.msk.msra.mxu1 %vm471_vm0, %v3521_v62  ;;  %7576 = vmatprep.mubr.msk.f32.mxu1 %vm8739_vm4, %v8738_v20  ;;  %v888_v62 = vld [vmem:[#allocation42] sm:$0x1]  ;;  %vm3993_vm9 = vcmp.lt.s32.totalorder %v9032_v35, %v3992_v60  ;;  %v895_v35 = vld [vmem:[%s8924_s13 + $0x8] sm:$0xff] }
0x1385   :  { %v3519_v2 = vmul.f32 %v8014_v0, %v8006_v42  ;;  %7590 = vmatprep.subr.mxu1 %v8738_v20  ;;  %vm3994_vm6 = vmand %vm3991_vm7, %vm3993_vm9 }
0x1386   :  { %v3995_v8 = vsel %vm3994_vm6, 1.0, %v8738_v20  ;;  %vm4069_vm6 = vcmp.lt.s32.totalorder %v9034_v37, %v3992_v60  ;;  %v8087_v60 = vld [vmem:[#allocation20] sm:$0xff] }
0x1387   :  { %7577 = vmatmul.mubr.msk.f32.vlgmr.msra.gmra.mxu1 %vm464_vm1, %v3519_v2 }
0x1388   :  { %7598 = vmatprep.mubr.msk.f32.mxu1 %vm8739_vm4, %v8738_v20  ;;  %7591 = vmatpush3.msra.mxu1 %v882_v30  ;;  %v8079_v30 = vld [vmem:[#allocation18] ss:$0 sm:$0xff] }
0x1389   :  { %7592 = vmatprep.subr.mxu1 %v8738_v20 }
0x138a   :  { %7593 = vmatpush3.msra.mxu1 %v881_v31 }
0x138b   :  { %7594 = vmatprep.subr.mxu1 %v8738_v20 }
0x138c   :  { %7595 = vmatpush3.msra.mxu1 %v880_v32 }
0x138d   :  { %7596 = vmatprep.subr.mxu1 %v8738_v20 }
0x138e   :  { %7597 = vmatpush3.msra.mxu1 %v879_v33 }
0x138f   :  { %7612 = vmatprep.subr.mxu1 %v8738_v20 }
0x13cc   :  { %v3081_v3 = vpop.f32.mrf.mxu1 }
0x13cd   :  { %v3085_v24 = vadd.f32 %v3081_v3, %v9303_v51 }
0x13ce   :  { %v7548_v6 = vpop.f32.mrf.mxu1 }
0x143f   :  { %v3249_v13 = vpop.f32.mrf.mxu1 }
0x1440   :  { %3254 = vrot.lane.b32.xlu1 %v3249_v13, %s8725_s2 }
0x1441   :  { %v7558_v14 = vpop.f32.mrf.mxu1 }
0x1443   :  { %v3421_v15 = vpop.f32.mrf.mxu1 }
0x1444   :  { %3426 = vrot.lane.b32.xlu0 %v3421_v15, %s8746_s15 }
0x1445   :  { %v7568_v16 = vpop.f32.mrf.mxu1 }
0x1447   :  { %v3593_v17 = vpop.f32.mrf.mxu1 }
0x1448   :  { %3598 = vrot.lane.b32.xlu1 %v3593_v17, %s8754_s19  ;;  %v8071_v17 = vld [vmem:[#allocation17 + $0x38] sm:$0xff] }
0x1449   :  { %v7578_v18 = vpop.f32.mrf.mxu1 }
0x14b2   :  { %v3255_v19 = vpop.permute.xlu1 %3254 }
0x14b3   :  { %v3257_v22 = vadd.f32 %v3255_v19, %v9303_v51  ;;  %v8072_v19 = vld [vmem:[#allocation17 + $0x30] sm:$0xff] }
0x14b5   :  { %v3602_v26 = vsel %vm2000_vm14, %v3085_v24, %v3257_v22  ;;  %v8074_v22 = vld [vmem:[#allocation17 + $0x20] sm:$0xff]  ;;  %v8076_v24 = vld [vmem:[#allocation17 + $0x10] sm:$0xff] }
0x14b6   :  { %v3427_v21 = vpop.permute.xlu0 %3426 }
0x14b7   :  { %v3429_v23 = vadd.f32 %v3427_v21, %v9303_v51  ;;  %v8073_v21 = vld [vmem:[#allocation17 + $0x28] sm:$0xff] }
0x14b9   :  { %v3603_v28 = vsel %vm557_vm2, %v3602_v26, %v3429_v23  ;;  %v8075_v23 = vld [vmem:[#allocation17 + $0x18] sm:$0xff]  ;;  %v8078_v26 = vld [vmem:[#allocation17] sm:$0xff] }
0x14ba   :  { %v3599_v25 = vpop.permute.xlu1 %3598 }
0x14bb   :  { %v3601_v27 = vadd.f32 %v3599_v25, %v9303_v51  ;;  %v8077_v25 = vld [vmem:[#allocation17 + $0x8] sm:$0xff] }
0x14bd   :  { %v3604_v29 = vsel %vm2684_vm5, %v3603_v28, %v3601_v27 }
0x14be   :  { %7588 = vmatmul.mubr.msk.f32.vlgmr.msra.gmra.mxu0 %vm645_vm3, %v3604_v29 }
0x14bf   :  { %7609 = vmatprep.mubr.msk.f32.mxu0 %vm8739_vm4, %v8738_v20  ;;  %7602 = vmatpush3.msra.mxu0 %v887_v34  ;;  %v9484_v34 = vsel %vm4069_vm6, 0.0, %v8744_v9 }
0x14c0   :  { %7603 = vmatprep.subr.mxu0 %v8738_v20 }
0x14c1   :  { %7604 = vmatpush3.msra.mxu0 %v886_v36 }
0x14c2   :  { %7605 = vmatprep.subr.mxu0 %v8738_v20 }
0x14c3   :  { %7606 = vmatpush3.msra.mxu0 %v885_v45 }
0x14c4   :  { %7607 = vmatprep.subr.mxu0 %v8738_v20 }
0x14c5   :  { %7608 = vmatpush3.msra.mxu0 %v884_v46 }
0x14c6   :  { %7623 = vmatprep.subr.mxu0 %v8738_v20 }
0x157e   :  { %v3674_v39 = vpop.f32.mrf.mxu0 }
0x157f   :  { %v3675_v59 = vadd.f32 %v3674_v39, %v878_v38 }
0x1580   :  { %v7589_v40 = vpop.f32.mrf.mxu0 }
0x1581   :  { %v3678_v42 = vmax.f32 %v3675_v59, 0.0 }
0x1583   :  { %v3679_v43 = vadd.f32 %v3678_v42, %v3604_v29 }
0x1585   :  { %7599 = vmatmul.mubr.msk.f32.vlgmr.msra.gmra.mxu1 %vm645_vm3, %v3679_v43 }
0x1586   :  { %7620 = vmatprep.mubr.msk.f32.mxu1 %vm8739_vm4, %v8738_v20  ;;  %7613 = vmatpush3.msra.mxu1 %v892_v47 }
0x1587   :  { %7614 = vmatprep.subr.mxu1 %v8738_v20 }
0x1588   :  { %7615 = vmatpush3.msra.mxu1 %v891_v48 }
0x1589   :  { %7616 = vmatprep.subr.mxu1 %v8738_v20 }
0x158a   :  { %7617 = vmatpush3.msra.mxu1 %v890_v54  ;;  %v8082_v54 = vld [vmem:[#allocation20 + $0x28] sm:$0xff] }
0x158b   :  { %7618 = vmatprep.subr.mxu1 %v8738_v20 }
0x158c   :  { %7619 = vmatpush3.msra.mxu1 %v889_v55  ;;  %v8084_v55 = vld [vmem:[#allocation20 + $0x18] sm:$0xff] }
0x158d   :  { %7630 = vmatprep.subr.mxu1 %v8738_v20 }
0x1645   :  { %v3749_v50 = vpop.f32.mrf.mxu1 }
0x1646   :  { %v3750_v52 = vadd.f32 %v3749_v50, %v883_v49 }
0x1647   :  { %v7600_v53 = vpop.f32.mrf.mxu1 }
0x1648   :  { %7610 = vmatmul.mubr.msk.f32.vlgmr.msra.gmra.mxu0 %vm645_vm3, %v3750_v52  ;;  %v8081_v53 = vld [vmem:[#allocation20 + $0x30] sm:$0xff] }
0x1649   :  { %7627 = vmatprep.mubr.msk.f32.mxu0 %vm8739_vm4, %v8738_v20  ;;  %7624 = vmatpush3.msra.mxu0 %v895_v35 }
0x164a   :  { %7625 = vmatprep.subr.mxu0 %v8738_v20 }
0x1708   :  { %v3822_v0 = vpop.f32.mrf.mxu0 }
0x1709   :  { %v3823_v2 = vadd.f32 %v3822_v0, %v888_v62 }
0x170a   :  { %v7611_v3 = vpop.f32.mrf.mxu0 }
0x170b   :  { %v3826_v6 = vmax.f32 %v3823_v2, 0.0 }
0x170d   :  { %7621 = vmatmul.mubr.msk.f32.vlgmr.msra.gmra.mxu1 %vm645_vm3, %v3826_v6 }
0x170e   :  { %7631 = vmatpush3.msra.mxu1 %v9043_v41  ;;  %7634 = vmatprep.mubr.msk.f32.mxu1 %vm8739_vm4, %v8738_v20  ;;  %v894_v41 = vld [vmem:[%s8924_s13] sm:$0xff] }
0x170f   :  { %7632 = vmatprep.subr.mxu1 %v8738_v20  ;;  %7626 = vmatpush3.msra.mxu0 %v894_v41 }
0x1710   :  { %7633 = vmatpush3.msra.mxu1 %v9051_v44  ;;  %7637 = vmatprep.subr.mxu0 %v8738_v20 }
0x1711   :  { %7635 = vmatmul.mubr.msk.f32.vlgmr.msra.gmra.mxu1 %vm557_vm2, %v3995_v8  ;;  %7656 = vmatprep.subr.mxu1 %v8738_v20 }
0x1712   :  { %7658 = vmatprep.mubr.msk.f32.mxu1 %vm8739_vm4, %v8738_v20 }
0x17cd   :  { %v3896_v13 = vpop.f32.mrf.mxu1 }
0x17ce   :  { %v3897_v14 = vadd.f32 %v3896_v13, %v893_v10 }
0x17cf   :  { %v7622_v15 = vpop.f32.mrf.mxu1 }
0x17d0   :  { %v3900_v44 = vmax.f32 %v3897_v14, 0.0 }
0x17d1   :  { %v4065_v16 = vpop.f32.mrf.mxu1 }
0x17d2   :  { %7628 = vmatmul.mubr.msk.f32.vlgmr.msra.gmra.mxu0 %vm557_vm2, %v3900_v44 }
0x17d3   :  { %7638 = vmatpush3.msra.mxu0 %v8071_v17  ;;  %v7636_v18 = vpop.f32.mrf.mxu1  ;;  %7653 = vmatprep.mubr.msk.f32.mxu0 %vm8739_vm4, %v8738_v20 }
0x17d4   :  { %7639 = vmatprep.subr.mxu0 %v8738_v20 }
0x17d5   :  { %7640 = vmatpush3.msra.mxu0 %v8072_v19 }
0x17d6   :  { %7641 = vmatprep.subr.mxu0 %v8738_v20 }
0x17d7   :  { %7642 = vmatpush3.msra.mxu0 %v8073_v21 }
0x17d8   :  { %7643 = vmatprep.subr.mxu0 %v8738_v20 }
0x17d9   :  { %7644 = vmatpush3.msra.mxu0 %v8074_v22 }
0x17da   :  { %7645 = vmatprep.subr.mxu0 %v8738_v20 }
0x17db   :  { %7646 = vmatpush3.msra.mxu0 %v8075_v23 }
0x17dc   :  { %7647 = vmatprep.subr.mxu0 %v8738_v20 }
0x17dd   :  { %7648 = vmatpush3.msra.mxu0 %v8076_v24 }
0x17de   :  { %7649 = vmatprep.subr.mxu0 %v8738_v20 }
0x17df   :  { %7650 = vmatpush3.msra.mxu0 %v8077_v25 }
0x17e0   :  { %7651 = vmatprep.subr.mxu0 %v8738_v20 }
0x17e1   :  { %7652 = vmatpush3.msra.mxu0 %v8078_v26 }
0x17e2   :  { %7654 = vmatmul.mubr.msk.f32.vlgmr.msra.gmra.mxu0 %vm991_vm8, %v4065_v16  ;;  %7676 = vmatprep.subr.mxu0 %v8738_v20 }
0x17e3   :  { %7678 = vmatprep.mubr.msk.f32.mxu0 %vm8739_vm4, %v8738_v20 }
0x1892   :  { %v9469_v27 = vpop.f32.mrf.mxu0 }
0x1894   :  { %v7629_v28 = vpop.f32.mrf.mxu0 }
0x18a2   :  { %v4140_v29 = vpop.f32.mrf.mxu0 }
0x18a3   :  { %v9471_v31 = vadd.f32 %v8079_v30, %v4140_v29 }
0x18a4   :  { %v7655_v32 = vpop.f32.mrf.mxu0 }
0x18a5   :  { %7657 = vmatpush3.xpose.msk.msra.mxu1 %vm557_vm2, %v9471_v31 }
0x18a6   :  { %7661 = vmatprep.subr.mxu1 %v8738_v20 }
0x18a8   :  { %7659 = vmatmul.mubr.msk.f32.vlgmr.msra.gmra.mxu1 %vm557_vm2, %v9078_v1 }
0x18a9   :  { %7663 = vmatprep.mubr.msk.f32.mxu1 %vm8739_vm4, %v8738_v20 }
0x1968   :  { %v4213_v33 = vpop.f32.mrf.mxu1 }
0x1969   :  { %v4217_v36 = vmul.f32 0.125, %v4213_v33 }
0x196a   :  { %v7660_v38 = vpop.f32.mrf.mxu1 }
0x196b   :  { %v4218_v39 = vadd.f32 %v4217_v36, %v9484_v34 }
0x196d   :  { %v4219_v59 = vsel %vm1222_vm10, %v4218_v39, -inf }
0x196e   :  { %4220 = vmax.xlane.f32.xlu0 %v4219_v59 }
0x1984   :  { %4230 = vrot.lane.b32.xlu0 %v9471_v31, %s8745_s21 }
0x1988   :  { %4477 = vrot.lane.b32.xlu0 %v9471_v31, %s8741_s11 }
0x19f7   :  { %v4221_v40 = vpop.xlane.xlu0 %4220 }
0x19f8   :  { %v4222_v42 = vsub.f32 %v4218_v39, %v4221_v40 }
0x19fa   :  { %v4223_v37 = vmul.f32 1.442695, %v4222_v42 }
0x19fb   :  { %v4231_v43 = vpop.permute.xlu0 %4230 }
0x19fc   :  { %8015 = vpow2.f32 %v4223_v37  ;;  %7662 = vmatpush3.msk.msra.mxu1 %vm1240_vm11, %v4231_v43 }
0x19fd   :  { %7666 = vmatprep.subr.mxu1 %v8738_v20 }
0x19ff   :  { %v4478_v9 = vpop.permute.xlu0 %4477 }
0x1a00   :  { %7677 = vmatpush3.xpose.msk.msra.mxu0 %vm557_vm2, %v4478_v9 }
0x1a01   :  { %7686 = vmatprep.subr.mxu0 %v8738_v20 }
0x1a03   :  { %7679 = vmatmul.mubr.msk.f32.vlgmr.msra.gmra.mxu0 %vm557_vm2, %v9109_v5  ;;  %v8080_v5 = vld [vmem:[#allocation20 + $0x38] sm:$0xff] }
0x1a04   :  { %7688 = vmatprep.mubr.msk.f32.mxu0 %vm8739_vm4, %v8738_v20 }
0x1a09   :  { %v8016_v45 = vpop.eup %8015 }
0x1a0a   :  { %v4225_v46 = vsel %vm1222_vm10, %v8016_v45, 0.0 }
0x1a0b   :  { %4226 = vadd.xlane.f32.xlu1 %v4225_v46 }
0x1a1c   :  { %4308 = vrot.lane.b32.xlu1 %v9471_v31, %s8742_s27 }
0x1a20   :  { %4646 = vrot.lane.b32.xlu1 %v9471_v31, %s8743_s17 }
0x1a94   :  { %v4227_v47 = vpop.xlane.xlu1 %4226 }
0x1a95   :  { %8017 = vrcp.f32 %v4227_v47 }
0x1a98   :  { %v4309_v48 = vpop.permute.xlu1 %4308 }
0x1a9c   :  { %v4647_v49 = vpop.permute.xlu1 %4646 }
0x1a9d   :  { %7687 = vmatpush3.xpose.msk.msra.mxu0 %vm557_vm2, %v4647_v49  ;;  %v8088_v49 = vld [vmem:[#allocation23 + $0x38] sm:$0xff] }
0x1a9e   :  { %7696 = vmatprep.subr.mxu0 %v8738_v20 }
0x1aa0   :  { %7689 = vmatmul.mubr.msk.f32.vlgmr.msra.gmra.mxu0 %vm557_vm2, %v9117_v7  ;;  %v8083_v7 = vld [vmem:[#allocation20 + $0x20] sm:$0xff] }
0x1aa1   :  { %7697 = vmatpush3.msra.mxu0 %v8080_v5  ;;  %7712 = vmatprep.mubr.msk.f32.mxu0 %vm8739_vm4, %v8738_v20  ;;  %v8089_v5 = vld [vmem:[#allocation23 + $0x30] sm:$0xff] }
0x1aa2   :  { %v8018_v50 = vpop.eup %8017  ;;  %7698 = vmatprep.subr.mxu0 %v8738_v20 }
0x1aa3   :  { %v4229_v52 = vmul.f32 %v8018_v50, %v8016_v45  ;;  %7699 = vmatpush3.msra.mxu0 %v8081_v53  ;;  %v8090_v50 = vld [vmem:[#allocation23 + $0x28] sm:$0xff]  ;;  %v8092_v53 = vld [vmem:[#allocation23 + $0x18] sm:$0xff] }
0x1aa4   :  { %7700 = vmatprep.subr.mxu0 %v8738_v20 }
0x1aa5   :  { %7664 = vmatmul.mubr.msk.f32.vlgmr.msra.gmra.mxu1 %vm1236_vm12, %v4229_v52  ;;  %7701 = vmatpush3.msra.mxu0 %v8082_v54  ;;  %v8091_v52 = vld [vmem:[#allocation23 + $0x20] sm:$0xff]  ;;  %v8093_v54 = vld [vmem:[#allocation23 + $0x10] sm:$0xff] }
0x1aa6   :  { %7667 = vmatpush3.xpose.msk.msra.mxu1 %vm557_vm2, %v4309_v48  ;;  %7668 = vmatprep.mubr.msk.f32.mxu1 %vm8739_vm4, %v8738_v20 }
0x1aa7   :  { %7671 = vmatprep.subr.mxu1 %v8738_v20  ;;  %7702 = vmatprep.subr.mxu0 %v8738_v20 }
0x1aa8   :  { %7703 = vmatpush3.msra.mxu0 %v8083_v7  ;;  %v8094_v7 = vld [vmem:[#allocation23 + $0x8] sm:$0xff] }
0x1aa9   :  { %7669 = vmatmul.mubr.msk.f32.vlgmr.msra.gmra.mxu1 %vm557_vm2, %v9101_v4  ;;  %7704 = vmatprep.subr.mxu0 %v8738_v20 }
0x1aaa   :  { %7673 = vmatprep.mubr.msk.f32.mxu1 %vm8739_vm4, %v8738_v20  ;;  %7705 = vmatpush3.msra.mxu0 %v8084_v55  ;;  %v8095_v55 = vld [vmem:[#allocation23] sm:$0xff] }
0x1aab   :  { %7706 = vmatprep.subr.mxu0 %v8738_v20 }
0x1aac   :  { %7707 = vmatpush3.msra.mxu0 %v8085_v56 }
0x1aad   :  { %7708 = vmatprep.subr.mxu0 %v8738_v20 }
0x1aae   :  { %7709 = vmatpush3.msra.mxu0 %v8086_v58 }
0x1aaf   :  { %7710 = vmatprep.subr.mxu0 %v8738_v20 }
0x1ab0   :  { %7711 = vmatpush3.msra.mxu0 %v8087_v60 }
0x1ab1   :  { %7734 = vmatprep.subr.mxu0 %v8738_v20 }
0x1ac3   :  { %v4547_v4 = vpop.f32.mrf.mxu0 }
0x1ac4   :  { %v4551_v62 = vmul.f32 0.125, %v4547_v4 }
0x1ac5   :  { %v7680_v0 = vpop.f32.mrf.mxu0 }
0x1ac6   :  { %v4552_v2 = vadd.f32 %v4551_v62, %v9484_v34 }
0x1ac8   :  { %v4553_v3 = vsel %vm1222_vm10, %v4552_v2, -inf }
0x1ac9   :  { %4554 = vmax.xlane.f32.xlu1 %v4553_v3 }
0x1b52   :  { %v4555_v6 = vpop.xlane.xlu1 %4554 }
0x1b53   :  { %v4556_v8 = vsub.f32 %v4552_v2, %v4555_v6 }
0x1b55   :  { %v4557_v35 = vmul.f32 1.442695, %v4556_v8 }
0x1b57   :  { %8019 = vpow2.f32 %v4557_v35 }
0x1b60   :  { %v4716_v41 = vpop.f32.mrf.mxu0 }
0x1b61   :  { %v4720_v17 = vmul.f32 0.125, %v4716_v41 }
0x1b62   :  { %v7690_v10 = vpop.f32.mrf.mxu0 }
0x1b63   :  { %v4721_v23 = vadd.f32 %v4720_v17, %v9484_v34  ;;  %v8096_v17 = vld [vmem:[#allocation21] ss:$0 sm:$0xff] }
0x1b64   :  { %v8020_v13 = vpop.eup %8019 }
0x1b65   :  { %v9530_v14 = vpop.f32.mrf.mxu1  ;;  %v4559_v15 = vsel %vm1222_vm10, %v8020_v13, 0.0  ;;  %v4722_v24 = vsel %vm1222_vm10, %v4721_v23, -inf }
0x1b66   :  { %4560 = vadd.xlane.f32.xlu1 %v4559_v15  ;;  %v4307_v35 = vadd.f32 %v9530_v14, %v9078_v1 }
0x1b67   :  { %v7665_v44 = vpop.f32.mrf.mxu1 }
0x1b69   :  { %v4378_v16 = vpop.f32.mrf.mxu1 }
0x1b6a   :  { %v4382_v18 = vmul.f32 0.125, %v4378_v16 }
0x1b6b   :  { %v7670_v19 = vpop.f32.mrf.mxu1 }
0x1b6c   :  { %v4383_v21 = vadd.f32 %v4382_v18, %v9484_v34 }
0x1b6e   :  { %v4384_v22 = vsel %vm1222_vm10, %v4383_v21, -inf }
0x1b6f   :  { %4385 = vmax.xlane.f32.xlu0 %v4384_v22  ;;  %v8097_v22 = vld [vmem:[#allocation24] ss:$0 sm:$0xff] }
0x1b73   :  { %4723 = vmax.xlane.f32.xlu0 %v4722_v24 }
0x1b77   :  { %4395 = vrot.lane.b32.xlu1 %v9471_v31, %s8747_s3 }
0x1b7b   :  { %4733 = vrot.lane.b32.xlu1 %v9471_v31, %s8746_s15 }
0x1bef   :  { %v4561_v25 = vpop.xlane.xlu1 %4560 }
0x1bf3   :  { %v4396_v26 = vpop.permute.xlu1 %4395 }
0x1bf4   :  { %7672 = vmatpush3.msk.msra.mxu1 %vm1240_vm11, %v4396_v26 }
0x1bf5   :  { %7681 = vmatprep.subr.mxu1 %v8738_v20 }
0x1bf7   :  { %v4734_v47 = vpop.permute.xlu1 %4733 }
0x1bf8   :  { %v4386_v28 = vpop.xlane.xlu0 %4385 }
0x1bf9   :  { %v4387_v29 = vsub.f32 %v4383_v21, %v4386_v28 }
0x1bfb   :  { %v4388_v33 = vmul.f32 1.442695, %v4387_v29 }
0x1bfc   :  { %v4724_v30 = vpop.xlane.xlu0 %4723 }
0x1bfd   :  { %v4725_v32 = vsub.f32 %v4721_v23, %v4724_v30 }
0x1bff   :  { %v4726_v34 = vmul.f32 1.442695, %v4725_v32 }
0x1c01   :  { %8021 = vpow2.f32 %v4726_v34  ;;  %v8098_v34 = vld [vmem:[#allocation26 + $0x18] sm:$0xff] }
0x1c02   :  { %8023 = vpow2.f32 %v4388_v33 }
0x1c0e   :  { %v8022_v36 = vpop.eup %8021 }
0x1c0f   :  { %v4728_v38 = vsel %vm1222_vm10, %v8022_v36, 0.0  ;;  %v8024_v39 = vpop.eup %8023 }
0x1c10   :  { %4729 = vadd.xlane.f32.xlu0 %v4728_v38  ;;  %v4390_v59 = vsel %vm1222_vm10, %v8024_v39, 0.0  ;;  %v8100_v38 = vld [vmem:[#allocation26 + $0x8] sm:$0xff] }
0x1c14   :  { %4391 = vadd.xlane.f32.xlu0 %v4390_v59 }
0x1c2a   :  { %4564 = vrot.lane.b32.xlu0 %v9471_v31, %s8740_s7 }
0x1c99   :  { %v4730_v40 = vpop.xlane.xlu0 %4729 }
0x1c9d   :  { %v4392_v42 = vpop.xlane.xlu0 %4391 }
0x1c9e   :  { %8025 = vrcp.f32 %v4392_v42 }
0x1c9f   :  { %8027 = vrcp.f32 %v4561_v25 }
0x1ca0   :  { %8029 = vrcp.f32 %v4730_v40 }
0x1ca1   :  { %v4565_v45 = vpop.permute.xlu0 %4564 }
0x1cab   :  { %v8026_v37 = vpop.eup %8025 }
0x1cac   :  { %v4394_v43 = vmul.f32 %v8026_v37, %v8024_v39  ;;  %v8028_v9 = vpop.eup %8027  ;;  %v8101_v39 = vld [vmem:[#allocation26] sm:$0xff] }
0x1cad   :  { %v4563_v46 = vmul.f32 %v8028_v9, %v8020_v13  ;;  %v8030_v31 = vpop.eup %8029 }
0x1cae   :  { %7674 = vmatmul.mubr.msk.f32.vlgmr.msra.gmra.mxu1 %vm1236_vm12, %v4394_v43  ;;  %v4732_v48 = vmul.f32 %v8030_v31, %v8022_v36  ;;  %v8099_v36 = vld [vmem:[#allocation26 + $0x10] sm:$0xff] }
0x1caf   :  { %7682 = vmatpush3.msk.msra.mxu1 %vm1240_vm11, %v4565_v45  ;;  %7683 = vmatprep.mubr.msk.f32.mxu1 %vm8739_vm4, %v8738_v20 }
0x1cb0   :  { %7691 = vmatprep.subr.mxu1 %v8738_v20 }
0x1cb2   :  { %7684 = vmatmul.mubr.msk.f32.vlgmr.msra.gmra.mxu1 %vm1236_vm12, %v4563_v46 }
0x1cb3   :  { %7692 = vmatpush3.msk.msra.mxu1 %vm1240_vm11, %v4734_v47  ;;  %7693 = vmatprep.mubr.msk.f32.mxu1 %vm8739_vm4, %v8738_v20 }
0x1cb4   :  { %7715 = vmatprep.subr.mxu1 %v8738_v20 }
0x1cb6   :  { %7694 = vmatmul.mubr.msk.f32.vlgmr.msra.gmra.mxu1 %vm1236_vm12, %v4732_v48 }
0x1cb7   :  { %7716 = vmatpush3.msra.mxu1 %v8088_v49  ;;  %7731 = vmatprep.mubr.msk.f32.mxu1 %vm8739_vm4, %v8738_v20 }
0x1cb8   :  { %7717 = vmatprep.subr.mxu1 %v8738_v20 }
0x1cb9   :  { %7718 = vmatpush3.msra.mxu1 %v8089_v5 }
0x1cba   :  { %7719 = vmatprep.subr.mxu1 %v8738_v20 }
0x1cbb   :  { %7720 = vmatpush3.msra.mxu1 %v8090_v50 }
0x1cbc   :  { %7721 = vmatprep.subr.mxu1 %v8738_v20 }
0x1cbd   :  { %7722 = vmatpush3.msra.mxu1 %v8091_v52 }
0x1cbe   :  { %7723 = vmatprep.subr.mxu1 %v8738_v20 }
0x1cbf   :  { %7724 = vmatpush3.msra.mxu1 %v8092_v53 }
0x1cc0   :  { %7725 = vmatprep.subr.mxu1 %v8738_v20 }
0x1cc1   :  { %7726 = vmatpush3.msra.mxu1 %v8093_v54 }
0x1cc2   :  { %7727 = vmatprep.subr.mxu1 %v8738_v20 }
0x1cc3   :  { %7728 = vmatpush3.msra.mxu1 %v8094_v7 }
0x1cc4   :  { %7729 = vmatprep.subr.mxu1 %v8738_v20 }
0x1cc5   :  { %7730 = vmatpush3.msra.mxu1 %v8095_v55 }
0x1cc6   :  { %7739 = vmatprep.subr.mxu1 %v8738_v20 }
0x1d6e   :  { %v4468_v56 = vpop.f32.mrf.mxu1 }
0x1d6f   :  { %4473 = vrot.lane.b32.xlu1 %v4468_v56, %s8746_s15 }
0x1d70   :  { %v7675_v58 = vpop.f32.mrf.mxu1 }
0x1d72   :  { %v4637_v60 = vpop.f32.mrf.mxu1 }
0x1d73   :  { %4642 = vrot.lane.b32.xlu0 %v4637_v60, %s8740_s7 }
0x1d74   :  { %v7685_v4 = vpop.f32.mrf.mxu1 }
0x1d76   :  { %v4806_v62 = vpop.f32.mrf.mxu1 }
0x1d77   :  { %4811 = vrot.lane.b32.xlu1 %v4806_v62, %s8747_s3 }
0x1d78   :  { %v7695_v0 = vpop.f32.mrf.mxu1 }
0x1de1   :  { %v4474_v2 = vpop.permute.xlu1 %4473 }
0x1de2   :  { %v4476_v6 = vadd.f32 %v4474_v2, %v9078_v1 }
0x1de4   :  { %v4815_v10 = vsel %vm557_vm2, %v4307_v35, %v4476_v6 }
0x1de5   :  { %v4643_v3 = vpop.permute.xlu0 %4642 }
0x1de6   :  { %v4645_v8 = vadd.f32 %v4643_v3, %v9078_v1 }
0x1de8   :  { %v4816_v15 = vsel %vm645_vm3, %v4815_v10, %v4645_v8 }
0x1de9   :  { %v4812_v41 = vpop.permute.xlu1 %4811 }
0x1dea   :  { %v4814_v13 = vadd.f32 %v4812_v41, %v9078_v1 }
0x1dec   :  { %v4817_v44 = vsel %vm1835_vm13, %v4816_v15, %v4814_v13 }
0x1ded   :  { %7713 = vmatmul.mubr.msk.f32.vlgmr.msra.gmra.mxu0 %vm991_vm8, %v4817_v44 }
0x1dee   :  { %7736 = vmatprep.mubr.msk.f32.mxu0 %vm8739_vm4, %v8738_v20 }
0x1ead   :  { %v4887_v16 = vpop.f32.mrf.mxu0 }
0x1eae   :  { %v4888_v18 = vadd.f32 %v8096_v17, %v4887_v16 }
0x1eaf   :  { %v7714_v19 = vpop.f32.mrf.mxu0 }
0x1eb0   :  { %v4891_v21 = vmax.f32 %v4888_v18, 0.0 }
0x1eb2   :  { %v4892_v14 = vadd.f32 %v4891_v21, %v4817_v44 }
0x1eb4   :  { %7732 = vmatmul.mubr.msk.f32.vlgmr.msra.gmra.mxu1 %vm991_vm8, %v4892_v14  ;;  %vm9853_vm8 = vcmask 24576  }
0x1eb5   :  { %7741 = vmatprep.mubr.msk.f32.mxu1 %vm8739_vm4, %v8738_v20  ;;  %vm9854_vm10 = vmmov %vm9853_vm8 }
0x1eb6   :  { %vm9855_vm11 = vmmov %vm9853_vm8 }
0x1eb7   :  { %vm9856_vm12 = vmmov %vm9853_vm8 }
0x1eb8   :  { %vm9857_vm13 = vmmov %vm9853_vm8 }
0x1eb9   :  { %vm9859_vm7 = vmmov %vm9853_vm8 }
0x1eba   :  { %vm9860_vm9 = vmmov %vm9859_vm7 }
0x1f74   :  { %v4962_v1 = vpop.f32.mrf.mxu1 }
0x1f75   :  { %v9585_v23 = vadd.f32 %v8097_v22, %v4962_v1 }
0x1f76   :  { %v7733_v24 = vpop.f32.mrf.mxu1 }
0x1f77   :  { %5135 = vrot.lane.b32.xlu1 %v9585_v23, %s8748_s16  ;;  %4967 = vrot.lane.b32.xlu0 %v9585_v23, %s8741_s11 }
0x1f7b   :  { %5307 = vrot.lane.b32.xlu1 %v9585_v23, %s8743_s17  ;;  %5133 = vrot.lane.b32.xlu0 %v9585_v23, %s8749_s0 }
0x1f7f   :  { %5479 = vrot.lane.b32.xlu1 %v9585_v23, %s8750_s14  ;;  %5305 = vrot.lane.b32.xlu0 %v9585_v23, %s8742_s27 }
0x1f83   :  { %5477 = vrot.lane.b32.xlu0 %v9585_v23, %s8751_s18 }
0x1fe9   :  { %v5136_v25 = vpop.permute.xlu1 %5135  ;;  %v4968_v26 = vpop.permute.xlu0 %4967 }
0x1fea   :  { %7735 = vmatpush3.xpose.msk.msra.mxu0 %vm2000_vm14, %v4968_v26 }
0x1feb   :  { %7744 = vmatprep.subr.mxu0 %v8738_v20 }
0x1fed   :  { %7737 = vmatmul.mubr.msk.f32.vlgmr.msra.gmra.mxu0 %vm2000_vm14, %v9585_v23  ;;  %v5134_v28 = vpop.permute.xlu0 %5133  ;;  %v5308_v29 = vpop.permute.xlu1 %5307 }
0x1fee   :  { %7745 = vmatpush3.xpose.msk.msra.mxu0 %vm2000_vm14, %v5136_v25  ;;  %7746 = vmatprep.mubr.msk.f32.mxu0 %vm8739_vm4, %v8738_v20 }
0x1fef   :  { %7754 = vmatprep.subr.mxu0 %v8738_v20 }
0x1ff1   :  { %7747 = vmatmul.mubr.msk.f32.vlgmr.msra.gmra.mxu0 %vm2000_vm14, %v5134_v28  ;;  %v5306_v30 = vpop.permute.xlu0 %5305  ;;  %v5480_v32 = vpop.permute.xlu1 %5479 }
0x1ff2   :  { %7755 = vmatpush3.xpose.msk.msra.mxu0 %vm2000_vm14, %v5308_v29  ;;  %7756 = vmatprep.mubr.msk.f32.mxu0 %vm8739_vm4, %v8738_v20 }
0x1ff3   :  { %7764 = vmatprep.subr.mxu0 %v8738_v20 }
0x1ff5   :  { %7757 = vmatmul.mubr.msk.f32.vlgmr.msra.gmra.mxu0 %vm2000_vm14, %v5306_v30  ;;  %v5478_v33 = vpop.permute.xlu0 %5477 }
0x1ff6   :  { %7765 = vmatpush3.xpose.msk.msra.mxu0 %vm2000_vm14, %v5480_v32  ;;  %7766 = vmatprep.mubr.msk.f32.mxu0 %vm8739_vm4, %v8738_v20 }
0x1ff7   :  { %7774 = vmatprep.subr.mxu0 %v8738_v20 }
0x1ff9   :  { %7767 = vmatmul.mubr.msk.f32.vlgmr.msra.gmra.mxu0 %vm2000_vm14, %v5478_v33 }
0x1ffa   :  { %7775 = vmatpush3.msra.mxu0 %v8098_v34  ;;  %7782 = vmatprep.mubr.msk.f32.mxu0 %vm8739_vm4, %v8738_v20 }
0x1ffb   :  { %7776 = vmatprep.subr.mxu0 %v8738_v20 }
0x1ffc   :  { %7777 = vmatpush3.msra.mxu0 %v8099_v36  ;;  %v8102_v36 = vld [vmem:[#allocation32 + $0x18] sm:$0xff] }
0x1ffd   :  { %7778 = vmatprep.subr.mxu0 %v8738_v20 }
0x1ffe   :  { %7779 = vmatpush3.msra.mxu0 %v8100_v38  ;;  %v8103_v38 = vld [vmem:[#allocation32 + $0x10] sm:$0xff] }
0x1fff   :  { %7780 = vmatprep.subr.mxu0 %v8738_v20 }
0x2000   :  { %7781 = vmatpush3.msra.mxu0 %v8101_v39  ;;  %v8104_v39 = vld [vmem:[#allocation32 + $0x8] sm:$0xff] }
0x2001   :  { %7796 = vmatprep.subr.mxu0 %v8738_v20 }
0x20ad   :  { %v5039_v59 = vpop.f32.mrf.mxu0 }
0x20ae   :  { %v5043_v40 = vmul.f32 0.17677669, %v5039_v59  ;;  %v8105_v59 = vld [vmem:[#allocation32] sm:$0xff] }
0x20af   :  { %v7738_v42 = vpop.f32.mrf.mxu0 }
0x20b0   :  { %v5044_v37 = vsel %vm2076_vm15, %v5043_v40, -inf }
0x20b1   :  { %5045 = vmax.xlane.f32.xlu1 %v5044_v37  ;;  %v5207_v43 = vpop.f32.mrf.mxu0 }
0x20b2   :  { %v5211_v9 = vmul.f32 0.17677669, %v5207_v43 }
0x20b3   :  { %v7748_v45 = vpop.f32.mrf.mxu0 }
0x20b4   :  { %v5212_v46 = vsel %vm2076_vm15, %v5211_v9, -inf }
0x20b5   :  { %5213 = vmax.xlane.f32.xlu0 %v5212_v46  ;;  %v5379_v31 = vpop.f32.mrf.mxu0 }
0x20b6   :  { %v5383_v47 = vmul.f32 0.17677669, %v5379_v31 }
0x20b7   :  { %v7758_v48 = vpop.f32.mrf.mxu0 }
0x20b8   :  { %v5384_v49 = vsel %vm2076_vm15, %v5383_v47, -inf }
0x20b9   :  { %5385 = vmax.xlane.f32.xlu0 %v5384_v49  ;;  %v5551_v5 = vpop.f32.mrf.mxu0 }
0x20ba   :  { %v5555_v50 = vmul.f32 0.17677669, %v5551_v5 }
0x20bb   :  { %v7768_v52 = vpop.f32.mrf.mxu0 }
0x20bc   :  { %v5556_v53 = vsel %vm2076_vm15, %v5555_v50, -inf }
0x20bd   :  { %5557 = vmax.xlane.f32.xlu1 %v5556_v53 }
0x20ce   :  { %5223 = vrot.lane.b32.xlu1 %v9585_v23, %s8753_s22 }
0x213a   :  { %v5046_v54 = vpop.xlane.xlu1 %5045 }
0x213b   :  { %v5047_v7 = vsub.f32 %v5043_v40, %v5046_v54 }
0x213d   :  { %v5048_v55 = vmul.f32 1.442695, %v5047_v7 }
0x213e   :  { %v5214_v56 = vpop.xlane.xlu0 %5213 }
0x213f   :  { %8031 = vpow2.f32 %v5048_v55  ;;  %v5215_v58 = vsub.f32 %v5211_v9, %v5214_v56 }
0x2141   :  { %v5216_v60 = vmul.f32 1.442695, %v5215_v58  ;;  %v8106_v58 = vld [vmem:[#allocation27] ss:$0 sm:$0xff] }
0x2142   :  { %v5386_v10 = vpop.xlane.xlu0 %5385 }
0x2143   :  { %8033 = vpow2.f32 %v5216_v60  ;;  %v5387_v13 = vsub.f32 %v5383_v47, %v5386_v10  ;;  %v8109_v10 = vld [vmem:[#allocation35 + $0x10] sm:$0xff] }
0x2145   :  { %v5388_v15 = vmul.f32 1.442695, %v5387_v13 }
0x2146   :  { %v5558_v4 = vpop.xlane.xlu1 %5557 }
0x2147   :  { %v5559_v62 = vsub.f32 %v5555_v50, %v5558_v4 }
0x2149   :  { %v5560_v0 = vmul.f32 1.442695, %v5559_v62 }
0x214a   :  { %v5224_v17 = vpop.permute.xlu1 %5223 }
0x214b   :  { %8035 = vpow2.f32 %v5560_v0 }
0x214c   :  { %v8032_v2 = vpop.eup %8031  ;;  %8037 = vpow2.f32 %v5388_v15 }
0x214d   :  { %v5050_v3 = vsel %vm2076_vm15, %v8032_v2, 0.0 }
0x214e   :  { %5051 = vadd.xlane.f32.xlu0 %v5050_v3 }
0x2150   :  { %v8034_v6 = vpop.eup %8033 }
0x2151   :  { %v5218_v8 = vsel %vm2076_vm15, %v8034_v6, 0.0 }
0x2152   :  { %5219 = vadd.xlane.f32.xlu1 %v5218_v8 }
0x2158   :  { %v8036_v35 = vpop.eup %8035 }
0x2159   :  { %v5562_v41 = vsel %vm2076_vm15, %v8036_v35, 0.0  ;;  %v8038_v44 = vpop.eup %8037 }
0x215a   :  { %5563 = vadd.xlane.f32.xlu1 %v5562_v41  ;;  %v5390_v16 = vsel %vm2076_vm15, %v8038_v44, 0.0  ;;  %vm9858_vm15 = vmmov %vm9853_vm8 }
0x2164   :  { %5055 = vrot.lane.b32.xlu0 %v9585_v23, %s8745_s21 }
0x216b   :  { %5395 = vrot.lane.b32.xlu1 %v9585_v23, %s8747_s3 }
0x2183   :  { %5391 = vadd.xlane.f32.xlu0 %v5390_v16 }
0x2199   :  { %5567 = vrot.lane.b32.xlu0 %v9585_v23, %s8752_s4 }
0x21d7   :  { %v5052_v18 = vpop.xlane.xlu0 %5051 }
0x21d8   :  { %8039 = vrcp.f32 %v5052_v18 }
0x21db   :  { %v5220_v19 = vpop.xlane.xlu1 %5219  ;;  %v5056_v21 = vpop.permute.xlu0 %5055 }
0x21dc   :  { %8041 = vrcp.f32 %v5220_v19  ;;  %7740 = vmatpush3.msk.msra.mxu1 %vm471_vm0, %v5056_v21 }
0x21dd   :  { %7749 = vmatprep.subr.mxu1 %v8738_v20 }
0x21e3   :  { %v5564_v1 = vpop.xlane.xlu1 %5563 }
0x21e5   :  { %v8040_v14 = vpop.eup %8039 }
0x21e6   :  { %v5054_v22 = vmul.f32 %v8040_v14, %v8032_v2  ;;  %v8107_v2 = vld [vmem:[#allocation33] ss:$0 sm:$0xff] }
0x21e7   :  { %v5396_v26 = vpop.permute.xlu1 %5395 }
0x21e8   :  { %7742 = vmatmul.mubr.msk.f32.vlgmr.msra.gmra.mxu1 %vm464_vm1, %v5054_v22 }
0x21e9   :  { %v8042_v24 = vpop.eup %8041  ;;  %7750 = vmatpush3.msk.msra.mxu1 %vm471_vm0, %v5224_v17  ;;  %7751 = vmatprep.mubr.msk.f32.mxu1 %vm8739_vm4, %v8738_v20 }
0x21ea   :  { %7759 = vmatprep.subr.mxu1 %v8738_v20  ;;  %v5222_v25 = vmul.f32 %v8042_v24, %v8034_v6 }
0x21ec   :  { %7752 = vmatmul.mubr.msk.f32.vlgmr.msra.gmra.mxu1 %vm464_vm1, %v5222_v25 }
0x21ed   :  { %7760 = vmatpush3.msk.msra.mxu1 %vm471_vm0, %v5396_v26  ;;  %7761 = vmatprep.mubr.msk.f32.mxu1 %vm8739_vm4, %v8738_v20 }
0x21ee   :  { %7769 = vmatprep.subr.mxu1 %v8738_v20 }
0x220c   :  { %v5392_v28 = vpop.xlane.xlu0 %5391 }
0x220d   :  { %8043 = vrcp.f32 %v5392_v28 }
0x220e   :  { %8045 = vrcp.f32 %v5564_v1 }
0x2210   :  { %v5568_v33 = vpop.permute.xlu0 %5567 }
0x221a   :  { %v8044_v29 = vpop.eup %8043 }
0x221b   :  { %v5394_v30 = vmul.f32 %v8044_v29, %v8038_v44  ;;  %v8046_v32 = vpop.eup %8045 }
0x221c   :  { %v5566_v34 = vmul.f32 %v8046_v32, %v8036_v35 }
0x221d   :  { %7762 = vmatmul.mubr.msk.f32.vlgmr.msra.gmra.mxu1 %vm464_vm1, %v5394_v30 }
0x221e   :  { %7770 = vmatpush3.msk.msra.mxu1 %vm471_vm0, %v5568_v33  ;;  %7771 = vmatprep.mubr.msk.f32.mxu1 %vm8739_vm4, %v8738_v20 }
0x221f   :  { %7785 = vmatprep.subr.mxu1 %v8738_v20 }
0x2221   :  { %7772 = vmatmul.mubr.msk.f32.vlgmr.msra.gmra.mxu1 %vm464_vm1, %v5566_v34 }
0x2222   :  { %7786 = vmatpush3.msra.mxu1 %v8102_v36  ;;  %7793 = vmatprep.mubr.msk.f32.mxu1 %vm8739_vm4, %v8738_v20 }
0x2223   :  { %7787 = vmatprep.subr.mxu1 %v8738_v20 }
0x2224   :  { %7788 = vmatpush3.msra.mxu1 %v8103_v38 }
0x2225   :  { %7789 = vmatprep.subr.mxu1 %v8738_v20 }
0x2226   :  { %7790 = vmatpush3.msra.mxu1 %v8104_v39 }
0x2227   :  { %7791 = vmatprep.subr.mxu1 %v8738_v20 }
0x2228   :  { %7792 = vmatpush3.msra.mxu1 %v8105_v59 }
0x2229   :  { %7801 = vmatprep.subr.mxu1 %v8738_v20 }
0x22a8   :  { %v5128_v40 = vpop.f32.mrf.mxu1 }
0x22a9   :  { %v5132_v50 = vadd.f32 %v5128_v40, %v9585_v23 }
0x22aa   :  { %v7743_v42 = vpop.f32.mrf.mxu1 }
0x22ac   :  { %v5296_v37 = vpop.f32.mrf.mxu1 }
0x22ad   :  { %5301 = vrot.lane.b32.xlu1 %v5296_v37, %s8725_s2 }
0x22ae   :  { %v7753_v43 = vpop.f32.mrf.mxu1 }
0x22dd   :  { %v5468_v9 = vpop.f32.mrf.mxu1 }
0x22de   :  { %5473 = vrot.lane.b32.xlu0 %v5468_v9, %s8746_s15 }
0x22df   :  { %v7763_v45 = vpop.f32.mrf.mxu1 }
0x22e1   :  { %v5640_v46 = vpop.f32.mrf.mxu1 }
0x22e2   :  { %5645 = vrot.lane.b32.xlu1 %v5640_v46, %s8754_s19 }
0x22e3   :  { %v7773_v31 = vpop.f32.mrf.mxu1 }
0x231f   :  { %v5302_v47 = vpop.permute.xlu1 %5301 }
0x2320   :  { %v5304_v49 = vadd.f32 %v5302_v47, %v9585_v23 }
0x2322   :  { %v5649_v53 = vsel %vm2000_vm14, %v5132_v50, %v5304_v49 }
0x2350   :  { %v5474_v48 = vpop.permute.xlu0 %5473 }
0x2351   :  { %v5476_v5 = vadd.f32 %v5474_v48, %v9585_v23 }
0x2353   :  { %v5650_v7 = vsel %vm557_vm2, %v5649_v53, %v5476_v5 }
0x2354   :  { %v5646_v52 = vpop.permute.xlu1 %5645 }
0x2355   :  { %v5648_v54 = vadd.f32 %v5646_v52, %v9585_v23 }
0x2357   :  { %v5651_v55 = vsel %vm2684_vm5, %v5650_v7, %v5648_v54 }
0x2358   :  { %7783 = vmatmul.mubr.msk.f32.vlgmr.msra.gmra.mxu0 %vm645_vm3, %v5651_v55 }
0x2359   :  { %7798 = vmatprep.mubr.msk.f32.mxu0 %vm8739_vm4, %v8738_v20 }
0x2418   :  { %v5721_v56 = vpop.f32.mrf.mxu0 }
0x2419   :  { %v5722_v60 = vadd.f32 %v8106_v58, %v5721_v56 }
0x241a   :  { %v7784_v4 = vpop.f32.mrf.mxu0 }
0x241b   :  { %v5725_v62 = vmax.f32 %v5722_v60, 0.0 }
0x241d   :  { %v5726_v0 = vadd.f32 %v5725_v62, %v5651_v55 }
0x241f   :  { %7794 = vmatmul.mubr.msk.f32.vlgmr.msra.gmra.mxu1 %vm645_vm3, %v5726_v0 }
0x2420   :  { %7803 = vmatprep.mubr.msk.f32.mxu1 %vm8739_vm4, %v8738_v20 }
0x24df   :  { %v5796_v23 = vpop.f32.mrf.mxu1 }
0x24e0   :  { %v9682_v3 = vadd.f32 %v8107_v2, %v5796_v23  ;;  %v8110_v23 = vld [vmem:[#allocation38 + $0x18] sm:$0xff]  ;;  %v8111_v2 = vld [vmem:[#allocation38 + $0x10] sm:$0xff] }
0x24e1   :  { %v7795_v6 = vpop.f32.mrf.mxu1 }
0x24e2   :  { %6131 = vrot.lane.b32.xlu1 %v9682_v3, %s8742_s27  ;;  %5963 = vrot.lane.b32.xlu0 %v9682_v3, %s8749_s0  ;;  %v8113_v6 = vld [vmem:[#allocation38] sm:$0xff] }
0x24e3   :  { %7797 = vmatpush3.xpose.msk.msra.mxu0 %vm2000_vm14, %v9682_v3 }
0x24e4   :  { %7806 = vmatprep.subr.mxu0 %v8738_v20 }
0x24e6   :  { %7799 = vmatmul.mubr.msk.f32.vlgmr.msra.gmra.mxu0 %vm2000_vm14, %v9303_v51  ;;  %6299 = vrot.lane.b32.xlu0 %v9682_v3, %s8751_s18 }
0x24e7   :  { %7808 = vmatprep.mubr.msk.f32.mxu0 %vm8739_vm4, %v8738_v20 }
0x2554   :  { %v5964_v8 = vpop.permute.xlu0 %5963  ;;  %v6132_v35 = vpop.permute.xlu1 %6131 }
0x2555   :  { %7807 = vmatpush3.xpose.msk.msra.mxu0 %vm2000_vm14, %v5964_v8 }
0x2556   :  { %7816 = vmatprep.subr.mxu0 %v8738_v20 }
0x2558   :  { %7809 = vmatmul.mubr.msk.f32.vlgmr.msra.gmra.mxu0 %vm2000_vm14, %v9326_v57  ;;  %v6300_v41 = vpop.permute.xlu0 %6299  ;;  %v8108_v57 = vld [vmem:[#allocation35 + $0x18] sm:$0xff] }
0x2559   :  { %7817 = vmatpush3.xpose.msk.msra.mxu0 %vm2000_vm14, %v6132_v35  ;;  %7818 = vmatprep.mubr.msk.f32.mxu0 %vm8739_vm4, %v8738_v20 }
0x255a   :  { %7826 = vmatprep.subr.mxu0 %v8738_v20 }
0x255c   :  { %7819 = vmatmul.mubr.msk.f32.vlgmr.msra.gmra.mxu0 %vm2000_vm14, %v9332_v61 }
0x255d   :  { %7827 = vmatpush3.xpose.msk.msra.mxu0 %vm2000_vm14, %v6300_v41  ;;  %7828 = vmatprep.mubr.msk.f32.mxu0 %vm8739_vm4, %v8738_v20 }
0x255e   :  { %7836 = vmatprep.subr.mxu0 %v8738_v20 }
0x2560   :  { %7829 = vmatmul.mubr.msk.f32.vlgmr.msra.gmra.mxu0 %vm2000_vm14, %v9344_v63 }
0x2561   :  { %7837 = vmatpush3.msra.mxu0 %v8108_v57  ;;  %7844 = vmatprep.mubr.msk.f32.mxu0 %vm8739_vm4, %v8738_v20 }
0x2562   :  { %7838 = vmatprep.subr.mxu0 %v8738_v20 }
0x2563   :  { %7839 = vmatpush3.msra.mxu0 %v8109_v10 }
0x2564   :  { %7840 = vmatprep.subr.mxu0 %v8738_v20 }
0x2565   :  { %7841 = vmatpush3.msra.mxu0 %v9388_v11 }
0x2566   :  { %7842 = vmatprep.subr.mxu0 %v8738_v20 }
0x2567   :  { %7843 = vmatpush3.msra.mxu0 %v9392_v12 }
0x2568   :  { %7858 = vmatprep.subr.mxu0 %v8738_v20 }
0x25a6   :  { %v5869_v61 = vpop.f32.mrf.mxu0 }
0x25a7   :  { %v5873_v63 = vmul.f32 0.17677669, %v5869_v61 }
0x25a8   :  { %v7800_v13 = vpop.f32.mrf.mxu0 }
0x25a9   :  { %v5874_v15 = vsel %vm9853_vm8, %v5873_v63, -inf }
0x25aa   :  { %5875 = vmax.xlane.f32.xlu1 %v5874_v15  ;;  %v9765_v15 = vld [vmem:[%s8929_s8] sm:$0x1] }
0x2618   :  { %v6033_v44 = vpop.f32.mrf.mxu0 }
0x2619   :  { %v6037_v16 = vmul.f32 0.17677669, %v6033_v44  ;;  %v3971_v44 = vadd.f32 %v9469_v27, %v9765_v15 }
0x261a   :  { %v7810_v17 = vpop.f32.mrf.mxu0 }
0x261b   :  { %v6038_v18 = vsel %vm9854_vm10, %v6037_v16, -inf }
0x261c   :  { %6039 = vmax.xlane.f32.xlu0 %v6038_v18  ;;  %v6201_v19 = vpop.f32.mrf.mxu0 }
0x261d   :  { %v6205_v11 = vmul.f32 0.17677669, %v6201_v19 }
0x261e   :  { %v7820_v21 = vpop.f32.mrf.mxu0 }
0x261f   :  { %v6206_v14 = vsel %vm9855_vm11, %v6205_v11, -inf }
0x2620   :  { %6207 = vmax.xlane.f32.xlu0 %v6206_v14  ;;  %v6369_v12 = vpop.f32.mrf.mxu0 }
0x2621   :  { %v6373_v1 = vmul.f32 0.17677669, %v6369_v12 }
0x2622   :  { %v7830_v22 = vpop.f32.mrf.mxu0 }
0x2623   :  { %v6374_v24 = vsel %vm9856_vm12, %v6373_v1, -inf }
0x2624   :  { %6375 = vmax.xlane.f32.xlu1 %v6374_v24  ;;  %v8114_v24 = vld [vmem:[#allocation41 + $0x18] sm:$0xff] }
0x2633   :  { %v5876_v25 = vpop.xlane.xlu1 %5875 }
0x2634   :  { %v5877_v26 = vsub.f32 %v5873_v63, %v5876_v25  ;;  %v8115_v25 = vld [vmem:[#allocation41 + $0x10] sm:$0xff] }
0x2635   :  { %6049 = vrot.lane.b32.xlu1 %v9682_v3, %s8748_s16 }
0x2636   :  { %v5878_v28 = vmul.f32 1.442695, %v5877_v26  ;;  %v8116_v26 = vld [vmem:[#allocation41 + $0x8] sm:$0xff] }
0x2638   :  { %8047 = vpow2.f32 %v5878_v28 }
0x2645   :  { %v8048_v29 = vpop.eup %8047 }
0x2646   :  { %v5880_v30 = vsel %vm9857_vm13, %v8048_v29, 0.0 }
0x2647   :  { %5881 = vadd.xlane.f32.xlu0 %v5880_v30 }
0x265d   :  { %5885 = vrot.lane.b32.xlu0 %v9682_v3, %s8741_s11 }
0x26a5   :  { %v6040_v32 = vpop.xlane.xlu0 %6039 }
0x26a6   :  { %v6041_v33 = vsub.f32 %v6037_v16, %v6040_v32 }
0x26a8   :  { %v6042_v34 = vmul.f32 1.442695, %v6041_v33 }
0x26a9   :  { %v6208_v36 = vpop.xlane.xlu0 %6207 }
0x26aa   :  { %8049 = vpow2.f32 %v6042_v34  ;;  %v6209_v38 = vsub.f32 %v6205_v11, %v6208_v36  ;;  %v8118_v36 = vld [vmem:[#allocation36] sm:$0x1] }
0x26ac   :  { %v6210_v39 = vmul.f32 1.442695, %v6209_v38 }
0x26ad   :  { %v6376_v59 = vpop.xlane.xlu1 %6375 }
0x26ae   :  { %8051 = vpow2.f32 %v6210_v39  ;;  %v6377_v40 = vsub.f32 %v6373_v1, %v6376_v59 }
0x26b0   :  { %v6378_v42 = vmul.f32 1.442695, %v6377_v40 }
0x26b1   :  { %v6050_v50 = vpop.permute.xlu1 %6049 }
0x26b2   :  { %8053 = vpow2.f32 %v6378_v42  ;;  %v8119_v42 = vld [vmem:[%s9852_s29 + $0x18] sm:$0xff] }
0x26b7   :  { %v8050_v37 = vpop.eup %8049 }
0x26b8   :  { %v6044_v43 = vsel %vm9858_vm15, %v8050_v37, 0.0 }
0x26b9   :  { %6045 = vadd.xlane.f32.xlu1 %v6044_v43  ;;  %v8121_v43 = vld [vmem:[%s9852_s29 + $0x8] sm:$0xff] }
0x26bb   :  { %v8052_v9 = vpop.eup %8051 }
0x26bc   :  { %v6212_v45 = vsel %vm9859_vm7, %v8052_v9, 0.0 }
0x26bd   :  { %6213 = vadd.xlane.f32.xlu0 %v6212_v45 }
0x26bf   :  { %v8054_v46 = vpop.eup %8053 }
0x26c0   :  { %v6380_v31 = vsel %vm9860_vm9, %v8054_v46, 0.0 }
0x26c1   :  { %6381 = vadd.xlane.f32.xlu1 %v6380_v31 }
0x26d0   :  { %v5882_v47 = vpop.xlane.xlu0 %5881 }
0x26d1   :  { %8055 = vrcp.f32 %v5882_v47 }
0x26d2   :  { %6217 = vrot.lane.b32.xlu1 %v9682_v3, %s8743_s17 }
0x26d3   :  { %6385 = vrot.lane.b32.xlu0 %v9682_v3, %s8750_s14  ;;  %v8112_v3 = vld [vmem:[#allocation38 + $0x8] sm:$0xff] }
0x26d4   :  { %v5886_v48 = vpop.permute.xlu0 %5885 }
0x26d5   :  { %7802 = vmatpush3.msk.msra.mxu1 %vm471_vm0, %v5886_v48  ;;  %v8124_v48 = vld [vmem:[%s8924_s13 + $0x8] sm:$0xff] }
0x26d6   :  { %7811 = vmatprep.subr.mxu1 %v8738_v20 }
0x26de   :  { %v8056_v49 = vpop.eup %8055 }
0x26df   :  { %v5884_v5 = vmul.f32 %v8056_v49, %v8048_v29  ;;  %v8125_v49 = vld [vmem:[%s8924_s13] sm:$0xff]  ;;  %s8755_s13 = smov [#allocation44]  }
0x26e1   :  { %7804 = vmatmul.mubr.msk.f32.vlgmr.msra.gmra.mxu1 %vm464_vm1, %v5884_v5 }
0x26e2   :  { %7812 = vmatpush3.msk.msra.mxu1 %vm471_vm0, %v6050_v50  ;;  %7813 = vmatprep.mubr.msk.f32.mxu1 %vm8739_vm4, %v8738_v20  ;;  %v8126_v50 = vld [vmem:[#allocation42] sm:$0x1] }
0x26e3   :  { %7821 = vmatprep.subr.mxu1 %v8738_v20 }
0x2742   :  { %v6046_v52 = vpop.xlane.xlu1 %6045 }
0x2743   :  { %8057 = vrcp.f32 %v6046_v52 }
0x2746   :  { %v6214_v53 = vpop.xlane.xlu0 %6213 }
0x2747   :  { %8059 = vrcp.f32 %v6214_v53 }
0x274a   :  { %v6382_v54 = vpop.xlane.xlu1 %6381  ;;  %v6386_v4 = vpop.permute.xlu0 %6385 }
0x274b   :  { %8061 = vrcp.f32 %v6382_v54 }
0x274e   :  { %v6218_v56 = vpop.permute.xlu1 %6217 }
0x2750   :  { %v8058_v7 = vpop.eup %8057 }
0x2751   :  { %v6048_v55 = vmul.f32 %v8058_v7, %v8050_v37  ;;  %v8120_v37 = vld [vmem:[%s9852_s29 + $0x10] sm:$0xff] }
0x2753   :  { %7814 = vmatmul.mubr.msk.f32.vlgmr.msra.gmra.mxu1 %vm464_vm1, %v6048_v55  ;;  %v8127_v55 = vld [vmem:[%s8919_s25] sm:$0x1]  ;;  %s6864_s25 = sshll.u32 %s8755_s13, 4  ;;  %s6865_s25 = int_to_ptr.vmem [resolvable:$true] %s6864_s25 }
0x2754   :  { %v8060_v58 = vpop.eup %8059  ;;  %7822 = vmatpush3.msk.msra.mxu1 %vm471_vm0, %v6218_v56  ;;  %7823 = vmatprep.mubr.msk.f32.mxu1 %vm8739_vm4, %v8738_v20  ;;  %s8624_s8 = scalar_lea.vmem %s6865_s25, 32  ;;  %p8629_p9 = scmp.lt.s32.totalorder %s6865_s25, %s6865_s25 }
0x2755   :  { %7831 = vmatprep.subr.mxu1 %v8738_v20  ;;  %v6216_v60 = vmul.f32 %v8060_v58, %v8052_v9  ;;  %v8122_v9 = vld [vmem:[%s9852_s29] sm:$0xff]  ;;  %p8625_p8 = scmp.ne.s32.totalorder %s6865_s25, %s8624_s8  ;;  %p8630_p10 = scmp.lt.s32.totalorder %s8624_s8, %s8624_s8 }
0x2757   :  { %7824 = vmatmul.mubr.msk.f32.vlgmr.msra.gmra.mxu1 %vm464_vm1, %v6216_v60  ;;  %p8631_p11 = por %p8630_p10, %p8629_p9 }
0x2758   :  { %v8062_v62 = vpop.eup %8061  ;;  %7832 = vmatpush3.msk.msra.mxu1 %vm471_vm0, %v6386_v4  ;;  %7833 = vmatprep.mubr.msk.f32.mxu1 %vm8739_vm4, %v8738_v20  ;;  %vm3974_vm0 = vcmask 32768  }
0x2759   :  { %v6384_v0 = vmul.f32 %v8062_v62, %v8054_v46  ;;  %7847 = vmatprep.subr.mxu1 %v8738_v20  ;;  %v3975_v16 = vsel %vm3974_vm0, %v3971_v44, -inf  ;;  %v8123_v46 = vld [vmem:[#allocation39] sm:$0x1]  ;;  %p8632_p12 = pnand %p8631_p11, %p8625_p8 }
0x275b   :  { %7834 = vmatmul.mubr.msk.f32.vlgmr.msra.gmra.mxu1 %vm464_vm1, %v6384_v0  ;;  %vm6854_vm1 = vcmask 1040384  }
0x275c   :  { %7848 = vmatpush3.msra.mxu1 %v8110_v23  ;;  %7855 = vmatprep.mubr.msk.f32.mxu1 %vm8739_vm4, %v8738_v20 }
0x275d   :  { %7849 = vmatprep.subr.mxu1 %v8738_v20 }
0x275e   :  { %7850 = vmatpush3.msra.mxu1 %v8111_v2 }
0x275f   :  { %7851 = vmatprep.subr.mxu1 %v8738_v20 }
0x2760   :  { %7852 = vmatpush3.msra.mxu1 %v8112_v3 }
0x2761   :  { %7853 = vmatprep.subr.mxu1 %v8738_v20 }
0x2762   :  { %7854 = vmatpush3.msra.mxu1 %v8113_v6 }
0x2763   :  { %7869 = vmatprep.subr.mxu1 %v8738_v20 }
0x27a1   :  { %v5958_v8 = vpop.f32.mrf.mxu1 }
0x27a2   :  { %v5962_v21 = vadd.f32 %v5958_v8, %v9303_v51 }
0x27a3   :  { %v7805_v35 = vpop.f32.mrf.mxu1 }
0x2813   :  { %v6122_v41 = vpop.f32.mrf.mxu1 }
0x2814   :  { %6127 = vrot.lane.b32.xlu1 %v6122_v41, %s8725_s2 }
0x2815   :  { %v7815_v57 = vpop.f32.mrf.mxu1 }
0x2817   :  { %v6290_v10 = vpop.f32.mrf.mxu1 }
0x2818   :  { %6295 = vrot.lane.b32.xlu0 %v6290_v10, %s8746_s15 }
0x2819   :  { %v7825_v61 = vpop.f32.mrf.mxu1 }
0x281b   :  { %v6458_v63 = vpop.f32.mrf.mxu1 }
0x281c   :  { %6463 = vrot.lane.b32.xlu1 %v6458_v63, %s8754_s19 }
0x281d   :  { %v7835_v13 = vpop.f32.mrf.mxu1 }
0x2837   :  { %3976 = vmax.xlane.f32.xlu0 %v3975_v16 }
0x2886   :  { %v6128_v17 = vpop.permute.xlu1 %6127 }
0x2887   :  { %v6130_v19 = vadd.f32 %v6128_v17, %v9303_v51 }
0x2889   :  { %v6467_v12 = vsel %vm2000_vm14, %v5962_v21, %v6130_v19 }
0x288a   :  { %v6296_v18 = vpop.permute.xlu0 %6295 }
0x288b   :  { %v6298_v11 = vadd.f32 %v6296_v18, %v9303_v51 }
0x288d   :  { %v6468_v22 = vsel %vm557_vm2, %v6467_v12, %v6298_v11 }
0x288e   :  { %v6464_v14 = vpop.permute.xlu1 %6463 }
0x288f   :  { %v6466_v1 = vadd.f32 %v6464_v14, %v9303_v51  ;;  %v8117_v51 = vld [vmem:[#allocation41] sm:$0xff] }
0x2891   :  { %v6469_v27 = vsel %vm2684_vm5, %v6468_v22, %v6466_v1 }
0x2892   :  { %7845 = vmatmul.mubr.msk.f32.vlgmr.msra.gmra.mxu0 %vm645_vm3, %v6469_v27 }
0x2893   :  { %7859 = vmatpush3.msra.mxu0 %v8114_v24  ;;  %7866 = vmatprep.mubr.msk.f32.mxu0 %vm8739_vm4, %v8738_v20 }
0x2894   :  { %7860 = vmatprep.subr.mxu0 %v8738_v20 }
0x2895   :  { %7861 = vmatpush3.msra.mxu0 %v8115_v25 }
0x2896   :  { %7862 = vmatprep.subr.mxu0 %v8738_v20 }
0x2897   :  { %7863 = vmatpush3.msra.mxu0 %v8116_v26 }
0x2898   :  { %7864 = vmatprep.subr.mxu0 %v8738_v20 }
0x2899   :  { %7865 = vmatpush3.msra.mxu0 %v8117_v51 }
0x289a   :  { %7880 = vmatprep.subr.mxu0 %v8738_v20 }
0x28c0   :  { %v3977_v28 = vpop.xlane.xlu0 %3976 }
0x28c1   :  { %v9784_v29 = vsub.f32 %v3971_v44, %v3977_v28 }
0x28c3   :  { %v3979_v30 = vmul.f32 1.442695, %v9784_v29 }
0x28c5   :  { %8063 = vpow2.f32 %v3979_v30 }
0x28d2   :  { %v8064_v32 = vpop.eup %8063 }
0x28d3   :  { %v3981_v33 = vsel %vm3974_vm0, %v8064_v32, 0.0 }
0x28d4   :  { %3982 = vadd.xlane.f32.xlu1 %v3981_v33 }
0x2952   :  { %v6539_v34 = vpop.f32.mrf.mxu0 }
0x2953   :  { %v6540_v38 = vadd.f32 %v8118_v36, %v6539_v34 }
0x2954   :  { %v7846_v39 = vpop.f32.mrf.mxu0 }
0x2955   :  { %v6543_v59 = vmax.f32 %v6540_v38, 0.0 }
0x2957   :  { %v6544_v40 = vadd.f32 %v6543_v59, %v6469_v27 }
0x2959   :  { %7856 = vmatmul.mubr.msk.f32.vlgmr.msra.gmra.mxu1 %vm645_vm3, %v6544_v40 }
0x295a   :  { %7870 = vmatpush3.msra.mxu1 %v8119_v42  ;;  %7877 = vmatprep.mubr.msk.f32.mxu1 %vm8739_vm4, %v8738_v20 }
0x295b   :  { %7871 = vmatprep.subr.mxu1 %v8738_v20 }
0x295c   :  { %7872 = vmatpush3.msra.mxu1 %v8120_v37 }
0x295d   :  { %7873 = vmatprep.subr.mxu1 %v8738_v20  ;;  %v3983_v35 = vpop.xlane.xlu1 %3982 }
0x295e   :  { %7874 = vmatpush3.msra.mxu1 %v8121_v43 }
0x295f   :  { %7875 = vmatprep.subr.mxu1 %v8738_v20 }
0x2960   :  { %7876 = vmatpush3.msra.mxu1 %v8122_v9 }
0x2a19   :  { %v6614_v45 = vpop.f32.mrf.mxu1 }
0x2a1a   :  { %v6615_v31 = vadd.f32 %v8123_v46, %v6614_v45 }
0x2a1b   :  { %v7857_v47 = vpop.f32.mrf.mxu1 }
0x2a1c   :  { %7867 = vmatmul.mubr.msk.f32.vlgmr.msra.gmra.mxu0 %vm645_vm3, %v6615_v31 }
0x2a1d   :  { %7881 = vmatpush3.msra.mxu0 %v8124_v48  ;;  %7884 = vmatprep.mubr.msk.f32.mxu0 %vm8739_vm4, %v8738_v20 }
0x2a1e   :  { %7882 = vmatprep.subr.mxu0 %v8738_v20 }
0x2a1f   :  { %7883 = vmatpush3.msra.mxu0 %v8125_v49 }
0x2adc   :  { %v6687_v5 = vpop.f32.mrf.mxu0 }
0x2add   :  { %v6688_v52 = vadd.f32 %v8126_v50, %v6687_v5 }
0x2ade   :  { %v7868_v53 = vpop.f32.mrf.mxu0 }
0x2adf   :  { %v6691_v54 = vmax.f32 %v6688_v52, 0.0 }
0x2ae1   :  { %7878 = vmatmul.mubr.msk.f32.vlgmr.msra.gmra.mxu1 %vm645_vm3, %v6691_v54 }
0x2ba1   :  { %v6761_v7 = vpop.f32.mrf.mxu1 }
0x2ba2   :  { %v6762_v56 = vadd.f32 %v8127_v55, %v6761_v7 }
0x2ba3   :  { %v7879_v58 = vpop.f32.mrf.mxu1 }
0x2ba4   :  { %v6765_v60 = vmax.f32 %v6762_v56, 0.0 }
0x2ba6   :  { %7885 = vmatmul.mubr.msk.f32.vlgmr.msra.gmra.mxu0 %vm557_vm2, %v6765_v60  ;;  %vm6856_vm2 = vcmask 33792  }
0x2c66   :  { %v6835_v4 = vpop.f32.mrf.mxu0 }
0x2c67   :  { %v6836_v62 = vadd.f32 %v6835_v4, %v9765_v15 }
0x2c68   :  { %v7886_v20 = vpop.f32.mrf.mxu0 }
0x2c69   :  { %v6839_v0 = vsel %vm3974_vm0, %v6836_v62, -inf }
0x2c6a   :  { %6840 = vmax.xlane.f32.xlu0 %v6839_v0 }
0x2cf3   :  { %v6841_v23 = vpop.xlane.xlu0 %6840 }
0x2cf4   :  { %v6842_v2 = vsub.f32 %v6836_v62, %v6841_v23 }
0x2cf6   :  { %v6843_v3 = vmul.f32 1.442695, %v6842_v2 }
0x2cf8   :  { %8065 = vpow2.f32 %v6843_v3 }
0x2cf9   :  { %8067 = vlog2.f32 %v3983_v35 }
0x2d05   :  { %v8066_v6 = vpop.eup %8065 }
0x2d06   :  { %v6845_v8 = vsel %vm3974_vm0, %v8066_v6, 0.0  ;;  %v8068_v57 = vpop.eup %8067 }
0x2d07   :  { %6846 = vadd.xlane.f32.xlu0 %v6845_v8  ;;  %v3985_v61 = vmul.f32 0.6931472, %v8068_v57 }
0x2d09   :  { %v3986_v15 = vsub.f32 %v9784_v29, %v3985_v61 }
0x2d90   :  { %v6847_v41 = vpop.xlane.xlu0 %6846 }
0x2d91   :  { %8069 = vlog2.f32 %v6847_v41 }
0x2d9e   :  { %v8070_v10 = vpop.eup %8069 }
0x2d9f   :  { %v6849_v63 = vmul.f32 0.6931472, %v8070_v10 }
0x2da1   :  { %v6850_v13 = vsub.f32 %v6842_v2, %v6849_v63 }
0x2da3   :  { %v6852_v44 = vrot.slane %v6850_v13, 7 }
0x2da5   :  { %v6855_v16 = vsel %vm6854_vm1, %v3986_v15, %v6852_v44 }
0x2da6   :  { %6857 = vst.msk [vmem:[#allocation44] sm:$0x3] %vm6856_vm2, %v6855_v16 }
0x2da7   :  { %8635 = shalt.err (!%p8632_p12)
}
0x2da8   :  { %6867 = dma.vmem_to_hbm [thread:$0]  %s6865_s25, 32, %s8934_s20, [#allocation4]  }
0x2da9   :  { %8674 = dma.done.wait [#allocation4], 32  }
0x2daa   :  { %8675 = vsyncadd [#allocation4], 4294967264 }
0x2dab   :  { %6871 = vsyncpa [#allocation3], 1 }
0x2dac   :  { %6872 = vsyncpa [#allocation10], 1 }
0x2dad   :  { %6873 = vsyncpa [#allocation13], 1 }
0x2dae   :  { %6874 = vsyncpa [#allocation16], 1 }
0x2daf   :  { %6875 = vsyncpa [#allocation19], 1 }
0x2db0   :  { %6876 = vsyncpa [#allocation22], 1 }
0x2db1   :  { %6877 = vsyncpa [#allocation25], 1 }
0x2db2   :  { %6878 = vsyncpa [#allocation28], 1 }
0x2db3   :  { %6879 = vsyncpa [#allocation31], 1 }
0x2db4   :  { %6880 = vsyncpa [#allocation34], 1 }
0x2db5   :  { %6881 = vsyncpa [#allocation37], 1 }
0x2db6   :  { %6882 = vsyncpa [#allocation40], 1 }
0x2db7   :  { %6883 = vsyncpa [#allocation43], 1 }
0x2db8   :  { %6884 = vsyncpa [#allocation4], 1 }
0x2db9   :  { %6885 = vsyncpa [#allocation5], 1 }
0x2dba   :  { %6886 = vsyncpa [#allocation7], 1 }

</bundles_post_ra>
